<compile_context>
chip_gen: v7x
topology: tpu7x:2x2x1
jax: 0.10.0
libtpu: 0.0.40
codegen_flags: <defaults>
</compile_context>

<pallas_src>
import functools

import jax
import jax.numpy as jnp
import numpy as np
from jax.experimental import pallas as pl
from jax.experimental.pallas import tpu as pltpu

ALPHA = 1000.0
PAD_DIST = 1e30          # sentinel squared-distance for padded (fake) lanes
LANE = 128


def _round_up(n, m):
    return ((n + m - 1) // m) * m


def _choose_batch_tile(batch, requested):
    """Largest batch tile <= requested, multiple of 8, leaving >= 2 grid steps
    when the batch allows it (v7x: 2 TensorCores need >= 2 parallel steps)."""
    half = max(8, _round_up(-(-batch // 2), 8))
    tb = min(_round_up(requested, 8), half)
    return max(tb, 8)


def deep_kmeans_kernel(x_ref, w_enc_ref, b_enc_ref, w_dec_ref, b_dec_ref,
                       reps_t_ref, reps_sq_ref,
                       packed_ref, recon_ref, *, n_clusters):
    """One batch tile of the fused DeepKMeans forward.

    Packed-lane layout of `packed_ref` (built by prepare_params):
      lanes [0, K)        -> weighted_dists
      lanes [K, 2K)       -> distances
      lanes [2K, 2K+E)    -> embeddings
      lanes [2K+E, 128)   -> zeros
    Cluster-rep columns are duplicated into [0,K) and [K,2K); lanes >= 2K of
    reps_sq carry PAD_DIST so they never win the min and their exps are 0.
    """
    k = n_clusters
    hi = jax.lax.Precision.HIGHEST

    x = x_ref[...]                                                # [TB, Dp]

    # ---- synthetic linear autoencoder (MXU, explicit f32 precision) ----
    emb = jnp.dot(x, w_enc_ref[...], precision=hi,
                  preferred_element_type=jnp.float32) + b_enc_ref[...]    # [TB, L]
    recon = jnp.dot(emb, w_dec_ref[...], precision=hi,
                    preferred_element_type=jnp.float32) + b_dec_ref[...]  # [TB, Dp]

    # ---- squared distances via ||e||^2 + ||r||^2 - 2 e.r (MXU) ----
    # Non-embedding lanes of `emb` are exactly 0 (zero weight cols + zero
    # bias), so the full-lane sum of squares is exact.
    emb_sq = jnp.sum(emb * emb, axis=-1, keepdims=True)           # [TB, 1]
    cross = jnp.dot(emb, reps_t_ref[...], precision=hi,
                    preferred_element_type=jnp.float32)           # [TB, L]
    dist = jnp.maximum(emb_sq + reps_sq_ref[...] - 2.0 * cross, 0.0)

    # ---- shifted exponentials & softmax-weighted distances ----
    min_dist = jnp.min(dist, axis=-1, keepdims=True)              # PAD lanes never win
    exps = jnp.exp(-ALPHA * (dist - min_dist))                    # 0 at PAD lanes
    sum_exps = jnp.sum(exps, axis=-1, keepdims=True)              # = 2 * true sum (dup lanes)
    inv_sum = 2.0 * pl.reciprocal(sum_exps, approx=True)          # EUP slot, off VALU
    weighted = dist * exps * inv_sum

    # ---- assemble the packed lane-dense output slab ----
    lane = jax.lax.broadcasted_iota(jnp.int32, packed_ref.shape, 1)
    packed_ref[...] = jnp.where(lane < k, weighted,
                                jnp.where(lane < 2 * k, dist, emb))
    recon_ref[...] = recon


def prepare_params(w_enc, b_enc, w_dec, b_dec, cluster_reps, *, lane=LANE):
    """One-time parameter packing (hoisted out of the per-call forward path).

    Returns (arrays, dims) where arrays are the padded/packed device arrays
    fed to the kernel and dims are the static shape constants.
    """
    D_in, E = w_enc.shape
    K = cluster_reps.shape[0]
    assert cluster_reps.shape[1] == E
    if 2 * K + E > lane:
        # TODO(synk): general multi-slab packing for 2K+E > 128 (fall back to
        # separate padded outputs); not needed for these shapes.
        raise NotImplementedError("packed-output path requires 2*K + E <= 128")

    L = lane
    Dp = _round_up(D_in, lane)
    off = 2 * K                    # lane offset where the embedding block starts
    f32 = jnp.float32

    # Encoder weights/bias shifted so the embedding lands in lanes [off, off+E).
    w_enc_pk = jnp.zeros((Dp, L), f32).at[:D_in, off:off + E].set(w_enc.astype(f32))
    b_enc_pk = jnp.zeros((1, L), f32).at[0, off:off + E].set(
        jnp.reshape(b_enc, (E,)).astype(f32))
    # Decoder weights with rows shifted correspondingly.
    w_dec_pk = jnp.zeros((L, Dp), f32).at[off:off + E, :D_in].set(w_dec.astype(f32))
    b_dec_p = jnp.zeros((1, Dp), f32).at[0, :D_in].set(
        jnp.reshape(b_dec, (D_in,)).astype(f32))
    # Cluster reps transposed, rows shifted to the embedding block, columns
    # duplicated into [0,K) (weighted-dist slot) and [K,2K) (dist slot).
    reps_t = cluster_reps.astype(f32).T                            # [E, K]
    reps_t_pk = (jnp.zeros((L, L), f32)
                 .at[off:off + E, :K].set(reps_t)
                 .at[off:off + E, K:2 * K].set(reps_t))
    reps_sq = jnp.sum(jnp.square(cluster_reps.astype(f32)), axis=1)  # [K]
    reps_sq_pk = (jnp.full((1, L), PAD_DIST, f32)
                  .at[0, :K].set(reps_sq)
                  .at[0, K:2 * K].set(reps_sq))

    arrays = (w_enc_pk, b_enc_pk, w_dec_pk, b_dec_p, reps_t_pk, reps_sq_pk)
    dims = dict(D_in=D_in, E=E, K=K, Dp=Dp, L=L)
    return arrays, dims


def deep_kmeans_forward(x, params, *, tb=512):
    """Hot path: one pallas_call over the batch grid (params pre-packed)."""
    arrays, dims = params
    w_enc_pk, b_enc_pk, w_dec_pk, b_dec_p, reps_t_pk, reps_sq_pk = arrays
    D_in, E, K, Dp, L = dims["D_in"], dims["E"], dims["K"], dims["Dp"], dims["L"]

    B = x.shape[0]
    assert x.shape[1] == D_in
    f32 = jnp.float32

    tb_eff = _choose_batch_tile(B, tb)
    Bp = _round_up(B, tb_eff)

    # Fast path: skip the pad-copy entirely when already aligned.
    if Bp != B or Dp != D_in:
        xp = jnp.zeros((Bp, Dp), f32).at[:B, :D_in].set(x.astype(f32))
    else:
        xp = x.astype(f32)

    grid = (Bp // tb_eff,)

    def batch_map(i):
        return (i, 0)

    def resident_map(i):          # same block every step -> stays in VMEM
        return (0, 0)

    out_shapes = (
        jax.ShapeDtypeStruct((Bp, L), f32),    # packed: wdist | dist | emb
        jax.ShapeDtypeStruct((Bp, Dp), f32),   # reconstruction
    )

    flops = 2 * Bp * Dp * L + 2 * Bp * L * Dp + 2 * Bp * L * L
    bytes_accessed = 4 * (Bp * Dp                      # x in
                          + Dp * L + L + L * Dp + Dp   # weights/biases
                          + L * L + L                  # reps_t, reps_sq
                          + Bp * L + Bp * Dp)          # packed + recon out
    cost = pl.CostEstimate(flops=flops, transcendentals=Bp * L,
                           bytes_accessed=bytes_accessed)

    # Per-step VMEM estimate: double-buffered batch blocks + resident params.
    # Only set an explicit limit when it approaches the 16 MiB scoped default
    # (large TB on v5e); otherwise leave the compiler default untouched.
    vmem_bytes = 4 * (2 * (tb_eff * Dp + tb_eff * L + tb_eff * Dp)
                      + 2 * (Dp * L + L * Dp + L * L + 2 * L + Dp))
    vmem_limit = None
    if vmem_bytes > 12 * (1 << 20):
        vmem_limit = min(2 * vmem_bytes, 128 * (1 << 20))

    packed_p, recon_p = pl.pallas_call(
        functools.partial(deep_kmeans_kernel, n_clusters=K),
        out_shape=out_shapes,
        grid=grid,
        in_specs=[
            pl.BlockSpec((tb_eff, Dp), batch_map),     # x        (batch-blocked)
            pl.BlockSpec((Dp, L), resident_map),       # w_enc    (VMEM-resident)
            pl.BlockSpec((1, L), resident_map),        # b_enc
            pl.BlockSpec((L, Dp), resident_map),       # w_dec
            pl.BlockSpec((1, Dp), resident_map),       # b_dec
            pl.BlockSpec((L, L), resident_map),        # cluster reps (packed)
            pl.BlockSpec((1, L), resident_map),        # ||reps||^2 (+PAD fill)
        ],
        out_specs=(
            pl.BlockSpec((tb_eff, L), batch_map),
            pl.BlockSpec((tb_eff, Dp), batch_map),
        ),
        compiler_params=pltpu.CompilerParams(
            dimension_semantics=("parallel",),
            vmem_limit_bytes=vmem_limit),
        cost_estimate=cost,
    )(xp, w_enc_pk, b_enc_pk, w_dec_pk, b_dec_p, reps_t_pk, reps_sq_pk)

    # Fast path: skip re-slicing when no padding was applied.
    if Bp != B:
        packed_p = packed_p[:B]
        recon_p = recon_p[:B]
    if Dp != D_in:
        recon_p = recon_p[:, :D_in]

    weighted = packed_p[:, :K]
    dist = packed_p[:, K:2 * K]
    emb = packed_p[:, 2 * K:2 * K + E]
    # TODO(synk): arbitrary `embedding_mapper` callbacks are not supported
    # in-kernel; with mapper=None (the reference default) mapped_embeds is
    # just an alias of embeddings, so we alias at the JAX level.
    mapped = emb
    return weighted, dist, recon_p, emb, mapped


def deep_kmeans_reference(x, w_enc, b_enc, w_dec, b_dec, cluster_reps):
    """Pure-JAX reference mirroring the PyTorch forward semantics."""
    hi = jax.lax.Precision.HIGHEST
    emb = jnp.dot(x, w_enc, precision=hi) + jnp.reshape(b_enc, (1, -1))
    recon = jnp.dot(emb, w_dec, precision=hi) + jnp.reshape(b_dec, (1, -1))
    mapped = emb
    diff = mapped[:, None, :] - cluster_reps[None, :, :]
    dist = jnp.sum(jnp.square(diff), axis=-1)
    min_dist = jnp.min(dist, axis=1, keepdims=True)
    exps = jnp.exp(-ALPHA * (dist - min_dist))
    sum_exps = jnp.sum(exps, axis=1, keepdims=True)
    weighted = dist * (exps / sum_exps)
    return weighted, dist, recon, emb, mapped


if __name__ == "__main__":
    # batch, input features, embedding_size, n_clusters
    B, D_IN, E, K = 256, 128, 32, 16

    key = jax.random.PRNGKey(0)
    kx, ke, kd, kr = jax.random.split(key, 4)

    x = jax.random.normal(kx, (B, D_IN), dtype=jnp.float32)
    # deterministic synthetic autoencoder parameters
    w_enc = 0.05 * jax.random.normal(ke, (D_IN, E), dtype=jnp.float32)
    b_enc = jnp.zeros((1, E), dtype=jnp.float32)
    w_dec = 0.05 * jax.random.normal(kd, (E, D_IN), dtype=jnp.float32)
    b_dec = jnp.zeros((1, D_IN), dtype=jnp.float32)
    cluster_reps = jax.random.normal(kr, (K, E), dtype=jnp.float32)

    # One-time parameter packing (cache and reuse across forward calls).
    params = prepare_params(w_enc, b_enc, w_dec, b_dec, cluster_reps)

    outs = deep_kmeans_forward(x, params, tb=512)
    outs = jax.block_until_ready(outs)

    refs = deep_kmeans_reference(x, w_enc, b_enc, w_dec, b_dec, cluster_reps)

    # weighted_dists tolerance is loose by necessity: ALPHA=1000 amplifies
    # O(1e-4) f32-level distance differences by exp(1000*delta) inside the
    # (near-hard-assignment) softmax. dist / recon / emb are checked tightly.
    tols = [
        dict(rtol=1e-1, atol=5e-2),   # weighted_dists
        dict(rtol=1e-3, atol=1e-3),   # distances
        dict(rtol=1e-3, atol=1e-4),   # reconstruction
        dict(rtol=1e-3, atol=1e-4),   # embeddings
        dict(rtol=1e-3, atol=1e-4),   # mapped_embeds
    ]
    for o, r, t in zip(outs, refs, tols):
        np.testing.assert_allclose(np.asarray(o), np.asarray(r), **t)

    print("KERNEL_OK")
</pallas_src>

<mosaic_0001>
module attributes {stable_mosaic.version = 11 : i64} {
  func.func @deep_kmeans_kernel(%arg0: i32, %arg1: memref<128x128xf32, #tpu.memory_space<vmem>>, %arg2: memref<128x128xf32, #tpu.memory_space<vmem>>, %arg3: memref<1x128xf32, #tpu.memory_space<vmem>>, %arg4: memref<128x128xf32, #tpu.memory_space<vmem>>, %arg5: memref<1x128xf32, #tpu.memory_space<vmem>>, %arg6: memref<128x128xf32, #tpu.memory_space<vmem>>, %arg7: memref<1x128xf32, #tpu.memory_space<vmem>>, %arg8: memref<128x128xf32, #tpu.memory_space<vmem>>, %arg9: memref<128x128xf32, #tpu.memory_space<vmem>>) attributes {dimension_semantics = [#tpu.dimension_semantics<parallel>], iteration_bounds = array<i64: 2>, scalar_prefetch = 0 : i64, scratch_operands = 0 : i64, tpu.core_type = #tpu.core_type<tc>, window_params = [{transform_indices = @transform_0, window_bounds = array<i64: 128, 128>}, {pipeline_mode = #tpu.pipeline_mode<synchronous>, transform_indices = @transform_1, window_bounds = array<i64: 128, 128>}, {pipeline_mode = #tpu.pipeline_mode<synchronous>, transform_indices = @transform_2, window_bounds = array<i64: 1, 128>}, {pipeline_mode = #tpu.pipeline_mode<synchronous>, transform_indices = @transform_3, window_bounds = array<i64: 128, 128>}, {pipeline_mode = #tpu.pipeline_mode<synchronous>, transform_indices = @transform_4, window_bounds = array<i64: 1, 128>}, {pipeline_mode = #tpu.pipeline_mode<synchronous>, transform_indices = @transform_5, window_bounds = array<i64: 128, 128>}, {pipeline_mode = #tpu.pipeline_mode<synchronous>, transform_indices = @transform_6, window_bounds = array<i64: 1, 128>}, {transform_indices = @transform_7, window_bounds = array<i64: 128, 128>}, {transform_indices = @transform_8, window_bounds = array<i64: 128, 128>}]} {
    %c0 = arith.constant 0 : index
    %c0_0 = arith.constant 0 : index
    %0 = vector.load %arg1[%c0, %c0_0] : memref<128x128xf32, #tpu.memory_space<vmem>>, vector<128x128xf32>
    %c0_1 = arith.constant 0 : index
    %c0_2 = arith.constant 0 : index
    %1 = vector.load %arg2[%c0_1, %c0_2] : memref<128x128xf32, #tpu.memory_space<vmem>>, vector<128x128xf32>
    %cst = arith.constant dense<0.000000e+00> : vector<128x128xf32>
    %2 = tpu.matmul %0, %1, %cst {dimension_numbers = #tpu.dot_dimension_numbers<[1], [0], [0], [1], [0, 0, 1, 1], [], []>, precision = #tpu.contract_precision<fp32>} : vector<128x128xf32>, vector<128x128xf32>, vector<128x128xf32> -> vector<128x128xf32>
    %c0_3 = arith.constant 0 : index
    %c0_4 = arith.constant 0 : index
    %3 = vector.load %arg3[%c0_3, %c0_4] : memref<1x128xf32, #tpu.memory_space<vmem>>, vector<1x128xf32>
    %4 = vector.broadcast %3 : vector<1x128xf32> to vector<128x128xf32>
    %5 = arith.addf %2, %4 : vector<128x128xf32>
    %c0_5 = arith.constant 0 : index
    %c0_6 = arith.constant 0 : index
    %6 = vector.load %arg4[%c0_5, %c0_6] : memref<128x128xf32, #tpu.memory_space<vmem>>, vector<128x128xf32>
    %cst_7 = arith.constant dense<0.000000e+00> : vector<128x128xf32>
    %7 = tpu.matmul %5, %6, %cst_7 {dimension_numbers = #tpu.dot_dimension_numbers<[1], [0], [0], [1], [0, 0, 1, 1], [], []>, precision = #tpu.contract_precision<fp32>} : vector<128x128xf32>, vector<128x128xf32>, vector<128x128xf32> -> vector<128x128xf32>
    %c0_8 = arith.constant 0 : index
    %c0_9 = arith.constant 0 : index
    %8 = vector.load %arg5[%c0_8, %c0_9] : memref<1x128xf32, #tpu.memory_space<vmem>>, vector<1x128xf32>
    %9 = vector.broadcast %8 : vector<1x128xf32> to vector<128x128xf32>
    %10 = arith.addf %7, %9 : vector<128x128xf32>
    %11 = arith.mulf %5, %5 : vector<128x128xf32>
    %cst_10 = arith.constant dense<0.000000e+00> : vector<128xf32>
    %12 = vector.multi_reduction <add>, %11, %cst_10 [1] : vector<128x128xf32> to vector<128xf32>
    %13 = vector.shape_cast %12 : vector<128xf32> to vector<128x1xf32>
    %c0_11 = arith.constant 0 : index
    %c0_12 = arith.constant 0 : index
    %14 = vector.load %arg6[%c0_11, %c0_12] : memref<128x128xf32, #tpu.memory_space<vmem>>, vector<128x128xf32>
    %cst_13 = arith.constant dense<0.000000e+00> : vector<128x128xf32>
    %15 = tpu.matmul %5, %14, %cst_13 {dimension_numbers = #tpu.dot_dimension_numbers<[1], [0], [0], [1], [0, 0, 1, 1], [], []>, precision = #tpu.contract_precision<fp32>} : vector<128x128xf32>, vector<128x128xf32>, vector<128x128xf32> -> vector<128x128xf32>
    %c0_14 = arith.constant 0 : index
    %c0_15 = arith.constant 0 : index
    %16 = vector.load %arg7[%c0_14, %c0_15] : memref<1x128xf32, #tpu.memory_space<vmem>>, vector<1x128xf32>
    %17 = vector.broadcast %13 : vector<128x1xf32> to vector<128x128xf32>
    %18 = vector.broadcast %16 : vector<1x128xf32> to vector<128x128xf32>
    %19 = arith.addf %17, %18 : vector<128x128xf32>
    %cst_16 = arith.constant 2.000000e+00 : f32
    %20 = vector.broadcast %cst_16 : f32 to vector<128x128xf32>
    %21 = arith.mulf %20, %15 : vector<128x128xf32>
    %22 = arith.subf %19, %21 : vector<128x128xf32>
    %cst_17 = arith.constant 0.000000e+00 : f32
    %23 = vector.broadcast %cst_17 : f32 to vector<128x128xf32>
    %24 = arith.maximumf %22, %23 : vector<128x128xf32>
    %cst_18 = arith.constant dense<0x7F800000> : vector<128xf32>
    %25 = vector.multi_reduction <minimumf>, %24, %cst_18 [1] : vector<128x128xf32> to vector<128xf32>
    %26 = vector.shape_cast %25 : vector<128xf32> to vector<128x1xf32>
    %27 = vector.broadcast %26 : vector<128x1xf32> to vector<128x128xf32>
    %28 = arith.subf %24, %27 : vector<128x128xf32>
    %cst_19 = arith.constant -1.000000e+03 : f32
    %29 = vector.broadcast %cst_19 : f32 to vector<128x128xf32>
    %30 = arith.mulf %29, %28 : vector<128x128xf32>
    %31 = math.exp %30 : vector<128x128xf32>
    %cst_20 = arith.constant dense<0.000000e+00> : vector<128xf32>
    %32 = vector.multi_reduction <add>, %31, %cst_20 [1] : vector<128x128xf32> to vector<128xf32>
    %33 = vector.shape_cast %32 : vector<128xf32> to vector<128x1xf32>
    %34 = tpu.reciprocal %33 {approx = true} : vector<128x1xf32> -> vector<128x1xf32>
    %cst_21 = arith.constant 2.000000e+00 : f32
    %35 = vector.broadcast %cst_21 : f32 to vector<128x1xf32>
    %36 = arith.mulf %35, %34 : vector<128x1xf32>
    %37 = arith.mulf %24, %31 : vector<128x128xf32>
    %38 = vector.broadcast %36 : vector<128x1xf32> to vector<128x128xf32>
    %39 = arith.mulf %37, %38 : vector<128x128xf32>
    %40 = tpu.iota {dimensions = array<i32: 1>} : vector<128x128xi32>
    %c16_i32 = arith.constant 16 : i32
    %41 = vector.broadcast %c16_i32 : i32 to vector<128x128xi32>
    %42 = arith.cmpi slt, %40, %41 : vector<128x128xi32>
    %c32_i32 = arith.constant 32 : i32
    %43 = vector.broadcast %c32_i32 : i32 to vector<128x128xi32>
    %44 = arith.cmpi slt, %40, %43 : vector<128x128xi32>
    %45 = arith.select %44, %24, %5 : vector<128x128xi1>, vector<128x128xf32>
    %46 = arith.select %42, %39, %45 : vector<128x128xi1>, vector<128x128xf32>
    %c0_22 = arith.constant 0 : index
    %c0_23 = arith.constant 0 : index
    %47 = vector.load %arg8[%c0_22, %c0_23] : memref<128x128xf32, #tpu.memory_space<vmem>>, vector<128x128xf32>
    tpu.vector_store %arg8[%c0_22, %c0_23], %46 {strides = array<i32>} : memref<128x128xf32, #tpu.memory_space<vmem>>, vector<128x128xf32>,
    %c0_24 = arith.constant 0 : index
    %c0_25 = arith.constant 0 : index
    %48 = vector.load %arg9[%c0_24, %c0_25] : memref<128x128xf32, #tpu.memory_space<vmem>>, vector<128x128xf32>
    tpu.vector_store %arg9[%c0_24, %c0_25], %10 {strides = array<i32>} : memref<128x128xf32, #tpu.memory_space<vmem>>, vector<128x128xf32>,
    return
  }
  func.func @transform_0(%arg0: i32) -> (i32, i32) {
    %c0_i32 = arith.constant 0 : i32
    %c0_i32_0 = arith.constant 0 : i32
    return %arg0, %c0_i32 : i32, i32
  }
  func.func @transform_1(%arg0: i32) -> (i32, i32) {
    %c0_i32 = arith.constant 0 : i32
    %c0_i32_0 = arith.constant 0 : i32
    %c0_i32_1 = arith.constant 0 : i32
    return %c0_i32, %c0_i32_0 : i32, i32
  }
  func.func @transform_2(%arg0: i32) -> (i32, i32) {
    %c0_i32 = arith.constant 0 : i32
    %c0_i32_0 = arith.constant 0 : i32
    %c0_i32_1 = arith.constant 0 : i32
    return %c0_i32, %c0_i32_0 : i32, i32
  }
  func.func @transform_3(%arg0: i32) -> (i32, i32) {
    %c0_i32 = arith.constant 0 : i32
    %c0_i32_0 = arith.constant 0 : i32
    %c0_i32_1 = arith.constant 0 : i32
    return %c0_i32, %c0_i32_0 : i32, i32
  }
  func.func @transform_4(%arg0: i32) -> (i32, i32) {
    %c0_i32 = arith.constant 0 : i32
    %c0_i32_0 = arith.constant 0 : i32
    %c0_i32_1 = arith.constant 0 : i32
    return %c0_i32, %c0_i32_0 : i32, i32
  }
  func.func @transform_5(%arg0: i32) -> (i32, i32) {
    %c0_i32 = arith.constant 0 : i32
    %c0_i32_0 = arith.constant 0 : i32
    %c0_i32_1 = arith.constant 0 : i32
    return %c0_i32, %c0_i32_0 : i32, i32
  }
  func.func @transform_6(%arg0: i32) -> (i32, i32) {
    %c0_i32 = arith.constant 0 : i32
    %c0_i32_0 = arith.constant 0 : i32
    %c0_i32_1 = arith.constant 0 : i32
    return %c0_i32, %c0_i32_0 : i32, i32
  }
  func.func @transform_7(%arg0: i32) -> (i32, i32) {
    %c0_i32 = arith.constant 0 : i32
    %c0_i32_0 = arith.constant 0 : i32
    return %arg0, %c0_i32 : i32, i32
  }
  func.func @transform_8(%arg0: i32) -> (i32, i32) {
    %c0_i32 = arith.constant 0 : i32
    %c0_i32_0 = arith.constant 0 : i32
    return %arg0, %c0_i32 : i32, i32
  }
}

</mosaic_0001>

<bundles_post_ra>
// kernel: tpu_custom_call.1
= control target key start
LH: loop header
LB: loop body
LE: loop exit
PB: predicated region body
PF: predicated region fallthrough
CT: control target
= control target key end

     0   :  { %14 = vsyncpa [#allocation3], 0  ;;  %s10148_s0 = inlined_call_operand.hbm [shape: f32[256,128], index: 0, kind: input, shape index: {}]   ;;  %s10149_s1 = inlined_call_operand.hbm [shape: f32[128,128], index: 1, kind: input, shape index: {}]   ;;  %s10150_s2 = inlined_call_operand.vmem [shape: f32[1,128], index: 2, kind: input, shape index: {}]   ;;  %s10151_s3 = inlined_call_operand.hbm [shape: f32[128,128], index: 3, kind: input, shape index: {}]   ;;  %s10152_s4 = inlined_call_operand.vmem [shape: f32[1,128], index: 4, kind: input, shape index: {}]   ;;  %s10153_s5 = inlined_call_operand.hbm [shape: f32[128,128], index: 5, kind: input, shape index: {}]   ;;  %s10154_s6 = inlined_call_operand.vmem [shape: f32[1,128], index: 6, kind: input, shape index: {}]   ;;  %s10155_s7 = inlined_call_operand.hbm [shape: f32[256,128], index: 7, kind: output, shape index: {0}]   ;;  %s10156_s8 = inlined_call_operand.hbm [shape: f32[256,128], index: 8, kind: output, shape index: {1}]  }
   0x1   :  { %16 = vsyncpa [#allocation3 + $0x1], 0 }
   0x2   :  { %17 = vsyncpa [#allocation6], 0 }
   0x3   :  { %18 = vsyncpa [#allocation9], 0 }
   0x4   :  { %19 = vsyncpa [#allocation4], 0 }
   0x5   :  { %21 = vsyncpa [#allocation4 + $0x1], 0 }
   0x6   :  { %22 = vsyncpa [#allocation12], 0 }
   0x7   :  { %24 = vsyncpa [#allocation12 + $0x1], 0  ;;  %s7755_s27 = smov 0   ;;  %s7757_s28 = smov 0  }
   0x8   :  { %s7759_s29 = smov 0   ;;  %s7761_s30 = smov 0  }
   0x9 LB: > { %10359 = sst [smem:[#allocation18_spill]] %s7686_s27  ;;  %s7776_s9 = sadd.s32 4294967295, %s7698_s30   ;;  %s7698_s30 = sphi %s7761_s30, %s10672_s30   ;;  %s7694_s29 = sphi %s7759_s29, %s10671_s29   ;;  %s7690_s28 = sphi %s7757_s28, %s10670_s28   ;;  %s7686_s27 = sphi %s7755_s27, %s10669_s27  }
   0xa   : > { %s4866_s10 = sadd.s32 4294967294, %s7698_s30   ;;  %p50_p0 = scmp.ne.s32.totalorder %s7690_s28, %s7686_s27 }
   0xb   : > { %p10157_p1 = scmp.eq.s32.totalorder %s7776_s9, 0  ;;  %p206_p3 = scmp.eq.s32.totalorder %s4866_s10, 1 }
   0xc   : > { %p4867_p5 = scmp.ge.s32.totalorder %s7698_s30, 1  ;;  %p239_p7 = scmp.lt.s32.totalorder %s7698_s30, 3 }
   0xd   : > { %p7785_p4 = por %p10157_p1, %p50_p0  ;;  %p7790_p6 = por %p206_p3, %p50_p0 }
   0xe   : > { %p7795_p8 = pnand %p4867_p5, %p239_p7  ;;  %s7700_s14 = smov [#allocation5]  }
   0xf   : > { %s10360_s11 = scalar_select %p7785_p4, 1, 0 }
  0x10   : > { %s10361_s12 = scalar_select %p7790_p6, 1, 0 }
  0x11   : > { %s10363_s13 = scalar_select %p7795_p8, 1, 0 }
  0x12   : > { %10362 = sst [smem:[#allocation19_spill]] %s10361_s12  ;;  %s251_s15 = sshll.u32 %s7700_s14, 4  ;;  %s7799_s15 = int_to_ptr.vmem [resolvable:$true] %s251_s15 }
  0x13   : > { %p7346_p9 = pneg %p7795_p8  ;;  %s7701_s17 = smov [#allocation7]  }
  0x14   : > { %s267_s18 = sshll.u32 %s7701_s17, 4  ;;  %s7702_s19 = smov [#allocation8]   ;;  %s7810_s18 = int_to_ptr.vmem [resolvable:$true] %s267_s18 }
  0x15   : > { %p7806_p11 = pnand %p7346_p9, %p10157_p1  ;;  %s7812_s20 = sshll.u32 %s7702_s19, 4  ;;  %s284_s20 = int_to_ptr.vmem [resolvable:$true] %s7812_s20 }
  0x16   : > { %s7478_s23 = scalar_lea.hbm %s10149_s1, 2048 }
  0x17   : > { %p7479_p12 = scmp.ne.s32.totalorder %s10149_s1, %s7478_s23  ;;  %p7822_p13 = pneg %p7806_p11 }
  0x18   : > { %p7485_p5 = scmp.lt.u32.totalorder %s7478_s23, %s10149_s1 }
  0x19   : > { %p7481_p0 = pnand %p7822_p13, %p7479_p12 }
  0x1b   : > { %p7482_p3 = pneg %p7481_p0 }
  0x1d   : > { %p7487_p7 = pnand %p7485_p5, %p7482_p3 }
  0x1f   : > { %7490 = shalt.err (!%p7487_p7)
}
  0x20   : > { %s7491_s17 = scalar_lea.vmem %s7799_s15, 2048  ;;  %p7499_p2 = scmp.lt.s32.totalorder %s7799_s15, %s7799_s15 }
  0x21   : > { %p7492_p9 = scmp.ne.s32.totalorder %s7799_s15, %s7491_s17  ;;  %p7500_p6 = scmp.lt.s32.totalorder %s7491_s17, %s7491_s17 }
  0x23   : > { %p7494_p10 = pnand %p7492_p9, %p7822_p13  ;;  %p7501_p12 = por %p7500_p6, %p7499_p2 }
  0x25   : > { %p7495_p1 = pneg %p7494_p10 }
  0x27   : > { %p7502_p0 = pnand %p7501_p12, %p7495_p1 }
  0x29   : > { %7505 = shalt.err (!%p7502_p0)
}
  0x2a   : > { %s7703_s19 = smov 128   ;;  %s7704_s21 = smov 8  }
  0x2b   : > { %7349 = dma.hbm_to_vmem [thread:$0]  (!%p7806_p11), %s10149_s1, 2048, %s7799_s15, [#allocation6], %s7703_s19, %s7703_s19, %s7704_s21  }
  0x2c   : > { %s7506_s10 = scalar_lea.hbm %s10151_s3, 2048 }
  0x2d   : > { %p7507_p1 = scmp.ne.s32.totalorder %s10151_s3, %s7506_s10  ;;  %p7513_p10 = scmp.lt.u32.totalorder %s7506_s10, %s10151_s3 }
  0x2f   : > { %p7509_p2 = pnand %p7507_p1, %p7822_p13 }
  0x31   : > { %p7510_p6 = pneg %p7509_p2 }
  0x33   : > { %p7515_p3 = pnand %p7513_p10, %p7510_p6 }
  0x35   : > { %7518 = shalt.err (!%p7515_p3)
}
  0x36   : > { %s7519_s15 = scalar_lea.vmem %s7810_s18, 2048  ;;  %p7527_p12 = scmp.lt.s32.totalorder %s7810_s18, %s7810_s18 }
  0x37   : > { %p7520_p5 = scmp.ne.s32.totalorder %s7810_s18, %s7519_s15  ;;  %p7528_p0 = scmp.lt.s32.totalorder %s7519_s15, %s7519_s15 }
  0x39   : > { %p7522_p7 = pnand %p7520_p5, %p7822_p13  ;;  %p7529_p1 = por %p7528_p0, %p7527_p12 }
  0x3b   : > { %p7523_p9 = pneg %p7522_p7 }
  0x3d   : > { %p7530_p2 = pnand %p7529_p1, %p7523_p9 }
  0x3f   : > { %7533 = shalt.err (!%p7530_p2)
}
  0x40   : > { %7352 = dma.hbm_to_vmem [thread:$0]  (!%p7806_p11), %s10151_s3, 2048, %s7810_s18, [#allocation6], %s7703_s19, %s7703_s19, %s7704_s21  }
  0x41   : > { %s7534_s24 = scalar_lea.hbm %s10153_s5, 2048 }
  0x42   : > { %p7535_p6 = scmp.ne.s32.totalorder %s10153_s5, %s7534_s24  ;;  %p7541_p5 = scmp.lt.u32.totalorder %s7534_s24, %s10153_s5 }
  0x44   : > { %p7537_p10 = pnand %p7535_p6, %p7822_p13 }
  0x46   : > { %p7538_p3 = pneg %p7537_p10 }
  0x48   : > { %p7543_p7 = pnand %p7541_p5, %p7538_p3 }
  0x4a   : > { %7546 = shalt.err (!%p7543_p7)
}
  0x4b   : > { %s7547_s15 = scalar_lea.vmem %s284_s20, 2048  ;;  %p7555_p1 = scmp.lt.s32.totalorder %s284_s20, %s284_s20 }
  0x4c   : > { %p7548_p9 = scmp.ne.s32.totalorder %s284_s20, %s7547_s15  ;;  %p7556_p2 = scmp.lt.s32.totalorder %s7547_s15, %s7547_s15 }
  0x4e   : > { %p7550_p12 = pnand %p7548_p9, %p7822_p13  ;;  %p7557_p4 = por %p7556_p2, %p7555_p1 }
  0x50   : > { %p7551_p0 = pneg %p7550_p12 }
  0x52   : > { %p7558_p8 = pnand %p7557_p4, %p7551_p0 }
  0x54   : > { %7561 = shalt.err (!%p7558_p8)
}
  0x55   : > { %7355 = dma.hbm_to_vmem [thread:$0]  (!%p7806_p11), %s10153_s5, 2048, %s284_s20, [#allocation9], %s7703_s19, %s7703_s19, %s7704_s21  }
  0x56   : > { %s7895_s26 = sadd.s32 1, %s7698_s30   ;;  %s37_s12 = sadd.s32 1, %s7694_s29 }
  0x57   : > { %s34_s16 = ssub.s32 %s7698_s30, %s7895_s26  ;;  %p44_p8 = scmp.ne.s32.totalorder %s7694_s29, %s7690_s28 }
  0x58   : > { %p35_p4 = scmp.eq.s32.totalorder %s34_s16, 0  ;;  %p45_p13 = scmp.eq.s32.totalorder %s7698_s30, 0 }
  0x59   : > { %p7370_p6 = scmp.lt.s32.totalorder %s7698_s30, 2  ;;  %p10366_p3 = scmp.eq.s32.totalorder %s7776_s9, 1 }
  0x5a   : > { %s7905_s22 = scalar_select %p35_p4, %s7694_s29, %s37_s12  }
  0x5b   : > { %p46_p10 = por %p45_p13, %p44_p8  ;;  %p7909_p5 = por %p10366_p3, %p44_p8 }
  0x5c   : > { %s300_s24 = sand.u32 1, %s7694_s29   ;;  %s4893_s25 = sshll.u32 %s7698_s30, 11 }
  0x5d   : > { %s4872_s20 = sshll.u32 %s300_s24, 7  ;;  %s7918_s17 = scalar_lea.hbm %s10148_s0, %s4893_s25 }
  0x5e   : > { %s304_s15 = scalar_lea.vmem [#allocation2], %s4872_s20  ;;  %p7920_p11 = pnand %p7370_p6, %p46_p10 }
  0x5f   : > { %s311_s18 = sshll.u32 %s304_s15, 4  ;;  %s7926_s16 = scalar_lea.sflag [#allocation3], %s300_s24  ;;  %s7924_s18 = int_to_ptr.vmem [resolvable:$true] %s311_s18 }
  0x60   : > { %s7562_s12 = scalar_lea.hbm %s7918_s17, 2048  ;;  %p7564_p9 = pneg %p7920_p11 }
  0x61   : > { %p7563_p7 = scmp.ne.s32.totalorder %s7918_s17, %s7562_s12  ;;  %s7567_s10 = scalar_lea.hbm %s10148_s0, 4096 }
  0x62   : > { %p7568_p1 = scmp.lt.u32.totalorder %s7918_s17, %s10148_s0  ;;  %p7569_p2 = scmp.lt.u32.totalorder %s7567_s10, %s7562_s12 }
  0x63   : > { %p7565_p12 = pnand %p7564_p9, %p7563_p7  ;;  %p7571_p8 = scmp.lt.u32.totalorder %s7562_s12, %s7918_s17 }
  0x64   : > { %p7570_p4 = por %p7569_p2, %p7568_p1 }
  0x65   : > { %p7566_p0 = pneg %p7565_p12 }
  0x66   : > { %p7572_p13 = por %p7571_p8, %p7570_p4 }
  0x68   : > { %p7573_p6 = pnand %p7572_p13, %p7566_p0 }
  0x6a   : > { %7576 = shalt.err (!%p7573_p6)
}
  0x6b   : > { %s7577_s24 = scalar_lea.vmem %s7924_s18, 2048  ;;  %s7705_s25 = smov [#allocation2]  }
  0x6c   : > { %p7578_p10 = scmp.ne.s32.totalorder %s7924_s18, %s7577_s24  ;;  %s7582_s20 = sshll.u32 %s7705_s25, 4  ;;  %s7583_s20 = int_to_ptr.vmem [resolvable:$false] %s7582_s20 }
  0x6d   : > { %s7584_s14 = scalar_lea.vmem %s7583_s20, 4096  ;;  %p7585_p12 = scmp.lt.s32.totalorder %s7924_s18, %s7583_s20 }
  0x6e   : > { %p7580_p3 = pnand %p7578_p10, %p7564_p9  ;;  %p7586_p1 = scmp.lt.s32.totalorder %s7584_s14, %s7577_s24 }
  0x70   : > { %p7581_p7 = pneg %p7580_p3  ;;  %p7587_p2 = por %p7586_p1, %p7585_p12 }
  0x72   : > { %p7588_p4 = pnand %p7587_p2, %p7581_p7 }
  0x74   : > { %7591 = shalt.err (!%p7588_p4)
}
  0x75   : > { %7359 = dma.hbm_to_vmem [thread:$0]  (!%p7920_p11), %s7918_s17, 2048, %s7924_s18, %s7926_s16, %s7703_s19, %s7703_s19, %s7704_s21  }
  0x76   : > { %p10369_p9 = scmp.ne.s32.totalorder %s10363_s13, 0 }
  0x78   : > { %323 = sbr.rel (%p10369_p9) target bundleno = 1218 (0x4c2), region = 48 }
  0x7f   : > { %s7960_s12 = sand.u32 1, %s7690_s28   ;;  %p10370_p0 = scmp.ne.s32.totalorder %s10360_s11, 0 }
  0x80   : > { %s7963_s10 = sshll.u32 %s7960_s12, 7  ;;  %s326_s27 = scalar_lea.sflag [#allocation3], %s7960_s12 }
  0x81   : > { %s7967_s15 = scalar_lea.vmem [#allocation2], %s7963_s10 }
  0x82   : > { %7665 = dma.done.wait (%p10370_p0), %s326_s27, 2048  }
  0x83   : > { %7667 = vsyncadd (%p10370_p0), %s326_s27, 4294965248  ;;  %p10371_p11 = scmp.eq.s32.totalorder %s7776_s9, 0 }
  0x85   : > { %7669 = dma.done.wait (%p10371_p11), [#allocation6], 4096   ;;  %p10372_p8 = pmov %p10371_p11 }
  0x87   : > { %7671 = vsyncadd (%p10372_p8), [#allocation6], 4294963200  ;;  %p10373_p13 = pmov %p10372_p8 }
  0x88   : > { %p10374_p6 = pmov %p10372_p8 }
  0x89   : > { %7673 = dma.done.wait (%p10373_p13), [#allocation9], 2048  }
  0x8a   : > { %7675 = vsyncadd (%p10374_p6), [#allocation9], 4294965248  ;;  %v398_v0 = vld [vmem:[#allocation5] sm:$0xff]  ;;  %v399_v1 = vld [vmem:[#allocation5 + $0x8] sm:$0xff]  ;;  %s9746_s16 = scalar_lea.vmem [#allocation11], %s7963_s10  ;;  %s4894_s24 = sshll.u32 %s7776_s9, 11 }
  0x8b   : > { %v400_v2 = vld [vmem:[#allocation5 + $0x10] sm:$0xff]  ;;  %v422_v3 = vand.u32 4294901760, %v398_v0  ;;  %v425_v4 = vand.u32 4294901760, %v399_v1  ;;  %v401_v5 = vld [vmem:[#allocation5 + $0x18] sm:$0xff]  ;;  %v7981_v7 = vld [vmem:[#allocation5 + $0x20] sm:$0xff]  ;;  %s9910_s14 = scalar_lea.hbm %s10156_s8, %s4894_s24  ;;  %s4732_s27 = sshll.u32 %s9746_s16, 4  ;;  %s9913_s27 = int_to_ptr.vmem [resolvable:$true] %s4732_s27 }
  0x8c   : > { %v428_v6 = vand.u32 4294901760, %v400_v2  ;;  %v7983_v8 = vld [vmem:[#allocation5 + $0x28] sm:$0xff]  ;;  %v431_v9 = vand.u32 4294901760, %v401_v5  ;;  %v434_v11 = vand.u32 4294901760, %v7981_v7  ;;  %v7991_v14 = vld [vmem:[#allocation5 + $0x30] sm:$0xff]  ;;  %v7993_v15 = vld [vmem:[#allocation5 + $0x38] sm:$0xff] }
  0x8d   : > { %v7985_v10 = vpack.c.bf16 %v425_v4, %v422_v3  ;;  %v437_v12 = vand.u32 4294901760, %v7983_v8  ;;  %v382_v16 = vld [vmem:[%s7967_s15] sm:$0xff]  ;;  %v440_v19 = vand.u32 4294901760, %v7991_v14  ;;  %v443_v20 = vand.u32 4294901760, %v7993_v15  ;;  %v383_v21 = vld [vmem:[%s7967_s15 + $0x8] sm:$0xff]  ;;  %v8035_v30 = vld [vmem:[#allocation5 + $0x50] sm:$0xff] }
  0x8e   : > { %v7989_v13 = vpack.c.bf16 %v431_v9, %v428_v6  ;;  %v8000_v17 = vand.u32 4294901760, %v382_v16  ;;  %v8013_v22 = vld [vmem:[#allocation5 + $0x40] sm:$0xff]  ;;  %v8015_v23 = vld [vmem:[#allocation5 + $0x48] sm:$0xff]  ;;  %v8023_v26 = vand.u32 4294901760, %v383_v21  ;;  %v384_v31 = vld [vmem:[%s7967_s15 + $0x10] sm:$0xff]  ;;  %v8042_v35 = vsub.f32 %v398_v0, %v422_v3  ;;  %s7592_s11 = scalar_lea.vmem %s9913_s27, 2048 }
  0x8f   : > { %6481 = vmatprep.subr.bf16.mxu1 %v7985_v10  ;;  %6577 = vmatprep.subr.bf16.mxu0 %v7985_v10  ;;  %v8008_v18 = vpack.c.bf16 %v437_v12, %v434_v11  ;;  %v8031_v27 = vpack.c.bf16 %v443_v20, %v440_v19  ;;  %v446_v28 = vand.u32 4294901760, %v8013_v22  ;;  %v10170_v29 = vand.u32 4294901760, %v8015_v23  ;;  %v8038_v32 = vld [vmem:[#allocation5 + $0x58] sm:$0xff]  ;;  %v8049_v38 = vld [vmem:[#allocation5 + $0x60] sm:$0xff]  ;;  %v8051_v39 = vld [vmem:[#allocation5 + $0x68] sm:$0xff]  ;;  %p7593_p10 = scmp.ne.s32.totalorder %s9913_s27, %s7592_s11  ;;  %s7706_s13 = smov [#allocation11]  }
  0x90   : > { %6483 = vmatpush3.bf16.msra.mxu1 %v7985_v10  ;;  %6579 = vmatpush3.bf16.msra.mxu0 %v7985_v10  ;;  %v8018_v24 = vsub.f32 %v382_v16, %v8000_v17  ;;  %v385_v34 = vld [vmem:[%s7967_s15 + $0x18] sm:$0xff]  ;;  %v8044_v36 = vsub.f32 %v399_v1, %v425_v4  ;;  %v10169_v37 = vand.u32 4294901760, %v8035_v30  ;;  %v8054_v41 = vsub.f32 %v383_v21, %v8023_v26  ;;  %v8067_v45 = vld [vmem:[#allocation5 + $0x70] sm:$0xff]  ;;  %v386_v50 = vld [vmem:[%s7967_s15 + $0x20] sm:$0xff]  ;;  %s7596_s19 = sshll.u32 %s7706_s13, 4  ;;  %s7597_s19 = int_to_ptr.vmem [resolvable:$false] %s7596_s19 }
  0x91   : > { %6485 = vmatprep.subr.bf16.mxu1 %v7989_v13  ;;  %6581 = vmatprep.subr.bf16.mxu0 %v7989_v13  ;;  %10376 = vst [vmem:[#allocation21_spill] sm:$0xff] %v8031_v27  ;;  %v8056_v42 = vand.u32 4294901760, %v384_v31  ;;  %v8064_v43 = vpack.c.bf16 %v10170_v29, %v446_v28  ;;  %v10167_v44 = vand.u32 4294901760, %v8038_v32  ;;  %v8069_v46 = vld [vmem:[#allocation5 + $0x78] sm:$0xff]  ;;  %v8071_v47 = vand.u32 4294901760, %v385_v34  ;;  %v387_v55 = vld [vmem:[%s7967_s15 + $0x28] sm:$0xff]  ;;  %p7594_p3 = pnand %p7593_p10, %p7909_p5  ;;  %p7599_p12 = scmp.lt.s32.totalorder %s9913_s27, %s7597_s19 }
  0x92   : > { %10375 = vst [vmem:[#allocation20_spill] sm:$0xff] %v8018_v24  ;;  %v504_v25 = vand.u32 4294901760, %v8018_v24  ;;  %10377 = vst [vmem:[#allocation22_spill] sm:$0xff] %v8054_v41  ;;  %v8073_v48 = vsub.f32 %v400_v2, %v428_v6  ;;  %v8075_v49 = vsub.f32 %v401_v5, %v431_v9  ;;  %v10165_v51 = vand.u32 4294901760, %v8049_v38  ;;  %v388_v2 = vld [vmem:[%s7967_s15 + $0x30] sm:$0xff]  ;;  %v389_v9 = vld [vmem:[%s7967_s15 + $0x38] sm:$0xff] }
  0x93   : > { %10378 = vst [vmem:[#allocation23_spill] sm:$0xff] %v8064_v43  ;;  %v10164_v52 = vand.u32 4294901760, %v8051_v39  ;;  %v665_v53 = vand.u32 4294901760, %v8042_v35  ;;  %v672_v54 = vand.u32 4294901760, %v8044_v36  ;;  %v10163_v56 = vand.u32 4294901760, %v8067_v45  ;;  %p7595_p7 = pneg %p7594_p3  ;;  %s7598_s21 = scalar_lea.vmem %s7597_s19, 4096 }
  0x94   : > { %6487 = vmatpush3.bf16.msra.mxu1 %v7989_v13  ;;  %6583 = vmatpush3.bf16.msra.mxu0 %v7989_v13  ;;  %v505_v33 = vsub.f32 %v8018_v24, %v504_v25  ;;  %v10162_v57 = vand.u32 4294901760, %v8069_v46  ;;  %v10166_v58 = vand.u32 4294901760, %v8054_v41  ;;  %v8089_v59 = vsub.f32 %v384_v31, %v8056_v42  ;;  %p7600_p1 = scmp.lt.s32.totalorder %s7598_s21, %s7592_s11 }
  0x95   : > { %6489 = vmatprep.subr.bf16.mxu1 %v8008_v18  ;;  %6585 = vmatprep.subr.bf16.mxu0 %v8008_v18  ;;  %v8097_v60 = vpack.c.bf16 %v10167_v44, %v10169_v37  ;;  %v8100_v61 = vsub.f32 %v385_v34, %v8071_v47  ;;  %v679_v62 = vand.u32 4294901760, %v8073_v48  ;;  %v8103_v63 = vand.u32 4294901760, %v386_v50 }
  0x96   : > { %5672 = vmatprep.mubr.f32.mxu0 %v504_v25  ;;  %v506_v40 = vand.u32 4294901760, %v505_v33  ;;  %10379 = vst [vmem:[#allocation24_spill] sm:$0xff] %v8089_v59  ;;  %v686_v0 = vand.u32 4294901760, %v8075_v49  ;;  %v8106_v1 = vand.u32 4294901760, %v387_v55  ;;  %v666_v3 = vsub.f32 %v8042_v35, %v665_v53  ;;  %p7601_p2 = por %p7600_p1, %p7599_p12 }
  0x97   : > { %10380 = vst [vmem:[#allocation25_spill] sm:$0xff] %v8097_v60  ;;  %10381 = vst [vmem:[#allocation26_spill] sm:$0xff] %v8100_v61  ;;  %v673_v4 = vsub.f32 %v8044_v36, %v672_v54  ;;  %v8114_v5 = vsub.f32 %v7981_v7, %v434_v11  ;;  %v8119_v6 = vsub.f32 %v7983_v8, %v437_v12  ;;  %v10168_v11 = vand.u32 4294901760, %v8089_v59 }
  0x98   : > { %6491 = vmatpush3.bf16.msra.mxu1 %v8008_v18  ;;  %6587 = vmatpush3.bf16.msra.mxu0 %v8008_v18  ;;  %v8128_v16 = vpack.c.bf16 %v10164_v52, %v10165_v51  ;;  %v8134_v7 = vpack.c.bf16 %v10162_v57, %v10163_v56  ;;  %v8139_v8 = vsub.f32 %v8054_v41, %v10166_v58  ;;  %v10171_v12 = vand.u32 4294901760, %v8100_v61  ;;  %p7602_p4 = pnand %p7601_p2, %p7595_p7 }
  0x99   : > { %6493 = vmatprep.subr.bf16.mxu1 %v8031_v27  ;;  %6589 = vmatprep.subr.bf16.mxu0 %v8031_v27  ;;  %v680_v21 = vsub.f32 %v8073_v48, %v679_v62  ;;  %v8147_v25 = vsub.f32 %v386_v50, %v8103_v63  ;;  %v8149_v31 = vand.u32 4294901760, %v388_v2  ;;  %v687_v33 = vsub.f32 %v8075_v49, %v686_v0 }
  0x9a   : > { %5504 = vmatprep.mubr.f32.mxu1 %v506_v40  ;;  %10382 = vst [vmem:[#allocation27_spill] sm:$0xff] %v8128_v16  ;;  %10383 = vst [vmem:[#allocation28_spill] sm:$0xff] %v8134_v7  ;;  %v8153_v34 = vsub.f32 %v387_v55, %v8106_v1  ;;  %v8155_v40 = vand.u32 4294901760, %v389_v9  ;;  %v8160_v57 = vsub.f32 %v7991_v14, %v440_v19  ;;  %v667_v56 = vand.u32 4294901760, %v666_v3  ;;  %v390_v19 = vld [vmem:[%s7967_s15 + $0x40] sm:$0xff] }
  0x9b   : > { %10384 = vst [vmem:[#allocation29_spill] sm:$0xff] %v8147_v25  ;;  %10385 = vst [vmem:[#allocation30_spill] sm:$0xff] %v8149_v31  ;;  %v674_v52 = vand.u32 4294901760, %v673_v4  ;;  %v693_v50 = vand.u32 4294901760, %v8114_v5  ;;  %v700_v51 = vand.u32 4294901760, %v8119_v6  ;;  %v516_v55 = vand.u32 4294901760, %v8139_v8 }
  0x9c   : > { %6495 = vmatpush3.bf16.msra.mxu1 %v8031_v27  ;;  %6591 = vmatpush3.bf16.msra.mxu0 %v8031_v27  ;;  %10386 = vst [vmem:[#allocation31_spill] sm:$0xff] %v8153_v34  ;;  %10387 = vst [vmem:[#allocation32_spill] sm:$0xff] %v8155_v40  ;;  %v8167_v58 = vpack.c.bf16 %v672_v54, %v665_v53  ;;  %v8172_v44 = vsub.f32 %v8089_v59, %v10168_v11  ;;  %v681_v54 = vand.u32 4294901760, %v680_v21 }
  0x9d   : > { %6497 = vmatprep.subr.bf16.mxu1 %v8064_v43  ;;  %6593 = vmatprep.subr.bf16.mxu0 %v8064_v43  ;;  %v8177_v14 = vsub.f32 %v7993_v15, %v443_v20  ;;  %v8185_v53 = vsub.f32 %v8100_v61, %v10171_v12  ;;  %v10179_v3 = vand.u32 4294901760, %v8147_v25  ;;  %v8189_v4 = vsub.f32 %v388_v2, %v8149_v31 }
  0x9e   : > { %v688_v8 = vand.u32 4294901760, %v687_v33  ;;  %v8193_v20 = vsub.f32 %v389_v9, %v8155_v40  ;;  %v6512_v37 = vpack.c.bf16 %v674_v52, %v667_v56  ;;  %v694_v29 = vsub.f32 %v8114_v5, %v693_v50  ;;  %v391_v9 = vld [vmem:[%s7967_s15 + $0x48] sm:$0xff] }
  0x9f   : > { %10388 = vst [vmem:[#allocation33_spill] sm:$0xff] %v8189_v4  ;;  %v701_v12 = vsub.f32 %v8119_v6, %v700_v51  ;;  %v8198_v21 = vand.u32 4294901760, %v390_v19  ;;  %v526_v2 = vand.u32 4294901760, %v8172_v44  ;;  %v714_v33 = vand.u32 4294901760, %v8177_v14 }
  0xa0   : > { %6499 = vmatpush3.bf16.msra.mxu1 %v8064_v43  ;;  %6595 = vmatpush3.bf16.msra.mxu0 %v8064_v43  ;;  %10389 = vst [vmem:[#allocation34_spill] sm:$0xff] %v8193_v20  ;;  %v8208_v52 = vsub.f32 %v8013_v22, %v446_v28  ;;  %v10391_v56 = vand.u32 4294901760, %v8015_v23  ;;  %v536_v15 = vand.u32 4294901760, %v8185_v53  ;;  %v6612_v44 = vpack.c.bf16 %v686_v0, %v679_v62  ;;  %v392_v28 = vld [vmem:[%s7967_s15 + $0x50] sm:$0xff] }
  0xa1   : > { %6501 = vmatprep.subr.bf16.mxu1 %v8097_v60  ;;  %6597 = vmatprep.subr.bf16.mxu0 %v8097_v60  ;;  %10390 = vst [vmem:[#allocation35_spill] sm:$0xff] %v8198_v21  ;;  %v8221_v24 = vsub.f32 %v8147_v25, %v10179_v3  ;;  %v10393_v53 = vand.u32 4294901760, %v8160_v57  ;;  %v695_v0 = vand.u32 4294901760, %v694_v29  ;;  %v702_v43 = vand.u32 4294901760, %v701_v12  ;;  %v393_v29 = vld [vmem:[%s7967_s15 + $0x58] sm:$0xff] }
  0xa2   : > { %v8213_v11 = vsub.f32 %v8015_v23, %v10391_v56  ;;  %v10392_v23 = vand.u32 4294901760, %v8153_v34  ;;  %v8235_v3 = vsub.f32 %v390_v19, %v8198_v21  ;;  %v8237_v22 = vand.u32 4294901760, %v391_v9 }
  0xa3   : > { %v708_v62 = vsub.f32 %v8160_v57, %v10393_v53  ;;  %v546_v12 = vand.u32 4294901760, %v8221_v24  ;;  %v8249_v19 = vpack.c.bf16 %v700_v51, %v693_v50  ;;  %v10394_v53 = vand.u32 4294901760, %v8189_v4 }
  0xa4   : > { %6503 = vmatpush3.bf16.msra.mxu1 %v8097_v60  ;;  %6599 = vmatpush3.bf16.msra.mxu0 %v8097_v60  ;;  %v8228_v56 = vsub.f32 %v8153_v34, %v10392_v23  ;;  %v8244_v60 = vand.u32 4294901760, %v392_v28  ;;  %v10395_v21 = vand.u32 4294901760, %v8035_v30  ;;  %v10396_v40 = vand.u32 4294901760, %v8193_v20 }
  0xa5   : > { %6505 = vmatprep.subr.bf16.mxu1 %v8128_v16  ;;  %6601 = vmatprep.subr.bf16.mxu0 %v8128_v16  ;;  %v709_v24 = vand.u32 4294901760, %v708_v62  ;;  %v10397_v51 = vand.u32 4294901760, %v8038_v32  ;;  %v10398_v31 = vand.u32 4294901760, %v8054_v41 }
  0xa6   : > { %v556_v23 = vand.u32 4294901760, %v8228_v56  ;;  %v8265_v27 = vsub.f32 %v8193_v20, %v10396_v40  ;;  %v8277_v56 = vsub.f32 %v391_v9, %v8237_v22  ;;  %v8279_v40 = vand.u32 4294901760, %v393_v29  ;;  %v395_v9 = vld [vmem:[%s7967_s15 + $0x68] sm:$0xff] }
  0xa7   : > { %v8270_v50 = vsub.f32 %v8038_v32, %v10397_v51  ;;  %v10399_v32 = vand.u32 4294901760, %v8208_v52 }
  0xa8   : > { %6507 = vmatpush3.bf16.msra.mxu1 %v8128_v16  ;;  %6603 = vmatpush3.bf16.msra.mxu0 %v8128_v16  ;;  %v6516_v16 = vpack.c.bf16 %v688_v8, %v681_v54  ;;  %v715_v54 = vsub.f32 %v8177_v14, %v714_v33  ;;  %v8259_v8 = vsub.f32 %v8035_v30, %v10395_v21 }
  0xa9   : > { %6509 = vmatprep.subr.bf16.mxu1 %v8134_v7  ;;  %6605 = vmatprep.subr.bf16.mxu0 %v8134_v7  ;;  %v6520_v30 = vpack.c.bf16 %v702_v43, %v695_v0  ;;  %v722_v51 = vsub.f32 %v8208_v52, %v10399_v32  ;;  %v10401_v0 = vand.u32 4294901760, %v8089_v59  ;;  %v10402_v32 = vand.u32 4294901760, %v8049_v38  ;;  %v396_v59 = vld [vmem:[%s7967_s15 + $0x70] sm:$0xff] }
  0xaa   : > { %v716_v62 = vand.u32 4294901760, %v715_v54 }
  0xab   : > { %v8301_v21 = vsub.f32 %v8049_v38, %v10402_v32  ;;  %v10405_v38 = vand.u32 4294901760, %v8100_v61  ;;  %v10406_v32 = vand.u32 4294901760, %v8235_v3  ;;  %v397_v61 = vld [vmem:[%s7967_s15 + $0x78] sm:$0xff] }
  0xac   : > { %6511 = vmatpush3.bf16.msra.mxu1 %v8134_v7  ;;  %6607 = vmatpush3.bf16.msra.mxu0 %v8134_v7  ;;  %v8254_v7 = vsub.f32 %v8189_v4, %v10394_v53  ;;  %v394_v53 = vld [vmem:[%s7967_s15 + $0x60] sm:$0xff]  ;;  %s4703_s15 = scalar_lea.sflag [#allocation12], %s7960_s12 }
  0xad   : > { %6513 = vmatprep.subr.bf16.mxu1 %v6512_v37  ;;  %6609 = vmatprep.subr.bf16.mxu0 %v8167_v58  ;;  %v8296_v54 = vand.u32 4294901760, %v394_v53 }
  0xaf   : > { %5505 = vmatmul.mubr.f32.vlgmr.msra.gmra.mrb[0].mxu1 %v516_v55  ;;  %5673 = vmatmul.mubr.f32.vlgmr.msra.gmra.mrb[0].mxu0 %v10398_v31  ;;  %v10400_v55 = vand.u32 4294901760, %v8213_v11  ;;  %v8289_v31 = vsub.f32 %v392_v28, %v8244_v60  ;;  %v576_v28 = vand.u32 4294901760, %v8265_v27  ;;  %v585_v27 = vsub.f32 %v8235_v3, %v10406_v32 }
  0xb0   : > { %6515 = vmatpush3.bf16.msra.mxu1 %v6512_v37  ;;  %6611 = vmatpush3.bf16.msra.mxu0 %v8167_v58  ;;  %v566_v37 = vand.u32 4294901760, %v8254_v7  ;;  %v10404_v7 = vand.u32 4294901760, %v8051_v39  ;;  %v10410_v32 = vand.u32 4294901760, %v8259_v8 }
  0xb1   : > { %v729_v43 = vsub.f32 %v8213_v11, %v10400_v55  ;;  %5507 = vmatprep.mubr.f32.mxu1 %v526_v2  ;;  %5675 = vmatprep.mubr.f32.mxu0 %v10401_v0  ;;  %v10403_v2 = vand.u32 4294901760, %v8160_v57 }
  0xb2   : > { %6517 = vmatprep.subr.bf16.mxu1 %v6516_v16  ;;  %6613 = vmatprep.subr.bf16.mxu0 %v6612_v44  ;;  %v8310_v58 = vsub.f32 %v8051_v39, %v10404_v7  ;;  %v6524_v39 = vpack.c.bf16 %v716_v62, %v709_v24  ;;  %v723_v7 = vand.u32 4294901760, %v722_v51  ;;  %v736_v41 = vsub.f32 %v8259_v8, %v10410_v32 }
  0xb3   : > { %v6620_v55 = vpack.c.bf16 %v714_v33, %v10403_v2  ;;  %5508 = vmatmul.mubr.f32.gmra.mrb[2].mxu1 %v536_v15  ;;  %5676 = vmatmul.mubr.f32.gmra.mrb[2].mxu0 %v10405_v38  ;;  %v8320_v33 = vsub.f32 %v393_v29, %v8279_v40  ;;  %v8322_v2 = vand.u32 4294901760, %v395_v9  ;;  %v730_v0 = vand.u32 4294901760, %v729_v43 }
  0xb4   : > { %6519 = vmatpush3.bf16.msra.mxu1 %v6516_v16  ;;  %6615 = vmatpush3.bf16.msra.mxu0 %v6612_v44  ;;  %v10409_v38 = vand.u32 4294901760, %v8147_v25  ;;  %v8332_v29 = vsub.f32 %v394_v53, %v8296_v54  ;;  %v8335_v44 = vand.u32 4294901760, %v396_v59  ;;  %v10413_v24 = vand.u32 4294901760, %v8270_v50 }
  0xb5   : > { %10407 = vst [vmem:[#allocation36_spill] sm:$0xff] %v8320_v33  ;;  %10408 = vst [vmem:[#allocation37_spill] sm:$0xff] %v8322_v2  ;;  %5510 = vmatprep.mubr.f32.mxu1 %v546_v12  ;;  %6521 = vmatprep.subr.bf16.mxu1 %v6520_v30  ;;  %v756_v62 = vand.u32 4294901760, %v8310_v58  ;;  %v10414_v51 = vand.u32 4294901760, %v8067_v45  ;;  %v10415_v53 = vand.u32 4294901760, %v8069_v46  ;;  %v10416_v32 = vand.u32 4294901760, %v8153_v34 }
  0xb6   : > { %5678 = vmatprep.mubr.f32.mxu0 %v10409_v38  ;;  %10411 = vst [vmem:[#allocation38_spill] sm:$0xff] %v8332_v29  ;;  %10412 = vst [vmem:[#allocation39_spill] sm:$0xff] %v8335_v44  ;;  %6617 = vmatprep.subr.bf16.mxu0 %v8249_v19  ;;  %v743_v12 = vsub.f32 %v8270_v50, %v10413_v24  ;;  %v10417_v16 = vand.u32 4294901760, %v8277_v56  ;;  %v614_v15 = vand.u32 4294901760, %v8320_v33  ;;  %v10421_v34 = vand.u32 4294901760, %v8289_v31 }
  0xb7   : > { %v8345_v43 = vsub.f32 %v8067_v45, %v10414_v51  ;;  %v8350_v38 = vsub.f32 %v8069_v46, %v10415_v53  ;;  %5511 = vmatmul.mubr.f32.gmra.mrb[4].mxu1 %v556_v23  ;;  %5679 = vmatmul.mubr.f32.gmra.mrb[4].mxu0 %v10416_v32  ;;  %v8359_v25 = vsub.f32 %v395_v9, %v8322_v2  ;;  %v8361_v45 = vand.u32 4294901760, %v397_v61 }
  0xb8   : > { %v595_v24 = vsub.f32 %v8277_v56, %v10417_v16  ;;  %6523 = vmatpush3.bf16.msra.mxu1 %v6520_v30  ;;  %6619 = vmatpush3.bf16.msra.mxu0 %v8249_v19  ;;  %v586_v46 = vand.u32 4294901760, %v585_v27  ;;  %v6528_v51 = vpack.c.bf16 %v730_v0, %v723_v7  ;;  %v10419_v23 = vand.u32 4294901760, %v8208_v52 }
  0xb9   : > { %10418 = vst [vmem:[#allocation40_spill] sm:$0xff] %v8359_v25  ;;  %v10420_v53 = vand.u32 4294901760, %v8213_v11  ;;  %v605_v16 = vsub.f32 %v8289_v31, %v10421_v34  ;;  %5513 = vmatprep.mubr.f32.mxu1 %v566_v37  ;;  %v10422_v9 = vand.u32 4294901760, %v8189_v4  ;;  %v737_v2 = vand.u32 4294901760, %v736_v41  ;;  %6525 = vmatprep.subr.bf16.mxu1 %v6524_v39 }
  0xba   : > { %v624_v30 = vand.u32 4294901760, %v8332_v29  ;;  %v10423_v19 = vand.u32 4294901760, %v8301_v21  ;;  %v8378_v27 = vsub.f32 %v396_v59, %v8335_v44  ;;  %6621 = vmatprep.subr.bf16.mxu0 %v6620_v55  ;;  %v744_v7 = vand.u32 4294901760, %v743_v12 }
  0xbb   : > { %v6624_v32 = vpack.c.bf16 %v10420_v53, %v10419_v23  ;;  %5681 = vmatprep.mubr.f32.mxu0 %v10422_v9  ;;  %v757_v23 = vsub.f32 %v8310_v58, %v756_v62  ;;  %v763_v34 = vand.u32 4294901760, %v8345_v43  ;;  %v770_v37 = vand.u32 4294901760, %v8350_v38  ;;  %5514 = vmatmul.mubr.f32.gmra.mrb[6].mxu1 %v576_v28 }
  0xbc   : > { %v750_v0 = vsub.f32 %v8301_v21, %v10423_v19  ;;  %v10424_v41 = vand.u32 4294901760, %v8193_v20  ;;  %v596_v53 = vand.u32 4294901760, %v595_v24  ;;  %v615_v9 = vsub.f32 %v8320_v33, %v614_v15  ;;  %6527 = vmatpush3.bf16.msra.mxu1 %v6524_v39  ;;  %6623 = vmatpush3.bf16.msra.mxu0 %v6620_v55 }
  0xbd   : > { %v634_v19 = vand.u32 4294901760, %v8359_v25  ;;  %v8388_v59 = vsub.f32 %v397_v61, %v8361_v45  ;;  %v606_v12 = vand.u32 4294901760, %v605_v16  ;;  %5516 = vmatprep.mubr.f32.mxu1 %v586_v46  ;;  %v10425_v4 = vand.u32 4294901760, %v8235_v3  ;;  %6529 = vmatprep.subr.bf16.mxu1 %v6528_v51 }
  0xbe   : > { %5682 = vmatmul.mubr.f32.gmra.mrb[6].mxu0 %v10424_v41  ;;  %v10426_v28 = vand.u32 4294901760, %v8259_v8  ;;  %v10427_v20 = vand.u32 4294901760, %v8270_v50  ;;  %v625_v24 = vsub.f32 %v8332_v29, %v624_v30  ;;  %v751_v33 = vand.u32 4294901760, %v750_v0  ;;  %6625 = vmatprep.subr.bf16.mxu0 %v6624_v32 }
  0xbf   : > { %5684 = vmatprep.mubr.f32.mxu0 %v10425_v4  ;;  %v644_v44 = vand.u32 4294901760, %v8378_v27  ;;  %v6532_v61 = vpack.c.bf16 %v744_v7, %v737_v2  ;;  %v758_v39 = vand.u32 4294901760, %v757_v23  ;;  %v764_v55 = vsub.f32 %v8345_v43, %v763_v34  ;;  %5517 = vmatmul.mubr.f32.gmra.mrb[8].mxu1 %v596_v53 }
  0xc0   : > { %v6628_v41 = vpack.c.bf16 %v10427_v20, %v10426_v28  ;;  %v771_v46 = vsub.f32 %v8350_v38, %v770_v37  ;;  %v10428_v4 = vand.u32 4294901760, %v8277_v56  ;;  %v616_v16 = vand.u32 4294901760, %v615_v9  ;;  %6531 = vmatpush3.bf16.msra.mxu1 %v6528_v51  ;;  %6627 = vmatpush3.bf16.msra.mxu0 %v6624_v32 }
  0xc1   : > { %v635_v20 = vsub.f32 %v8359_v25, %v634_v19  ;;  %v654_v28 = vand.u32 4294901760, %v8388_v59  ;;  %5519 = vmatprep.mubr.f32.mxu1 %v606_v12  ;;  %v10429_v0 = vand.u32 4294901760, %v8289_v31  ;;  %v626_v2 = vand.u32 4294901760, %v625_v24  ;;  %6533 = vmatprep.subr.bf16.mxu1 %v6532_v61 }
  0xc2   : > { %5685 = vmatmul.mubr.f32.gmra.mrb[8].mxu0 %v10428_v4  ;;  %v645_v7 = vsub.f32 %v8378_v27, %v644_v44  ;;  %6629 = vmatprep.subr.bf16.mxu0 %v6628_v41  ;;  %v6536_v23 = vpack.c.bf16 %v758_v39, %v751_v33  ;;  %v10430_v53 = vand.u32 4294901760, %v8301_v21  ;;  %v765_v9 = vand.u32 4294901760, %v764_v55  ;;  %v10440_v55 = vld [vmem:[#allocation28_spill] sm:$0xff] }
  0xc3   : > { %5687 = vmatprep.mubr.f32.mxu0 %v10429_v0  ;;  %v772_v29 = vand.u32 4294901760, %v771_v46  ;;  %5520 = vmatmul.mubr.f32.gmra.mrb[10].mxu1 %v616_v16  ;;  %v636_v25 = vand.u32 4294901760, %v635_v20  ;;  %v655_v51 = vsub.f32 %v8388_v59, %v654_v28  ;;  %v6636_v24 = vpack.c.bf16 %v770_v37, %v763_v34  ;;  %v8477_v34 = vld [vmem:[#allocation7 + $0x10] sm:$0xff]  ;;  %v8479_v37 = vld [vmem:[#allocation7 + $0x18] sm:$0xff]  ;;  %v8507_v0 = vld [vmem:[#allocation7 + $0x20] sm:$0xff] }
  0xc4   : > { %v6632_v4 = vpack.c.bf16 %v756_v62, %v10430_v53  ;;  %6535 = vmatpush3.bf16.msra.mxu1 %v6532_v61  ;;  %6631 = vmatpush3.bf16.msra.mxu0 %v6628_v41  ;;  %v646_v32 = vand.u32 4294901760, %v645_v7  ;;  %v8483_v41 = vld [vmem:[#allocation8 + $0x10] sm:$0xff]  ;;  %v8485_v61 = vld [vmem:[#allocation8 + $0x18] sm:$0xff]  ;;  %v10214_v39 = vand.u32 4294901760, %v8479_v37  ;;  %v8513_v7 = vld [vmem:[#allocation8 + $0x20] sm:$0xff] }
  0xc5   : > { %5522 = vmatprep.mubr.f32.mxu1 %v626_v2  ;;  %6537 = vmatprep.subr.bf16.mxu1 %v6536_v23  ;;  %v6540_v12 = vpack.c.bf16 %v772_v29, %v765_v9  ;;  %v656_v33 = vand.u32 4294901760, %v655_v51  ;;  %v6572_v29 = vpack.c.bf16 %v8350_v38, %v8345_v43  ;;  %v10439_v43 = vld [vmem:[#allocation39_spill] sm:$0xff]  ;;  %v10215_v38 = vand.u32 4294901760, %v8477_v34  ;;  %v8511_v2 = vld [vmem:[#allocation7 + $0x28] sm:$0xff]  ;;  %v10443_v53 = vld [vmem:[#allocation20_spill] sm:$0xff] }
  0xc6   : > { %5688 = vmatmul.mubr.f32.gmra.mrb[10].mxu0 %v614_v15  ;;  %6633 = vmatprep.subr.bf16.mxu0 %v6632_v4  ;;  %v6544_v15 = vpack.c.bf16 %v8044_v36, %v8042_v35  ;;  %v6552_v35 = vpack.c.bf16 %v8119_v6, %v8114_v5  ;;  %v10431_v36 = vld [vmem:[#allocation30_spill] sm:$0xff]  ;;  %v6564_v5 = vpack.c.bf16 %v8270_v50, %v8259_v8  ;;  %v10436_v6 = vld [vmem:[#allocation25_spill] sm:$0xff]  ;;  %v8463_v8 = vld [vmem:[#allocation8] sm:$0xff]  ;;  %v10213_v20 = vand.u32 4294901760, %v8483_v41 }
  0xc7   : > { %5690 = vmatprep.mubr.f32.mxu0 %v624_v30  ;;  %5523 = vmatmul.mubr.f32.gmra.mrb[12].mxu1 %v636_v25  ;;  %v6548_v25 = vpack.c.bf16 %v8075_v49, %v8073_v48  ;;  %v6560_v48 = vpack.c.bf16 %v8213_v11, %v8208_v52  ;;  %v10433_v49 = vld [vmem:[#allocation32_spill] sm:$0xff]  ;;  %v6568_v11 = vpack.c.bf16 %v8310_v58, %v8301_v21  ;;  %v8461_v52 = vld [vmem:[#allocation7 + $0x8] sm:$0xff]  ;;  %v10437_v58 = vld [vmem:[#allocation27_spill] sm:$0xff]  ;;  %v3081_v62 = vand.u32 4294901760, %v8463_v8 }
  0xc8   : > { %6539 = vmatpush3.bf16.msra.mxu1 %v6536_v23  ;;  %6635 = vmatpush3.bf16.msra.mxu0 %v6632_v4  ;;  %v8465_v50 = vld [vmem:[#allocation8 + $0x8] sm:$0xff]  ;;  %v8524_v4 = vpack.c.bf16 %v10214_v39, %v10215_v38  ;;  %v10211_v9 = vand.u32 4294901760, %v8507_v0 }
  0xc9   : > { %5525 = vmatprep.mubr.f32.mxu1 %v646_v32  ;;  %6541 = vmatprep.subr.bf16.mxu1 %v6540_v12  ;;  %v3084_v30 = vand.u32 4294901760, %v8465_v50  ;;  %v8515_v23 = vld [vmem:[#allocation8 + $0x28] sm:$0xff]  ;;  %v10209_v32 = vand.u32 4294901760, %v8513_v7  ;;  %v8717_v38 = vsub.f32 %v8463_v8, %v3081_v62 }
  0xca   : > { %5691 = vmatmul.mubr.f32.gmra.mrb[12].mxu0 %v634_v19  ;;  %6637 = vmatprep.subr.bf16.mxu0 %v6636_v24  ;;  %v10438_v19 = vld [vmem:[#allocation37_spill] sm:$0xff]  ;;  %10444 = vst [vmem:[#allocation32_spill] sm:$0xff] %v8524_v4 }
  0xcb   : > { %5693 = vmatprep.mubr.f32.mxu0 %v644_v44  ;;  %5526 = vmatmul.mubr.f32.gmra.mrb[14].mxu1 %v656_v33  ;;  %v1734_v44 = vand.u32 4294901760, %v8461_v52  ;;  %v8503_v16 = vpack.c.bf16 %v3084_v30, %v3081_v62  ;;  %v8540_v33 = vld [vmem:[#allocation7 + $0x38] sm:$0xff]  ;;  %v10233_v62 = vand.u32 4294901760, %v8717_v38 }
  0xcc   : > { %6543 = vmatpush3.bf16.msra.mxu1 %v6540_v12  ;;  %6639 = vmatpush3.bf16.msra.mxu0 %v6636_v24  ;;  %v10208_v12 = vand.u32 4294901760, %v8515_v23  ;;  %v8538_v24 = vld [vmem:[#allocation7 + $0x30] sm:$0xff] }
  0xcd   : > { %5560 = vmatprep.mubr.f32.mxu1 %v8000_v17  ;;  %6545 = vmatprep.subr.bf16.mxu1 %v6544_v15  ;;  %v8712_v39 = vsub.f32 %v8461_v52, %v1734_v44  ;;  %v8728_v52 = vsub.f32 %v8465_v50, %v3084_v30 }
  0xce   : > { %5694 = vmatmul.mubr.f32.gmra.mrb[14].mxu0 %v654_v28  ;;  %6641 = vmatprep.subr.bf16.mxu0 %v7985_v10  ;;  %v10212_v28 = vand.u32 4294901760, %v8485_v61 }
  0xcf   : > { %5728 = vmatprep.mubr.f32.mxu0 %v8000_v17  ;;  %5561 = vmatmul.mubr.f32.vlgmr.msra.gmra.mrb[0].mxu1 %v8023_v26  ;;  %v10230_v30 = vand.u32 4294901760, %v8728_v52 }
  0xd0   : > { %6547 = vmatpush3.bf16.msra.mxu1 %v6544_v15  ;;  %5563 = vmatprep.mubr.f32.mxu1 %v8056_v42  ;;  %v8533_v51 = vpack.c.bf16 %v10212_v28, %v10213_v20  ;;  %v10446_v15 = vld [vmem:[#allocation22_spill] sm:$0xff] }
  0xd1   : > { %6549 = vmatprep.subr.bf16.mxu1 %v6548_v25  ;;  %v8702_v28 = vld [vmem:[#allocation8 + $0x70] sm:$0xff] }
  0xd2   : > { %5729 = vmatmul.mubr.f32.vlgmr.msra.gmra.mrb[0].mxu0 %v8023_v26 }
  0xd3   : > { %6643 = vmatpush3.bf16.msra.mxu0 %v7985_v10  ;;  %5731 = vmatprep.mubr.f32.mxu0 %v8056_v42  ;;  %v6556_v10 = vpack.c.bf16 %v8177_v14, %v8160_v57  ;;  %v10434_v57 = vld [vmem:[#allocation35_spill] sm:$0xff]  ;;  %v8457_v14 = vld [vmem:[#allocation7] sm:$0xff] }
  0xd4   : > { %6645 = vmatprep.subr.bf16.mxu0 %v7989_v13  ;;  %5564 = vmatmul.mubr.f32.gmra.mrb[2].mxu1 %v8071_v47  ;;  %v1731_v21 = vand.u32 4294901760, %v8457_v14  ;;  %10445 = vst [vmem:[#allocation35_spill] sm:$0xff] %v8533_v51 }
  0xd5   : > { %6551 = vmatpush3.bf16.msra.mxu1 %v6548_v25  ;;  %5566 = vmatprep.mubr.f32.mxu1 %v8103_v63  ;;  %v8544_v25 = vld [vmem:[#allocation8 + $0x30] sm:$0xff] }
  0xd6   : > { %5732 = vmatmul.mubr.f32.gmra.mrb[2].mxu0 %v8071_v47  ;;  %6553 = vmatprep.subr.bf16.mxu1 %v6552_v35  ;;  %v8497_v46 = vpack.c.bf16 %v1734_v44, %v1731_v21  ;;  %v8707_v20 = vsub.f32 %v8457_v14, %v1731_v21  ;;  %v10226_v14 = vand.u32 4294901760, %v8702_v28  ;;  %v10227_v44 = vand.u32 4294901760, %v8712_v39 }
  0xd7   : > { %6647 = vmatpush3.bf16.msra.mxu0 %v7989_v13  ;;  %5734 = vmatprep.mubr.f32.mxu0 %v8103_v63  ;;  %v10432_v13 = vld [vmem:[#allocation21_spill] sm:$0xff] }
  0xd8   : > { %6649 = vmatprep.subr.bf16.mxu0 %v8008_v18  ;;  %5567 = vmatmul.mubr.f32.gmra.mrb[4].mxu1 %v8106_v1  ;;  %10441 = vst [vmem:[#allocation30_spill] sm:$0xff] %v8497_v46  ;;  %10442 = vst [vmem:[#allocation21_spill] sm:$0xff] %v8503_v16  ;;  %v10225_v21 = vand.u32 4294901760, %v8707_v20 }
  0xd9   : > { %6555 = vmatpush3.bf16.msra.mxu1 %v6552_v35  ;;  %5569 = vmatprep.mubr.f32.mxu1 %v10431_v36  ;;  %v8546_v35 = vld [vmem:[#allocation8 + $0x38] sm:$0xff] }
  0xda   : > { %5735 = vmatmul.mubr.f32.gmra.mrb[4].mxu0 %v8106_v1  ;;  %6557 = vmatprep.subr.bf16.mxu1 %v6556_v10 }
  0xdb   : > { %6651 = vmatpush3.bf16.msra.mxu0 %v8008_v18  ;;  %5737 = vmatprep.mubr.f32.mxu0 %v10431_v36  ;;  %v10435_v18 = vld [vmem:[#allocation23_spill] sm:$0xff] }
  0xdc   : > { %6653 = vmatprep.subr.bf16.mxu0 %v10432_v13  ;;  %5570 = vmatmul.mubr.f32.gmra.mrb[6].mxu1 %v10433_v49 }
  0xdd   : > { %6559 = vmatpush3.bf16.msra.mxu1 %v6556_v10  ;;  %5572 = vmatprep.mubr.f32.mxu1 %v10434_v57  ;;  %v10447_v10 = vld [vmem:[#allocation24_spill] sm:$0xff] }
  0xde   : > { %5738 = vmatmul.mubr.f32.gmra.mrb[6].mxu0 %v10433_v49  ;;  %6561 = vmatprep.subr.bf16.mxu1 %v6560_v48 }
  0xdf   : > { %6655 = vmatpush3.bf16.msra.mxu0 %v10432_v13  ;;  %5740 = vmatprep.mubr.f32.mxu0 %v10434_v57  ;;  %v10207_v13 = vand.u32 4294901760, %v8538_v24 }
  0xe0   : > { %6657 = vmatprep.subr.bf16.mxu0 %v10435_v18  ;;  %5573 = vmatmul.mubr.f32.gmra.mrb[8].mxu1 %v8237_v22 }
  0xe1   : > { %6563 = vmatpush3.bf16.msra.mxu1 %v6560_v48  ;;  %5575 = vmatprep.mubr.f32.mxu1 %v8244_v60  ;;  %v10206_v48 = vand.u32 4294901760, %v8540_v33 }
  0xe2   : > { %5741 = vmatmul.mubr.f32.gmra.mrb[8].mxu0 %v8237_v22  ;;  %6565 = vmatprep.subr.bf16.mxu1 %v6564_v5 }
  0xe3   : > { %6659 = vmatpush3.bf16.msra.mxu0 %v10435_v18  ;;  %5743 = vmatprep.mubr.f32.mxu0 %v8244_v60  ;;  %v10205_v18 = vand.u32 4294901760, %v8544_v25 }
  0xe4   : > { %6661 = vmatprep.subr.bf16.mxu0 %v10436_v6  ;;  %5576 = vmatmul.mubr.f32.gmra.mrb[10].mxu1 %v8279_v40 }
  0xe5   : > { %6567 = vmatpush3.bf16.msra.mxu1 %v6564_v5  ;;  %5578 = vmatprep.mubr.f32.mxu1 %v8296_v54  ;;  %v10204_v5 = vand.u32 4294901760, %v8546_v35 }
  0xe6   : > { %5744 = vmatmul.mubr.f32.gmra.mrb[10].mxu0 %v8279_v40  ;;  %6569 = vmatprep.subr.bf16.mxu1 %v6568_v11 }
  0xe7   : > { %6663 = vmatpush3.bf16.msra.mxu0 %v10436_v6  ;;  %5746 = vmatprep.mubr.f32.mxu0 %v8296_v54  ;;  %v10450_v6 = vld [vmem:[#allocation26_spill] sm:$0xff] }
  0xe8   : > { %6665 = vmatprep.subr.bf16.mxu0 %v10437_v58  ;;  %5579 = vmatmul.mubr.f32.gmra.mrb[12].mxu1 %v10438_v19 }
  0xe9   : > { %6571 = vmatpush3.bf16.msra.mxu1 %v6568_v11  ;;  %5581 = vmatprep.mubr.f32.mxu1 %v10439_v43  ;;  %v10451_v11 = vld [vmem:[#allocation29_spill] sm:$0xff] }
  0xea   : > { %5747 = vmatmul.mubr.f32.gmra.mrb[12].mxu0 %v10438_v19  ;;  %6573 = vmatprep.subr.bf16.mxu1 %v6572_v29  ;;  %10466 = vst [vmem:[#allocation29_spill] sm:$0xff] %v8707_v20 }
  0xeb   : > { %6667 = vmatpush3.bf16.msra.mxu0 %v10437_v58  ;;  %5749 = vmatprep.mubr.f32.mxu0 %v10439_v43  ;;  %v8582_v58 = vpack.c.bf16 %v10206_v48, %v10207_v13 }
  0xec   : > { %6669 = vmatprep.subr.bf16.mxu0 %v10440_v55  ;;  %5582 = vmatmul.mubr.f32.gmra.mrb[14].mxu1 %v8361_v45 }
  0xed   : > { %6575 = vmatpush3.bf16.msra.mxu1 %v6572_v29  ;;  %5616 = vmatprep.mubr.f32.mxu1 %v10443_v53  ;;  %10452 = vst [vmem:[#allocation27_spill] sm:$0xff] %v8582_v58  ;;  %v10455_v29 = vld [vmem:[#allocation33_spill] sm:$0xff] }
  0xee   : > { %5750 = vmatmul.mubr.f32.gmra.mrb[14].mxu0 %v8361_v45  ;;  %6673 = vmatprep.subr.bf16.mxu1 %v8497_v46  ;;  %10468 = vst [vmem:[#allocation33_spill] sm:$0xff] %v8717_v38 }
  0xef   : > { %6671 = vmatpush3.bf16.msra.mxu0 %v10440_v55  ;;  %5784 = vmatprep.mubr.f32.mxu0 %v8000_v17  ;;  %v10210_v17 = vand.u32 4294901760, %v8511_v2  ;;  %v10456_v55 = vld [vmem:[#allocation34_spill] sm:$0xff] }
  0xf0   : > { %6865 = vmatprep.subr.bf16.mxu0 %v8503_v16  ;;  %5617 = vmatmul.mubr.f32.vlgmr.msra.gmra.mrb[0].mxu1 %v10446_v15  ;;  %10469 = vst [vmem:[#allocation34_spill] sm:$0xff] %v8728_v52 }
  0xf1   : > { %5619 = vmatprep.mubr.f32.mxu1 %v10447_v10  ;;  %6675 = vmatpush3.bf16.msra.mxu1 %v8497_v46  ;;  %v8651_v10 = vld [vmem:[#allocation8 + $0x58] sm:$0xff] }
  0xf2   : > { %5785 = vmatmul.mubr.f32.vlgmr.msra.gmra.mrb[0].mxu0 %v8023_v26  ;;  %6677 = vmatprep.subr.bf16.mxu1 %v8524_v4  ;;  %v8560_v26 = vpack.c.bf16 %v10210_v17, %v10211_v9  ;;  %v8698_v17 = vld [vmem:[#allocation7 + $0x70] sm:$0xff]  ;;  %v8700_v9 = vld [vmem:[#allocation7 + $0x78] sm:$0xff] }
  0xf3   : > { %5787 = vmatprep.mubr.f32.mxu0 %v8056_v42  ;;  %6867 = vmatpush3.bf16.msra.mxu0 %v8503_v16  ;;  %v8566_v42 = vpack.c.bf16 %v10208_v12, %v10209_v32 }
  0xf4   : > { %6869 = vmatprep.subr.bf16.mxu0 %v8533_v51  ;;  %10448 = vst [vmem:[#allocation23_spill] sm:$0xff] %v8560_v26  ;;  %5620 = vmatmul.mubr.f32.gmra.mrb[2].mxu1 %v10450_v6 }
  0xf5   : > { %10449 = vst [vmem:[#allocation25_spill] sm:$0xff] %v8566_v42  ;;  %5622 = vmatprep.mubr.f32.mxu1 %v10451_v11  ;;  %6679 = vmatpush3.bf16.msra.mxu1 %v8524_v4  ;;  %v10220_v11 = vand.u32 4294901760, %v8651_v10 }
  0xf6   : > { %5788 = vmatmul.mubr.f32.gmra.mrb[2].mxu0 %v8071_v47  ;;  %6681 = vmatprep.subr.bf16.mxu1 %v8560_v26  ;;  %v8588_v47 = vpack.c.bf16 %v10204_v5, %v10205_v18  ;;  %v8679_v18 = vld [vmem:[#allocation8 + $0x68] sm:$0xff] }
  0xf7   : > { %5790 = vmatprep.mubr.f32.mxu0 %v8103_v63  ;;  %6871 = vmatpush3.bf16.msra.mxu0 %v8533_v51  ;;  %v10454_v63 = vld [vmem:[#allocation31_spill] sm:$0xff]  ;;  %v10216_v13 = vand.u32 4294901760, %v8679_v18 }
  0xf8   : > { %6873 = vmatprep.subr.bf16.mxu0 %v8566_v42  ;;  %10453 = vst [vmem:[#allocation37_spill] sm:$0xff] %v8588_v47  ;;  %5623 = vmatmul.mubr.f32.gmra.mrb[4].mxu1 %v10454_v63  ;;  %10467 = vst [vmem:[#allocation31_spill] sm:$0xff] %v8712_v39 }
  0xf9   : > { %5625 = vmatprep.mubr.f32.mxu1 %v10455_v29  ;;  %6683 = vmatpush3.bf16.msra.mxu1 %v8560_v26 }
  0xfa   : > { %5791 = vmatmul.mubr.f32.gmra.mrb[4].mxu0 %v8106_v1  ;;  %6685 = vmatprep.subr.bf16.mxu1 %v8582_v58  ;;  %v10457_v1 = vld [vmem:[#allocation36_spill] sm:$0xff] }
  0xfb   : > { %5793 = vmatprep.mubr.f32.mxu0 %v10431_v36  ;;  %6875 = vmatpush3.bf16.msra.mxu0 %v8566_v42  ;;  %v10458_v36 = vld [vmem:[#allocation38_spill] sm:$0xff] }
  0xfc   : > { %6877 = vmatprep.subr.bf16.mxu0 %v8588_v47  ;;  %5626 = vmatmul.mubr.f32.gmra.mrb[6].mxu1 %v10456_v55  ;;  %v8670_v55 = vld [vmem:[#allocation7 + $0x60] sm:$0xff] }
  0xfd   : > { %5628 = vmatprep.mubr.f32.mxu1 %v8235_v3  ;;  %6687 = vmatpush3.bf16.msra.mxu1 %v8582_v58  ;;  %v10459_v3 = vld [vmem:[#allocation40_spill] sm:$0xff] }
  0xfe   : > { %5794 = vmatmul.mubr.f32.gmra.mrb[6].mxu0 %v10433_v49 }
  0xff   : > { %5796 = vmatprep.mubr.f32.mxu0 %v10434_v57  ;;  %6879 = vmatpush3.bf16.msra.mxu0 %v8588_v47  ;;  %v8642_v57 = vld [vmem:[#allocation7 + $0x50] sm:$0xff] }
 0x100   : > { %5629 = vmatmul.mubr.f32.gmra.mrb[8].mxu1 %v8277_v56  ;;  %v8622_v56 = vld [vmem:[#allocation8 + $0x40] sm:$0xff]  ;;  %v10229_v53 = vand.u32 4294901760, %v8642_v57 }
 0x101   : > { %5631 = vmatprep.mubr.f32.mxu1 %v8289_v31 }
 0x102   : > { %5797 = vmatmul.mubr.f32.gmra.mrb[8].mxu0 %v8237_v22  ;;  %v8620_v22 = vld [vmem:[#allocation7 + $0x48] sm:$0xff] }
 0x103   : > { %5799 = vmatprep.mubr.f32.mxu0 %v8244_v60  ;;  %v8618_v60 = vld [vmem:[#allocation7 + $0x40] sm:$0xff]  ;;  %v1758_v31 = vand.u32 4294901760, %v8620_v22 }
 0x104   : > { %5632 = vmatmul.mubr.f32.gmra.mrb[10].mxu1 %v10457_v1  ;;  %v8672_v1 = vld [vmem:[#allocation7 + $0x68] sm:$0xff] }
 0x105   : > { %5634 = vmatprep.mubr.f32.mxu1 %v10458_v36  ;;  %v8674_v36 = vld [vmem:[#allocation8 + $0x60] sm:$0xff]  ;;  %v10218_v5 = vand.u32 4294901760, %v8672_v1 }
 0x106   : > { %5800 = vmatmul.mubr.f32.gmra.mrb[10].mxu0 %v8279_v40  ;;  %v1755_v40 = vand.u32 4294901760, %v8618_v60  ;;  %v10217_v48 = vand.u32 4294901760, %v8674_v36 }
 0x107   : > { %5802 = vmatprep.mubr.f32.mxu0 %v8296_v54  ;;  %v8626_v54 = vld [vmem:[#allocation8 + $0x48] sm:$0xff] }
 0x108   : > { %5635 = vmatmul.mubr.f32.gmra.mrb[12].mxu1 %v10459_v3  ;;  %v3108_v49 = vand.u32 4294901760, %v8626_v54  ;;  %v10219_v3 = vand.u32 4294901760, %v8670_v55  ;;  %v8696_v32 = vpack.c.bf16 %v10216_v13, %v10217_v48  ;;  %v10223_v13 = vand.u32 4294901760, %v8698_v17 }
 0x109   : > { %5637 = vmatprep.mubr.f32.mxu1 %v8378_v27  ;;  %v3105_v27 = vand.u32 4294901760, %v8622_v56  ;;  %v10222_v48 = vand.u32 4294901760, %v8700_v9 }
 0x10a   : > { %5803 = vmatmul.mubr.f32.gmra.mrb[12].mxu0 %v10438_v19  ;;  %v8644_v19 = vld [vmem:[#allocation7 + $0x58] sm:$0xff]  ;;  %v8690_v12 = vpack.c.bf16 %v10218_v5, %v10219_v3  ;;  %10465 = vst [vmem:[#allocation26_spill] sm:$0xff] %v8696_v32 }
 0x10b   : > { %5805 = vmatprep.mubr.f32.mxu0 %v10439_v43  ;;  %v8646_v43 = vld [vmem:[#allocation8 + $0x50] sm:$0xff]  ;;  %v10228_v15 = vand.u32 4294901760, %v8644_v19  ;;  %v8722_v5 = vld [vmem:[#allocation8 + $0x78] sm:$0xff]  ;;  %v8741_v50 = vpack.c.bf16 %v10222_v48, %v10223_v13  ;;  %v3325_v48 = vsub.f32 %v8717_v38, %v10233_v62  ;;  %v3332_v13 = vsub.f32 %v8728_v52, %v10230_v30 }
 0x10c   : > { %5638 = vmatmul.mubr.f32.gmra.mrb[14].mxu1 %v8388_v59  ;;  %v8640_v59 = vpack.c.bf16 %v3108_v49, %v3105_v27  ;;  %v10221_v6 = vand.u32 4294901760, %v8646_v43  ;;  %10464 = vst [vmem:[#allocation24_spill] sm:$0xff] %v8690_v12  ;;  %v10224_v8 = vand.u32 4294901760, %v8722_v5  ;;  %v8775_v30 = vsub.f32 %v8618_v60, %v1755_v40 }
 0x10d   : > { %v8662_v63 = vpack.c.bf16 %v10228_v15, %v10229_v53  ;;  %10470 = vst [vmem:[#allocation36_spill] sm:$0xff] %v8741_v50 }
 0x10e   : > { %5806 = vmatmul.mubr.f32.gmra.mrb[14].mxu0 %v8361_v45  ;;  %v8634_v45 = vpack.c.bf16 %v1758_v31, %v1755_v40  ;;  %10461 = vst [vmem:[#allocation28_spill] sm:$0xff] %v8640_v59  ;;  %6881 = vmatprep.subr.bf16.mxu0 %v8640_v59  ;;  %v8668_v29 = vpack.c.bf16 %v10220_v11, %v10221_v6  ;;  %10472 = vst [vmem:[#allocation40_spill] sm:$0xff] %v8775_v30 }
 0x10f   : > { %6883 = vmatpush3.bf16.msra.mxu0 %v8640_v59  ;;  %10462 = vst [vmem:[#allocation20_spill] sm:$0xff] %v8662_v63  ;;  %v8748_v3 = vpack.c.bf16 %v10224_v8, %v10226_v14  ;;  %v1975_v11 = vsub.f32 %v8707_v20, %v10225_v21  ;;  %v1982_v6 = vsub.f32 %v8712_v39, %v10227_v44  ;;  %v3326_v14 = vand.u32 4294901760, %v3325_v48 }
 0x110   : > { %10460 = vst [vmem:[#allocation39_spill] sm:$0xff] %v8634_v45  ;;  %6689 = vmatprep.subr.bf16.mxu1 %v8634_v45  ;;  %10463 = vst [vmem:[#allocation22_spill] sm:$0xff] %v8668_v29  ;;  %6885 = vmatprep.subr.bf16.mxu0 %v8668_v29  ;;  %v3333_v44 = vand.u32 4294901760, %v3332_v13  ;;  %v8780_v48 = vsub.f32 %v8620_v22, %v1758_v31  ;;  %v10232_v13 = vand.u32 4294901760, %v8775_v30 }
 0x111   : > { %6691 = vmatpush3.bf16.msra.mxu1 %v8634_v45  ;;  %10471 = vst [vmem:[#allocation38_spill] sm:$0xff] %v8748_v3  ;;  %v1976_v8 = vand.u32 4294901760, %v1975_v11  ;;  %v1983_v21 = vand.u32 4294901760, %v1982_v6  ;;  %v8787_v11 = vsub.f32 %v8622_v56, %v3105_v27  ;;  %v10476_v56 = vand.u32 4294901760, %v8642_v57 }
 0x112   : > { %6693 = vmatprep.subr.bf16.mxu1 %v8662_v63  ;;  %v8768_v53 = vpack.c.bf16 %v3333_v44, %v3326_v14  ;;  %10473 = vst [vmem:[#allocation41_spill] sm:$0xff] %v8780_v48  ;;  %v10231_v6 = vand.u32 4294901760, %v8780_v48  ;;  %v8792_v14 = vsub.f32 %v8626_v54, %v3108_v49  ;;  %v2031_v60 = vsub.f32 %v8775_v30, %v10232_v13 }
 0x113   : > { %6887 = vmatpush3.bf16.msra.mxu0 %v8668_v29  ;;  %v8766_v15 = vpack.c.bf16 %v1983_v21, %v1976_v8  ;;  %10474 = vst [vmem:[#allocation42_spill] sm:$0xff] %v8787_v11  ;;  %v10234_v40 = vand.u32 4294901760, %v8787_v11  ;;  %v8805_v27 = vsub.f32 %v8642_v57, %v10476_v56  ;;  %v10478_v54 = vand.u32 4294901760, %v8644_v19 }
 0x114   : > { %6889 = vmatprep.subr.bf16.mxu0 %v8696_v32  ;;  %10475 = vst [vmem:[#allocation43_spill] sm:$0xff] %v8792_v14  ;;  %v2038_v22 = vsub.f32 %v8780_v48, %v10231_v6  ;;  %v10235_v31 = vand.u32 4294901760, %v8792_v14  ;;  %v2032_v8 = vand.u32 4294901760, %v2031_v60  ;;  %v10480_v21 = vand.u32 4294901760, %v8646_v43 }
 0x115   : > { %6695 = vmatpush3.bf16.msra.mxu1 %v8662_v63  ;;  %10477 = vst [vmem:[#allocation44_spill] sm:$0xff] %v8805_v27  ;;  %v8810_v49 = vsub.f32 %v8644_v19, %v10478_v54  ;;  %v3381_v60 = vsub.f32 %v8787_v11, %v10234_v40  ;;  %v10482_v56 = vand.u32 4294901760, %v8651_v10  ;;  %v10238_v19 = vand.u32 4294901760, %v8805_v27 }
 0x116   : > { %6697 = vmatprep.subr.bf16.mxu1 %v8690_v12  ;;  %v8815_v44 = vsub.f32 %v8646_v43, %v10480_v21  ;;  %v2039_v6 = vand.u32 4294901760, %v2038_v22  ;;  %v3388_v57 = vsub.f32 %v8792_v14, %v10235_v31 }
 0x117   : > { %6891 = vmatpush3.bf16.msra.mxu0 %v8696_v32  ;;  %10479 = vst [vmem:[#allocation45_spill] sm:$0xff] %v8810_v49  ;;  %v8826_v13 = vsub.f32 %v8651_v10, %v10482_v56  ;;  %v10239_v54 = vand.u32 4294901760, %v8810_v49  ;;  %v3382_v21 = vand.u32 4294901760, %v3381_v60  ;;  %v2045_v31 = vsub.f32 %v8805_v27, %v10238_v19 }
 0x118   : > { %6893 = vmatprep.subr.bf16.mxu0 %v8748_v3  ;;  %10481 = vst [vmem:[#allocation46_spill] sm:$0xff] %v8815_v44  ;;  %v10240_v43 = vand.u32 4294901760, %v8815_v44  ;;  %v8831_v22 = vpack.c.bf16 %v2039_v6, %v2032_v8  ;;  %v3389_v62 = vand.u32 4294901760, %v3388_v57  ;;  %v10486_v57 = vand.u32 4294901760, %v8672_v1 }
 0x119   : > { %6699 = vmatpush3.bf16.msra.mxu1 %v8690_v12  ;;  %10483 = vst [vmem:[#allocation47_spill] sm:$0xff] %v8826_v13  ;;  %v10245_v40 = vand.u32 4294901760, %v8826_v13  ;;  %v2052_v10 = vsub.f32 %v8810_v49, %v10239_v54  ;;  %v10488_v54 = vand.u32 4294901760, %v8674_v36  ;;  %v10490_v12 = vand.u32 4294901760, %v8679_v18 }
 0x11a   : > { %6701 = vmatprep.subr.bf16.mxu1 %v8741_v50  ;;  %v3395_v56 = vsub.f32 %v8815_v44, %v10240_v43  ;;  %v8848_v8 = vpack.c.bf16 %v3389_v62, %v3382_v21  ;;  %v8856_v19 = vsub.f32 %v8672_v1, %v10486_v57 }
 0x11b   : > { %6895 = vmatpush3.bf16.msra.mxu0 %v8748_v3  ;;  %v10484_v3 = vand.u32 4294901760, %v8670_v55  ;;  %v3402_v60 = vsub.f32 %v8826_v13, %v10245_v40  ;;  %v8861_v43 = vsub.f32 %v8674_v36, %v10488_v54  ;;  %v2053_v32 = vand.u32 4294901760, %v2052_v10 }
 0x11c   : > { %6897 = vmatprep.subr.bf16.mxu0 %v8768_v53  ;;  %10487 = vst [vmem:[#allocation49_spill] sm:$0xff] %v8856_v19  ;;  %v10248_v21 = vand.u32 4294901760, %v8856_v19  ;;  %v8869_v1 = vsub.f32 %v8679_v18, %v10490_v12  ;;  %v10494_v10 = vand.u32 4294901760, %v8700_v9 }
 0x11d   : > { %6703 = vmatpush3.bf16.msra.mxu1 %v8741_v50  ;;  %v8846_v6 = vsub.f32 %v8670_v55, %v10484_v3  ;;  %10489 = vst [vmem:[#allocation50_spill] sm:$0xff] %v8861_v43  ;;  %v2046_v50 = vand.u32 4294901760, %v2045_v31  ;;  %v3396_v55 = vand.u32 4294901760, %v3395_v56  ;;  %v3403_v62 = vand.u32 4294901760, %v3402_v60 }
 0x11e   : > { %6705 = vmatprep.subr.bf16.mxu1 %v8766_v15  ;;  %v10249_v40 = vand.u32 4294901760, %v8861_v43  ;;  %10491 = vst [vmem:[#allocation51_spill] sm:$0xff] %v8869_v1  ;;  %v10492_v31 = vand.u32 4294901760, %v8698_v17  ;;  %v8884_v56 = vsub.f32 %v8700_v9, %v10494_v10  ;;  %v10251_v18 = vand.u32 4294901760, %v8869_v1 }
 0x11f   : > { %10485 = vst [vmem:[#allocation48_spill] sm:$0xff] %v8846_v6  ;;  %v10250_v3 = vand.u32 4294901760, %v8846_v6  ;;  %v8871_v57 = vpack.c.bf16 %v2053_v32, %v2046_v50  ;;  %v8886_v60 = vpack.c.bf16 %v3403_v62, %v3396_v55  ;;  %v2066_v32 = vsub.f32 %v8856_v19, %v10248_v21 }
 0x120   : > { %v8879_v54 = vsub.f32 %v8698_v17, %v10492_v31  ;;  %10495 = vst [vmem:[#allocation53_spill] sm:$0xff] %v8884_v56  ;;  %v3409_v12 = vsub.f32 %v8861_v43, %v10249_v40  ;;  %v10257_v31 = vand.u32 4294901760, %v8884_v56  ;;  %v10496_v9 = vand.u32 4294901760, %v8702_v28 }
 0x121   : > { %v2059_v36 = vsub.f32 %v8846_v6, %v10250_v3  ;;  %v2067_v62 = vand.u32 4294901760, %v2066_v32  ;;  %v3416_v21 = vsub.f32 %v8869_v1, %v10251_v18  ;;  %v10498_v40 = vand.u32 4294901760, %v8722_v5 }
 0x122   : > { %10493 = vst [vmem:[#allocation52_spill] sm:$0xff] %v8879_v54  ;;  %v10256_v17 = vand.u32 4294901760, %v8879_v54  ;;  %v8900_v55 = vsub.f32 %v8702_v28, %v10496_v9  ;;  %v3410_v10 = vand.u32 4294901760, %v3409_v12  ;;  %v2080_v28 = vsub.f32 %v8884_v56, %v10257_v31 }
 0x123   : > { %v2060_v50 = vand.u32 4294901760, %v2059_v36  ;;  %v8908_v3 = vsub.f32 %v8722_v5, %v10498_v40  ;;  %v3417_v9 = vand.u32 4294901760, %v3416_v21  ;;  %v8934_v21 = vpack.c.bf16 %v8712_v39, %v8707_v20 }
 0x124   : > { %10497 = vst [vmem:[#allocation54_spill] sm:$0xff] %v8900_v55  ;;  %v2073_v36 = vsub.f32 %v8879_v54, %v10256_v17  ;;  %v10261_v32 = vand.u32 4294901760, %v8900_v55  ;;  %v2081_v63 = vand.u32 4294901760, %v2080_v28  ;;  %v8962_v28 = vpack.c.bf16 %v8869_v1, %v8861_v43 }
 0x125   : > { %10499 = vst [vmem:[#allocation55_spill] sm:$0xff] %v8908_v3  ;;  %v8917_v12 = vpack.c.bf16 %v2067_v62, %v2060_v50  ;;  %v10260_v18 = vand.u32 4294901760, %v8908_v3  ;;  %v8923_v40 = vpack.c.bf16 %v3417_v9, %v3410_v10  ;;  %v8942_v10 = vpack.c.bf16 %v8780_v48, %v8775_v30 }
 0x126   : > { %v2074_v29 = vand.u32 4294901760, %v2073_v36  ;;  %v3423_v5 = vsub.f32 %v8900_v55, %v10261_v32  ;;  %v8938_v36 = vpack.c.bf16 %v8728_v52, %v8717_v38  ;;  %10504 = vst [vmem:[#allocation60_spill] sm:$0xff] %v8962_v28  ;;  %v8966_v9 = vpack.c.bf16 %v8884_v56, %v8879_v54 }
 0x127   : > { %v3430_v17 = vsub.f32 %v8908_v3, %v10260_v18  ;;  %v10508_v32 = vand.u32 4294901760, %v8479_v37  ;;  %v10509_v1 = vand.u32 4294901760, %v8483_v41  ;;  %v10510_v56 = vand.u32 4294901760, %v8485_v61 }
 0x128   : > { %v8928_v31 = vpack.c.bf16 %v2081_v63, %v2074_v29  ;;  %v3424_v59 = vand.u32 4294901760, %v3423_v5  ;;  %v8946_v63 = vpack.c.bf16 %v8792_v14, %v8787_v11  ;;  %v8954_v29 = vpack.c.bf16 %v8826_v13, %v8815_v44  ;;  %10505 = vst [vmem:[#allocation61_spill] sm:$0xff] %v8966_v9 }
 0x129   : > { %v3431_v50 = vand.u32 4294901760, %v3430_v17  ;;  %v8958_v17 = vpack.c.bf16 %v8856_v19, %v8846_v6  ;;  %v8970_v5 = vpack.c.bf16 %v8908_v3, %v8900_v55  ;;  %v8980_v19 = vsub.f32 %v8479_v37, %v10508_v32  ;;  %v9040_v6 = vld [vmem:[%s10150_s2] ss:$0 sm:$0xff] }
 0x12a   : > { %10500 = vst [vmem:[#allocation56_spill] sm:$0xff] %v8946_v63  ;;  %10502 = vst [vmem:[#allocation58_spill] sm:$0xff] %v8954_v29  ;;  %v8985_v43 = vsub.f32 %v8483_v41, %v10509_v1  ;;  %v8990_v3 = vsub.f32 %v8485_v61, %v10510_v56  ;;  %v10511_v55 = vand.u32 4294901760, %v8507_v0  ;;  %v10512_v37 = vand.u32 4294901760, %v8511_v2 }
 0x12b   : > { %v8930_v62 = vpack.c.bf16 %v3431_v50, %v3424_v59  ;;  %v8950_v59 = vpack.c.bf16 %v8810_v49, %v8805_v27  ;;  %10503 = vst [vmem:[#allocation59_spill] sm:$0xff] %v8958_v17  ;;  %10506 = vst [vmem:[#allocation62_spill] sm:$0xff] %v8970_v5  ;;  %v10507_v50 = vand.u32 4294901760, %v8477_v34  ;;  %v10513_v41 = vand.u32 4294901760, %v8513_v7 }
 0x12c   : > { %v9001_v32 = vsub.f32 %v8511_v2, %v10512_v37  ;;  %v10514_v61 = vand.u32 4294901760, %v8515_v23 }
 0x12d   : > { %10501 = vst [vmem:[#allocation57_spill] sm:$0xff] %v8950_v59  ;;  %v8975_v18 = vsub.f32 %v8477_v34, %v10507_v50  ;;  %v8995_v34 = vsub.f32 %v8507_v0, %v10511_v55  ;;  %v9006_v1 = vsub.f32 %v8513_v7, %v10513_v41  ;;  %v10270_v0 = vand.u32 4294901760, %v8980_v19 }
 0x12e   : > { %v9011_v56 = vsub.f32 %v8515_v23, %v10514_v61  ;;  %v10271_v55 = vand.u32 4294901760, %v8985_v43  ;;  %v10273_v50 = vand.u32 4294901760, %v8990_v3 }
 0x12f   : > { %v10515_v2 = vand.u32 4294901760, %v8975_v18  ;;  %v1996_v23 = vsub.f32 %v8980_v19, %v10270_v0  ;;  %v10517_v0 = vand.u32 4294901760, %v8995_v34  ;;  %v10521_v27 = vand.u32 4294901760, %v9006_v1 }
 0x130   : > { %v3339_v61 = vsub.f32 %v8985_v43, %v10271_v55  ;;  %v3346_v54 = vsub.f32 %v8990_v3, %v10273_v50  ;;  %v10518_v55 = vand.u32 4294901760, %v8540_v33  ;;  %v10519_v50 = vand.u32 4294901760, %v8544_v25 }
 0x131   : > { %v1989_v37 = vsub.f32 %v8975_v18, %v10515_v2  ;;  %v10516_v2 = vand.u32 4294901760, %v8538_v24  ;;  %v2003_v41 = vsub.f32 %v8995_v34, %v10517_v0  ;;  %v3353_v14 = vsub.f32 %v9006_v1, %v10521_v27 }
 0x132   : > { %v9048_v13 = vsub.f32 %v8540_v33, %v10518_v55  ;;  %v9053_v44 = vsub.f32 %v8544_v25, %v10519_v50  ;;  %v10522_v0 = vand.u32 4294901760, %v9011_v56  ;;  %v1997_v48 = vand.u32 4294901760, %v1996_v23 }
 0x133   : > { %v9035_v7 = vsub.f32 %v8538_v24, %v10516_v2  ;;  %v1990_v24 = vand.u32 4294901760, %v1989_v37  ;;  %v10520_v2 = vand.u32 4294901760, %v9001_v32  ;;  %v3340_v30 = vand.u32 4294901760, %v3339_v61 }
 0x134   : > { %v3360_v11 = vsub.f32 %v9011_v56, %v10522_v0  ;;  %v3347_v52 = vand.u32 4294901760, %v3346_v54  ;;  %v10523_v25 = vand.u32 4294901760, %v8546_v35  ;;  %v2004_v20 = vand.u32 4294901760, %v2003_v41 }
 0x135   : > { %v2010_v49 = vsub.f32 %v9001_v32, %v10520_v2  ;;  %v10294_v27 = vand.u32 4294901760, %v9035_v7  ;;  %v10293_v0 = vand.u32 4294901760, %v9048_v13  ;;  %v3354_v45 = vand.u32 4294901760, %v3353_v14 }
 0x136   : > { %v9067_v50 = vsub.f32 %v8546_v35, %v10523_v25  ;;  %v3361_v47 = vand.u32 4294901760, %v3360_v11  ;;  %v9078_v58 = vpack.c.bf16 %v1997_v48, %v1990_v24  ;;  %v9080_v42 = vpack.c.bf16 %v3347_v52, %v3340_v30 }
 0x137   : > { %v2011_v54 = vand.u32 4294901760, %v2010_v49  ;;  %v9101_v30 = vsub.f32 %v9048_v13, %v10293_v0  ;;  %v10526_v48 = vand.u32 4294901760, %v9053_v44 }
 0x139   : > { %v9106_v14 = vsub.f32 %v9053_v44, %v10526_v48  ;;  %v2025_v16 = vand.u32 4294901760, %v9101_v30 }
 0x1c3   : > { %v5618_v33 = vpop.f32.mrb[0].mxu1 }
 0x1c4   : > { %v7056_v37 = vadd.f32 %v5618_v33, %v9040_v6  ;;  %v1003_v2 = vpop.f32.mrb[1].mxu1 }
 0x1c5   : > { %v5786_v55 = vpop.f32.mrb[0].mxu0  ;;  %v7058_v39 = vadd.f32 %v9040_v6, %v1003_v2 }
 0x1c6   : > { %v1613_v38 = vpop.f32.mrb[1].mxu0  ;;  %v9074_v61 = vadd.f32 %v7056_v37, %v5786_v55 }
 0x1c7   : > { %v9076_v35 = vadd.f32 %v7058_v39, %v1613_v38  ;;  %v5621_v25 = vpop.f32.mrb[2].mxu1  ;;  %v9092_v38 = vsub.f32 %v9035_v7, %v10294_v27 }
 0x1c8   : > { %10524 = vst [vmem:[#allocation63_spill] sm:$0xff] %v9074_v61  ;;  %v9084_v41 = vand.u32 4294901760, %v9074_v61  ;;  %v7060_v23 = vadd.f32 %v5621_v25, %v9040_v6  ;;  %v1017_v55 = vpop.f32.mrb[3].mxu1  ;;  %v3017_v11 = vmul.f32 %v9074_v61, %v9074_v61  ;;  %v9114_v25 = vpack.c.bf16 %v2011_v54, %v2004_v20 }
 0x1c9   : > { %10525 = vst [vmem:[#allocation64_spill] sm:$0xff] %v9076_v35  ;;  %v5789_v33 = vpop.f32.mrb[2].mxu0  ;;  %v9095_v39 = vand.u32 4294901760, %v9076_v35  ;;  %v7062_v52 = vadd.f32 %v9040_v6, %v1017_v55  ;;  %v9116_v55 = vpack.c.bf16 %v3361_v47, %v3354_v45  ;;  %v3016_v26 = vmul.f32 %v9076_v35, %v9076_v35 }
 0x1ca   : > { %v1625_v37 = vpop.f32.mrb[3].mxu0  ;;  %v9110_v49 = vsub.f32 %v9074_v61, %v9084_v41  ;;  %v9112_v24 = vadd.f32 %v7060_v23, %v5789_v33  ;;  %3034 = vadd.xlane.f32.xlu0 %v3017_v11  ;;  %v10531_v61 = vand.u32 4294901760, %v9067_v50 }
 0x1cb   : > { %v9120_v0 = vsub.f32 %v9076_v35, %v9095_v39  ;;  %v9122_v27 = vadd.f32 %v7062_v52, %v1625_v37  ;;  %v5624_v2 = vpop.f32.mrb[4].mxu1  ;;  %v2018_v35 = vand.u32 4294901760, %v9092_v38 }
 0x1cc   : > { %10527 = vst [vmem:[#allocation65_spill] sm:$0xff] %v9110_v49  ;;  %10528 = vst [vmem:[#allocation66_spill] sm:$0xff] %v9112_v24  ;;  %v9129_v23 = vsub.f32 %v9067_v50, %v10531_v61  ;;  %v9132_v20 = vand.u32 4294901760, %v9110_v49  ;;  %v9135_v47 = vand.u32 4294901760, %v9112_v24  ;;  %v7064_v45 = vadd.f32 %v5624_v2, %v9040_v6  ;;  %v1031_v54 = vpop.f32.mrb[5].mxu1 }
 0x1cd   : > { %10529 = vst [vmem:[#allocation67_spill] sm:$0xff] %v9120_v0  ;;  %10530 = vst [vmem:[#allocation68_spill] sm:$0xff] %v9122_v27  ;;  %v5792_v48 = vpop.f32.mrb[4].mxu0  ;;  %v3019_v37 = vmul.f32 %v9112_v24, %v9112_v24  ;;  %v9141_v11 = vand.u32 4294901760, %v9122_v27  ;;  %v7066_v52 = vadd.f32 %v9040_v6, %v1031_v54  ;;  %v9145_v61 = vand.u32 4294901760, %v9120_v0 }
 0x1ce   : > { %10532 = vst [vmem:[#allocation69_spill] sm:$0xff] %v9132_v20  ;;  %v1637_v33 = vpop.f32.mrb[5].mxu0  ;;  %v9150_v51 = vsub.f32 %v9112_v24, %v9135_v47  ;;  %v9152_v2 = vadd.f32 %v7064_v45, %v5792_v48  ;;  %3032 = vadd.xlane.f32.xlu0 %v3016_v26  ;;  %v1824_v4 = vsub.f32 %v9110_v49, %v9132_v20 }
 0x1cf   : > { %10533 = vst [vmem:[#allocation70_spill] sm:$0xff] %v9145_v61  ;;  %3038 = vadd.xlane.f32.xlu1 %v3019_v37  ;;  %v9159_v54 = vsub.f32 %v9122_v27, %v9141_v11  ;;  %v9161_v46 = vadd.f32 %v7066_v52, %v1637_v33  ;;  %v5627_v38 = vpop.f32.mrb[6].mxu1  ;;  %v1814_v24 = vsub.f32 %v9120_v0, %v9145_v61 }
 0x1d0   : > { %10534 = vst [vmem:[#allocation71_spill] sm:$0xff] %v9150_v51  ;;  %10535 = vst [vmem:[#allocation72_spill] sm:$0xff] %v9152_v2  ;;  %v9167_v26 = vand.u32 4294901760, %v9152_v2  ;;  %v7068_v45 = vadd.f32 %v5627_v38, %v9040_v6  ;;  %v1045_v37 = vpop.f32.mrb[7].mxu1  ;;  %v3018_v20 = vmul.f32 %v9122_v27, %v9122_v27  ;;  %v1825_v49 = vand.u32 4294901760, %v1824_v4 }
 0x1d1   : > { %10536 = vst [vmem:[#allocation73_spill] sm:$0xff] %v9159_v54  ;;  %10537 = vst [vmem:[#allocation74_spill] sm:$0xff] %v9161_v46  ;;  %v5795_v5 = vpop.f32.mrb[6].mxu0  ;;  %v9173_v33 = vand.u32 4294901760, %v9161_v46  ;;  %v7070_v52 = vadd.f32 %v9040_v6, %v1045_v37  ;;  %v1815_v9 = vand.u32 4294901760, %v1814_v24  ;;  %v3020_v48 = vmul.f32 %v9161_v46, %v9161_v46 }
 0x1d2   : > { %v1649_v30 = vpop.f32.mrb[7].mxu0  ;;  %v9178_v61 = vadd.f32 %v7068_v45, %v5795_v5  ;;  %v3021_v38 = vmul.f32 %v9152_v2, %v9152_v2  ;;  %v9183_v0 = vand.u32 4294901760, %v9159_v54  ;;  %v9186_v4 = vand.u32 4294901760, %v9150_v51 }
 0x1d3   : > { %3036 = vadd.xlane.f32.xlu1 %v3018_v20  ;;  %v9190_v27 = vsub.f32 %v9152_v2, %v9167_v26  ;;  %v9194_v24 = vsub.f32 %v9161_v46, %v9173_v33  ;;  %v9196_v5 = vadd.f32 %v7070_v52, %v1649_v30  ;;  %5840 = vmatprep.mubr.f32.mxu1 %v1815_v9  ;;  %v5630_v45 = vpop.f32.mrb[8].mxu1 }
 0x1d4   : > { %10538 = vst [vmem:[#allocation75_spill] sm:$0xff] %v9178_v61  ;;  %10539 = vst [vmem:[#allocation76_spill] sm:$0xff] %v9183_v0  ;;  %6176 = vmatprep.mubr.f32.mxu0 %v1815_v9  ;;  %v9200_v28 = vand.u32 4294901760, %v9178_v61  ;;  %3040 = vadd.xlane.f32.xlu0 %v3020_v48  ;;  %v7072_v17 = vadd.f32 %v5630_v45, %v9040_v6  ;;  %v1059_v2 = vpop.f32.mrb[9].mxu1  ;;  %v1834_v46 = vsub.f32 %v9159_v54, %v9183_v0 }
 0x1d5   : > { %10540 = vst [vmem:[#allocation77_spill] sm:$0xff] %v9186_v4  ;;  %10541 = vst [vmem:[#allocation78_spill] sm:$0xff] %v9190_v27  ;;  %v5798_v20 = vpop.f32.mrb[8].mxu0  ;;  %5841 = vmatmul.mubr.f32.vlgmr.msra.gmra.mrb[16].mxu1 %v1825_v49  ;;  %v1844_v30 = vsub.f32 %v9150_v51, %v9186_v4  ;;  %v9208_v9 = vand.u32 4294901760, %v9196_v5  ;;  %v7074_v52 = vadd.f32 %v9040_v6, %v1059_v2  ;;  %6177 = vmatmul.mubr.f32.vlgmr.msra.gmra.mrb[16].mxu0 %v1825_v49 }
 0x1d6   : > { %10542 = vst [vmem:[#allocation79_spill] sm:$0xff] %v9194_v24  ;;  %10543 = vst [vmem:[#allocation80_spill] sm:$0xff] %v9196_v5  ;;  %v1661_v29 = vpop.f32.mrb[9].mxu0  ;;  %6707 = vmatpush3.bf16.msra.mxu1 %v8766_v15  ;;  %v3022_v48 = vmul.f32 %v9196_v5, %v9196_v5  ;;  %v9214_v45 = vpack.c.bf16 %v2025_v16, %v2018_v35  ;;  %v9218_v37 = vsub.f32 %v9178_v61, %v9200_v28 }
 0x1d7   : > { %v9220_v0 = vadd.f32 %v7072_v17, %v5798_v20  ;;  %6899 = vmatpush3.bf16.msra.mxu0 %v8768_v53  ;;  %3042 = vadd.xlane.f32.xlu1 %v3021_v38  ;;  %v1835_v4 = vand.u32 4294901760, %v1834_v46  ;;  %v1845_v51 = vand.u32 4294901760, %v1844_v30  ;;  %v9225_v49 = vsub.f32 %v9196_v5, %v9208_v9  ;;  %v5633_v16 = vpop.f32.mrb[10].mxu1 }
 0x1d8   : > { %10544 = vst [vmem:[#allocation81_spill] sm:$0xff] %v9218_v37  ;;  %v9227_v15 = vadd.f32 %v7074_v52, %v1661_v29  ;;  %6709 = vmatprep.subr.bf16.mxu1 %v9078_v58  ;;  %6901 = vmatprep.subr.bf16.mxu0 %v9080_v42  ;;  %v9232_v17 = vand.u32 4294901760, %v9194_v24  ;;  %v9235_v53 = vand.u32 4294901760, %v9190_v27  ;;  %v7076_v29 = vadd.f32 %v5633_v16, %v9040_v6  ;;  %v1073_v35 = vpop.f32.mrb[11].mxu1 }
 0x1d9   : > { %10545 = vst [vmem:[#allocation82_spill] sm:$0xff] %v9220_v0  ;;  %v5801_v2 = vpop.f32.mrb[10].mxu0  ;;  %v9238_v46 = vand.u32 4294901760, %v9220_v0  ;;  %5843 = vmatprep.mubr.f32.mxu1 %v1835_v4  ;;  %6179 = vmatprep.mubr.f32.mxu0 %v1835_v4  ;;  %v3023_v20 = vmul.f32 %v9178_v61, %v9178_v61  ;;  %v9244_v30 = vand.u32 4294901760, %v9218_v37  ;;  %v7078_v5 = vadd.f32 %v9040_v6, %v1073_v35 }
 0x1da   : > { %10546 = vst [vmem:[#allocation83_spill] sm:$0xff] %v9227_v15  ;;  %10547 = vst [vmem:[#allocation84_spill] sm:$0xff] %v9232_v17  ;;  %v1673_v38 = vpop.f32.mrb[11].mxu0  ;;  %v9247_v52 = vand.u32 4294901760, %v9227_v15  ;;  %3044 = vadd.xlane.f32.xlu0 %v3022_v48  ;;  %5844 = vmatmul.mubr.f32.gmra.mrb[18].mxu1 %v1845_v51  ;;  %v1854_v4 = vsub.f32 %v9194_v24, %v9232_v17  ;;  %v3024_v16 = vmul.f32 %v9227_v15, %v9227_v15 }
 0x1db   : > { %10548 = vst [vmem:[#allocation85_spill] sm:$0xff] %v9235_v53  ;;  %10549 = vst [vmem:[#allocation86_spill] sm:$0xff] %v9244_v30  ;;  %v9256_v54 = vsub.f32 %v9220_v0, %v9238_v46  ;;  %v9258_v61 = vadd.f32 %v7076_v29, %v5801_v2  ;;  %6180 = vmatmul.mubr.f32.gmra.mrb[18].mxu0 %v1845_v51  ;;  %6711 = vmatpush3.bf16.msra.mxu1 %v9078_v58  ;;  %v9264_v35 = vand.u32 4294901760, %v9225_v49  ;;  %v5636_v51 = vpop.f32.mrb[12].mxu1 }
 0x1dc   : > { %v1864_v48 = vsub.f32 %v9190_v27, %v9235_v53  ;;  %v9268_v17 = vsub.f32 %v9227_v15, %v9247_v52  ;;  %v9270_v24 = vadd.f32 %v7078_v5, %v1673_v38  ;;  %6903 = vmatpush3.bf16.msra.mxu0 %v9080_v42  ;;  %3046 = vadd.xlane.f32.xlu1 %v3023_v20  ;;  %v1855_v29 = vand.u32 4294901760, %v1854_v4  ;;  %v1087_v59 = vpop.f32.mrb[13].mxu1 }
 0x1dd   : > { %10550 = vst [vmem:[#allocation87_spill] sm:$0xff] %v9258_v61  ;;  %10551 = vst [vmem:[#allocation88_spill] sm:$0xff] %v9264_v35  ;;  %v5804_v2 = vpop.f32.mrb[12].mxu0  ;;  %v1884_v58 = vsub.f32 %v9218_v37, %v9244_v30  ;;  %v9276_v53 = vand.u32 4294901760, %v9258_v61  ;;  %v7080_v27 = vadd.f32 %v5636_v51, %v9040_v6  ;;  %6713 = vmatprep.subr.bf16.mxu1 %v9114_v25  ;;  %6905 = vmatprep.subr.bf16.mxu0 %v9116_v55 }
 0x1de   : > { %10552 = vst [vmem:[#allocation89_spill] sm:$0xff] %v9270_v24  ;;  %v1685_v63 = vpop.f32.mrb[13].mxu0  ;;  %v1865_v15 = vand.u32 4294901760, %v1864_v48  ;;  %v1874_v42 = vsub.f32 %v9225_v49, %v9264_v35  ;;  %v9284_v5 = vand.u32 4294901760, %v9270_v24  ;;  %5846 = vmatprep.mubr.f32.mxu1 %v1855_v29  ;;  %6182 = vmatprep.mubr.f32.mxu0 %v1855_v29  ;;  %v7082_v38 = vadd.f32 %v9040_v6, %v1087_v59 }
 0x1df   : > { %v3025_v20 = vmul.f32 %v9220_v0, %v9220_v0  ;;  %v10553_v4 = vand.u32 4294901760, %v9106_v14  ;;  %v10554_v48 = vand.u32 4294901760, %v9129_v23  ;;  %v9295_v30 = vsub.f32 %v9258_v61, %v9276_v53  ;;  %3048 = vadd.xlane.f32.xlu0 %v3024_v16  ;;  %6715 = vmatpush3.bf16.msra.mxu1 %v9114_v25 }
 0x1e0   : > { %v9297_v35 = vadd.f32 %v7080_v27, %v5804_v2  ;;  %5847 = vmatmul.mubr.f32.gmra.mrb[20].mxu1 %v1865_v15  ;;  %v1875_v37 = vand.u32 4294901760, %v1874_v42  ;;  %v3026_v59 = vmul.f32 %v9270_v24, %v9270_v24  ;;  %v9303_v29 = vsub.f32 %v9270_v24, %v9284_v5  ;;  %6183 = vmatmul.mubr.f32.gmra.mrb[20].mxu0 %v1865_v15 }
 0x1e1   : > { %v6908_v51 = vpack.c.bf16 %v10554_v48, %v10553_v4  ;;  %v9305_v14 = vadd.f32 %v7082_v38, %v1685_v63  ;;  %v5807_v23 = vpop.f32.mrb[14].mxu0  ;;  %v5639_v4 = vpop.f32.mrb[14].mxu1  ;;  %v9309_v16 = vand.u32 4294901760, %v9268_v17  ;;  %v9312_v27 = vand.u32 4294901760, %v9256_v54  ;;  %6907 = vmatpush3.bf16.msra.mxu0 %v9116_v55  ;;  %3050 = vadd.xlane.f32.xlu1 %v3025_v20 }
 0x1e2   : > { %10555 = vst [vmem:[#allocation90_spill] sm:$0xff] %v9297_v35  ;;  %v9315_v2 = vand.u32 4294901760, %v9297_v35  ;;  %v7084_v63 = vadd.f32 %v5639_v4, %v9040_v6  ;;  %v1101_v42 = vpop.f32.mrb[15].mxu1  ;;  %v1697_v15 = vpop.f32.mrb[15].mxu0  ;;  %v1885_v38 = vand.u32 4294901760, %v1884_v58  ;;  %v3027_v25 = vmul.f32 %v9258_v61, %v9258_v61  ;;  %5849 = vmatprep.mubr.f32.mxu1 %v1875_v37  ;;  %6185 = vmatprep.mubr.f32.mxu0 %v1875_v37 }
 0x1e3   : > { %10556 = vst [vmem:[#allocation91_spill] sm:$0xff] %v9305_v14  ;;  %10557 = vst [vmem:[#allocation92_spill] sm:$0xff] %v9312_v27  ;;  %v9322_v48 = vand.u32 4294901760, %v9305_v14  ;;  %v7086_v24 = vadd.f32 %v9040_v6, %v1101_v42  ;;  %v1894_v0 = vsub.f32 %v9268_v17, %v9309_v16  ;;  %v9328_v55 = vand.u32 4294901760, %v9295_v30  ;;  %3052 = vadd.xlane.f32.xlu0 %v3026_v59 }
 0x1e4   : > { %v9330_v20 = vadd.f32 %v7084_v63, %v5807_v23  ;;  %5850 = vmatmul.mubr.f32.gmra.mrb[22].mxu1 %v1885_v38  ;;  %v3028_v58 = vmul.f32 %v9305_v14, %v9305_v14  ;;  %v1904_v4 = vsub.f32 %v9256_v54, %v9312_v27  ;;  %v9337_v37 = vand.u32 4294901760, %v9303_v29  ;;  %6717 = vmatprep.subr.bf16.mxu1 %v9214_v45 }
 0x1e5   : > { %v9341_v6 = vsub.f32 %v9297_v35, %v9315_v2  ;;  %v9345_v42 = vsub.f32 %v9305_v14, %v9322_v48  ;;  %v9347_v59 = vadd.f32 %v7086_v24, %v1697_v15  ;;  %6186 = vmatmul.mubr.f32.gmra.mrb[22].mxu0 %v1885_v38  ;;  %v1895_v23 = vand.u32 4294901760, %v1894_v0  ;;  %6909 = vmatprep.subr.bf16.mxu0 %v6908_v51 }
 0x1e6   : > { %v9351_v63 = vand.u32 4294901760, %v9330_v20  ;;  %6719 = vmatpush3.bf16.msra.mxu1 %v9214_v45  ;;  %v1914_v61 = vsub.f32 %v9303_v29, %v9337_v37  ;;  %6911 = vmatpush3.bf16.msra.mxu0 %v6908_v51  ;;  %v1905_v24 = vand.u32 4294901760, %v1904_v4  ;;  %v1924_v0 = vsub.f32 %v9295_v30, %v9328_v55 }
 0x1e7   : > { %10558 = vst [vmem:[#allocation93_spill] sm:$0xff] %v9347_v59  ;;  %v9357_v27 = vand.u32 4294901760, %v9347_v59  ;;  %3054 = vadd.xlane.f32.xlu1 %v3027_v25  ;;  %v9360_v15 = vand.u32 4294901760, %v9345_v42  ;;  %5852 = vmatprep.mubr.f32.mxu1 %v1895_v23  ;;  %v9373_v25 = vand.u32 4294901760, %v9341_v6  ;;  %v3029_v4 = vmul.f32 %v9297_v35, %v9297_v35 }
 0x1e8   : > { %6188 = vmatprep.mubr.f32.mxu0 %v1895_v23  ;;  %v9366_v45 = vsub.f32 %v9330_v20, %v9351_v63  ;;  %3056 = vadd.xlane.f32.xlu0 %v3028_v58  ;;  %v1915_v51 = vand.u32 4294901760, %v1914_v61  ;;  %v3030_v23 = vmul.f32 %v9347_v59, %v9347_v59  ;;  %v1925_v58 = vand.u32 4294901760, %v1924_v0 }
 0x1e9   : > { %v9370_v38 = vsub.f32 %v9347_v59, %v9357_v27  ;;  %5853 = vmatmul.mubr.f32.gmra.mrb[24].mxu1 %v1905_v24  ;;  %6721 = vmatprep.subr.bf16.mxu1 %v8831_v22  ;;  %v1934_v14 = vsub.f32 %v9345_v42, %v9360_v15 }
 0x1ea   : > { %6189 = vmatmul.mubr.f32.gmra.mrb[24].mxu0 %v1905_v24  ;;  %6913 = vmatprep.subr.bf16.mxu0 %v8848_v8  ;;  %v1944_v24 = vsub.f32 %v9341_v6, %v9373_v25  ;;  %v9391_v59 = vand.u32 4294901760, %v9366_v45 }
 0x1eb   : > { %6723 = vmatpush3.bf16.msra.mxu1 %v8831_v22  ;;  %v9385_v61 = vand.u32 4294901760, %v9370_v38  ;;  %6915 = vmatpush3.bf16.msra.mxu0 %v8848_v8  ;;  %v1935_v35 = vand.u32 4294901760, %v1934_v14  ;;  %v3031_v8 = vmul.f32 %v9330_v20, %v9330_v20 }
 0x1ec   : > { %3058 = vadd.xlane.f32.xlu1 %v3029_v4  ;;  %5855 = vmatprep.mubr.f32.mxu1 %v1915_v51  ;;  %v1945_v0 = vand.u32 4294901760, %v1944_v24  ;;  %v1964_v14 = vsub.f32 %v9366_v45, %v9391_v59  ;;  %v10561_v4 = vld [vmem:[#allocation58_spill] sm:$0xff] }
 0x1ed   : > { %6191 = vmatprep.mubr.f32.mxu0 %v1915_v51  ;;  %3060 = vadd.xlane.f32.xlu0 %v3030_v23  ;;  %v1954_v22 = vsub.f32 %v9370_v38, %v9385_v61  ;;  %v10563_v23 = vld [vmem:[#allocation60_spill] sm:$0xff]  ;;  %v10565_v24 = vld [vmem:[#allocation62_spill] sm:$0xff] }
 0x1ee   : > { %5856 = vmatmul.mubr.f32.gmra.mrb[26].mxu1 %v1925_v58  ;;  %6725 = vmatprep.subr.bf16.mxu1 %v8871_v57 }
 0x1ef   : > { %6192 = vmatmul.mubr.f32.gmra.mrb[26].mxu0 %v1925_v58  ;;  %6917 = vmatprep.subr.bf16.mxu0 %v8886_v60  ;;  %v1955_v51 = vand.u32 4294901760, %v1954_v22  ;;  %v10564_v58 = vld [vmem:[#allocation61_spill] sm:$0xff]  ;;  %v10566_v22 = vld [vmem:[#allocation67_spill] sm:$0xff] }
 0x1f0   : > { %6727 = vmatpush3.bf16.msra.mxu1 %v8871_v57  ;;  %6919 = vmatpush3.bf16.msra.mxu0 %v8886_v60  ;;  %v1965_v57 = vand.u32 4294901760, %v1964_v14  ;;  %v6740_v60 = vpack.c.bf16 %v8980_v19, %v8975_v18  ;;  %v10569_v14 = vld [vmem:[#allocation65_spill] sm:$0xff] }
 0x1f1   : > { %3062 = vadd.xlane.f32.xlu1 %v3031_v8  ;;  %5858 = vmatprep.mubr.f32.mxu1 %v1935_v35  ;;  %v10567_v8 = vld [vmem:[#allocation30_spill] sm:$0xff] }
 0x1f2   : > { %6194 = vmatprep.mubr.f32.mxu0 %v1935_v35  ;;  %5859 = vmatmul.mubr.f32.gmra.mrb[28].mxu1 %v1945_v0  ;;  %v10560_v35 = vld [vmem:[#allocation57_spill] sm:$0xff] }
 0x1f3   : > { %6729 = vmatprep.subr.bf16.mxu1 %v8917_v12  ;;  %6195 = vmatmul.mubr.f32.gmra.mrb[28].mxu0 %v1945_v0  ;;  %v10568_v0 = vld [vmem:[#allocation21_spill] sm:$0xff] }
 0x1f4   : > { %6921 = vmatprep.subr.bf16.mxu0 %v8923_v40  ;;  %6731 = vmatpush3.bf16.msra.mxu1 %v8917_v12  ;;  %v6932_v12 = vpack.c.bf16 %v8990_v3, %v8985_v43 }
 0x1f5   : > { %6923 = vmatpush3.bf16.msra.mxu0 %v8923_v40  ;;  %5861 = vmatprep.mubr.f32.mxu1 %v1955_v51  ;;  %v6936_v40 = vpack.c.bf16 %v9011_v56, %v9006_v1 }
 0x1f6   : > { %6197 = vmatprep.mubr.f32.mxu0 %v1955_v51  ;;  %5862 = vmatmul.mubr.f32.gmra.mrb[30].mxu1 %v1965_v57  ;;  %v10570_v51 = vld [vmem:[#allocation73_spill] sm:$0xff] }
 0x1f7   : > { %6733 = vmatprep.subr.bf16.mxu1 %v8928_v31  ;;  %6198 = vmatmul.mubr.f32.gmra.mrb[30].mxu0 %v1965_v57  ;;  %v10571_v57 = vld [vmem:[#allocation32_spill] sm:$0xff] }
 0x1f8   : > { %6925 = vmatprep.subr.bf16.mxu0 %v8930_v62  ;;  %6735 = vmatpush3.bf16.msra.mxu1 %v8928_v31  ;;  %v6744_v31 = vpack.c.bf16 %v9001_v32, %v8995_v34 }
 0x1f9   : > { %5896 = vmatprep.mubr.f32.mxu1 %v9095_v39  ;;  %6927 = vmatpush3.bf16.msra.mxu0 %v8930_v62  ;;  %v6748_v62 = vpack.c.bf16 %v9048_v13, %v9035_v7 }
 0x1fa   : > { %6232 = vmatprep.mubr.f32.mxu0 %v9095_v39  ;;  %6737 = vmatprep.subr.bf16.mxu1 %v8934_v21 }
 0x1fb   : > { %6929 = vmatprep.subr.bf16.mxu0 %v8938_v36  ;;  %5897 = vmatmul.mubr.f32.vlgmr.msra.gmra.mrb[16].mxu1 %v9084_v41 }
 0x1fc   : > { %6233 = vmatmul.mubr.f32.vlgmr.msra.gmra.mrb[16].mxu0 %v9084_v41  ;;  %5899 = vmatprep.mubr.f32.mxu1 %v9141_v11 }
 0x1fd   : > { %6739 = vmatpush3.bf16.msra.mxu1 %v8934_v21  ;;  %6235 = vmatprep.mubr.f32.mxu0 %v9141_v11  ;;  %v6940_v21 = vpack.c.bf16 %v9067_v50, %v9053_v44 }
 0x1fe   : > { %6931 = vmatpush3.bf16.msra.mxu0 %v8938_v36  ;;  %6741 = vmatprep.subr.bf16.mxu1 %v6740_v60  ;;  %v10559_v36 = vld [vmem:[#allocation56_spill] sm:$0xff] }
 0x1ff   : > { %5900 = vmatmul.mubr.f32.gmra.mrb[18].mxu1 %v9135_v47  ;;  %6933 = vmatprep.subr.bf16.mxu0 %v6932_v12 }
 0x200   : > { %6236 = vmatmul.mubr.f32.gmra.mrb[18].mxu0 %v9135_v47  ;;  %5902 = vmatprep.mubr.f32.mxu1 %v9173_v33 }
 0x201   : > { %6743 = vmatpush3.bf16.msra.mxu1 %v6740_v60  ;;  %6238 = vmatprep.mubr.f32.mxu0 %v9173_v33  ;;  %v10572_v60 = vld [vmem:[#allocation71_spill] sm:$0xff] }
 0x202   : > { %6935 = vmatpush3.bf16.msra.mxu0 %v6932_v12  ;;  %6745 = vmatprep.subr.bf16.mxu1 %v6744_v31  ;;  %v10573_v12 = vld [vmem:[#allocation35_spill] sm:$0xff] }
 0x203   : > { %5903 = vmatmul.mubr.f32.gmra.mrb[20].mxu1 %v9167_v26  ;;  %6937 = vmatprep.subr.bf16.mxu0 %v6936_v40 }
 0x204   : > { %6239 = vmatmul.mubr.f32.gmra.mrb[20].mxu0 %v9167_v26  ;;  %5905 = vmatprep.mubr.f32.mxu1 %v9208_v9 }
 0x205   : > { %6747 = vmatpush3.bf16.msra.mxu1 %v6744_v31  ;;  %6241 = vmatprep.mubr.f32.mxu0 %v9208_v9  ;;  %v10574_v31 = vld [vmem:[#allocation79_spill] sm:$0xff] }
 0x206   : > { %6939 = vmatpush3.bf16.msra.mxu0 %v6936_v40  ;;  %6749 = vmatprep.subr.bf16.mxu1 %v6748_v62  ;;  %v10575_v40 = vld [vmem:[#allocation23_spill] sm:$0xff] }
 0x207   : > { %5906 = vmatmul.mubr.f32.gmra.mrb[22].mxu1 %v9200_v28  ;;  %6941 = vmatprep.subr.bf16.mxu0 %v6940_v21 }
 0x208   : > { %6242 = vmatmul.mubr.f32.gmra.mrb[22].mxu0 %v9200_v28  ;;  %5908 = vmatprep.mubr.f32.mxu1 %v9247_v52 }
 0x209   : > { %6751 = vmatpush3.bf16.msra.mxu1 %v6748_v62  ;;  %6244 = vmatprep.mubr.f32.mxu0 %v9247_v52  ;;  %v10576_v62 = vld [vmem:[#allocation78_spill] sm:$0xff] }
 0x20a   : > { %6943 = vmatpush3.bf16.msra.mxu0 %v6940_v21  ;;  %6753 = vmatprep.subr.bf16.mxu1 %v8942_v10  ;;  %v10577_v21 = vld [vmem:[#allocation25_spill] sm:$0xff] }
 0x20b   : > { %5909 = vmatmul.mubr.f32.gmra.mrb[24].mxu1 %v9238_v46  ;;  %6945 = vmatprep.subr.bf16.mxu0 %v10559_v36 }
 0x20c   : > { %6245 = vmatmul.mubr.f32.gmra.mrb[24].mxu0 %v9238_v46  ;;  %5911 = vmatprep.mubr.f32.mxu1 %v9284_v5 }
 0x20d   : > { %6755 = vmatpush3.bf16.msra.mxu1 %v8942_v10  ;;  %6247 = vmatprep.mubr.f32.mxu0 %v9284_v5  ;;  %v10562_v10 = vld [vmem:[#allocation59_spill] sm:$0xff] }
 0x20e   : > { %6947 = vmatpush3.bf16.msra.mxu0 %v10559_v36  ;;  %6757 = vmatprep.subr.bf16.mxu1 %v10560_v35  ;;  %v10578_v36 = vld [vmem:[#allocation27_spill] sm:$0xff] }
 0x20f   : > { %5912 = vmatmul.mubr.f32.gmra.mrb[26].mxu1 %v9276_v53  ;;  %6949 = vmatprep.subr.bf16.mxu0 %v10561_v4 }
 0x210   : > { %6248 = vmatmul.mubr.f32.gmra.mrb[26].mxu0 %v9276_v53  ;;  %5914 = vmatprep.mubr.f32.mxu1 %v9322_v48 }
 0x211   : > { %6759 = vmatpush3.bf16.msra.mxu1 %v10560_v35  ;;  %6250 = vmatprep.mubr.f32.mxu0 %v9322_v48  ;;  %v10579_v35 = vld [vmem:[#allocation81_spill] sm:$0xff] }
 0x212   : > { %6951 = vmatpush3.bf16.msra.mxu0 %v10561_v4  ;;  %6761 = vmatprep.subr.bf16.mxu1 %v10562_v10  ;;  %v10580_v4 = vld [vmem:[#allocation37_spill] sm:$0xff] }
 0x213   : > { %5915 = vmatmul.mubr.f32.gmra.mrb[28].mxu1 %v9315_v2  ;;  %6953 = vmatprep.subr.bf16.mxu0 %v10563_v23 }
 0x214   : > { %6251 = vmatmul.mubr.f32.gmra.mrb[28].mxu0 %v9315_v2  ;;  %5917 = vmatprep.mubr.f32.mxu1 %v9357_v27 }
 0x215   : > { %6763 = vmatpush3.bf16.msra.mxu1 %v10562_v10  ;;  %6253 = vmatprep.mubr.f32.mxu0 %v9357_v27  ;;  %v10581_v10 = vld [vmem:[#allocation39_spill] sm:$0xff] }
 0x216   : > { %6955 = vmatpush3.bf16.msra.mxu0 %v10563_v23  ;;  %6765 = vmatprep.subr.bf16.mxu1 %v10564_v58  ;;  %v10583_v23 = vld [vmem:[#allocation20_spill] sm:$0xff] }
 0x217   : > { %5918 = vmatmul.mubr.f32.gmra.mrb[30].mxu1 %v9351_v63  ;;  %6957 = vmatprep.subr.bf16.mxu0 %v10565_v24 }
 0x218   : > { %6254 = vmatmul.mubr.f32.gmra.mrb[30].mxu0 %v9351_v63  ;;  %5952 = vmatprep.mubr.f32.mxu1 %v10566_v22 }
 0x219   : > { %6767 = vmatpush3.bf16.msra.mxu1 %v10564_v58  ;;  %6288 = vmatprep.mubr.f32.mxu0 %v10566_v22 }
 0x21a   : > { %6959 = vmatpush3.bf16.msra.mxu0 %v10565_v24  ;;  %6769 = vmatprep.subr.bf16.mxu1 %v10567_v8  ;;  %v10590_v24 = vld [vmem:[#allocation31_spill] sm:$0xff] }
 0x21b   : > { %6961 = vmatprep.subr.bf16.mxu0 %v10568_v0  ;;  %v10591_v22 = vand.u32 4294901760, %v10590_v24 }
 0x21c   : > { %5953 = vmatmul.mubr.f32.vlgmr.msra.gmra.mrb[16].mxu1 %v10569_v14 }
 0x21d   : > { %6289 = vmatmul.mubr.f32.vlgmr.msra.gmra.mrb[16].mxu0 %v10569_v14  ;;  %5955 = vmatprep.mubr.f32.mxu1 %v10570_v51 }
 0x21e   : > { %6771 = vmatpush3.bf16.msra.mxu1 %v10567_v8  ;;  %6291 = vmatprep.mubr.f32.mxu0 %v10570_v51  ;;  %v10592_v51 = vld [vmem:[#allocation38_spill] sm:$0xff] }
 0x21f   : > { %6963 = vmatpush3.bf16.msra.mxu0 %v10568_v0  ;;  %6773 = vmatprep.subr.bf16.mxu1 %v10571_v57 }
 0x220   : > { %5956 = vmatmul.mubr.f32.gmra.mrb[18].mxu1 %v10572_v60  ;;  %6965 = vmatprep.subr.bf16.mxu0 %v10573_v12 }
 0x221   : > { %6292 = vmatmul.mubr.f32.gmra.mrb[18].mxu0 %v10572_v60  ;;  %5958 = vmatprep.mubr.f32.mxu1 %v10574_v31 }
 0x222   : > { %6775 = vmatpush3.bf16.msra.mxu1 %v10571_v57  ;;  %6294 = vmatprep.mubr.f32.mxu0 %v10574_v31  ;;  %v10595_v31 = vld [vmem:[#allocation34_spill] sm:$0xff] }
 0x223   : > { %6967 = vmatpush3.bf16.msra.mxu0 %v10573_v12  ;;  %6777 = vmatprep.subr.bf16.mxu1 %v10575_v40 }
 0x224   : > { %5959 = vmatmul.mubr.f32.gmra.mrb[20].mxu1 %v10576_v62  ;;  %6969 = vmatprep.subr.bf16.mxu0 %v10577_v21 }
 0x225   : > { %6295 = vmatmul.mubr.f32.gmra.mrb[20].mxu0 %v10576_v62  ;;  %5961 = vmatprep.mubr.f32.mxu1 %v9225_v49  ;;  %v10596_v62 = vand.u32 4294901760, %v10595_v31  ;;  %v10603_v31 = vld [vmem:[#allocation76_spill] sm:$0xff] }
 0x226   : > { %6779 = vmatpush3.bf16.msra.mxu1 %v10575_v40  ;;  %6297 = vmatprep.mubr.f32.mxu0 %v9225_v49  ;;  %v10582_v49 = vld [vmem:[#allocation28_spill] sm:$0xff] }
 0x227   : > { %6971 = vmatpush3.bf16.msra.mxu0 %v10577_v21  ;;  %6781 = vmatprep.subr.bf16.mxu1 %v10578_v36 }
 0x228   : > { %5962 = vmatmul.mubr.f32.gmra.mrb[22].mxu1 %v10579_v35  ;;  %6973 = vmatprep.subr.bf16.mxu0 %v10580_v4 }
 0x229   : > { %6298 = vmatmul.mubr.f32.gmra.mrb[22].mxu0 %v10579_v35  ;;  %5964 = vmatprep.mubr.f32.mxu1 %v9268_v17 }
 0x22a   : > { %6783 = vmatpush3.bf16.msra.mxu1 %v10578_v36  ;;  %6300 = vmatprep.mubr.f32.mxu0 %v9268_v17  ;;  %v10584_v17 = vld [vmem:[#allocation22_spill] sm:$0xff] }
 0x22b   : > { %6975 = vmatpush3.bf16.msra.mxu0 %v10580_v4  ;;  %6785 = vmatprep.subr.bf16.mxu1 %v10581_v10 }
 0x22c   : > { %5965 = vmatmul.mubr.f32.gmra.mrb[24].mxu1 %v9256_v54  ;;  %6977 = vmatprep.subr.bf16.mxu0 %v10582_v49 }
 0x22d   : > { %6301 = vmatmul.mubr.f32.gmra.mrb[24].mxu0 %v9256_v54  ;;  %5967 = vmatprep.mubr.f32.mxu1 %v9303_v29  ;;  %v10585_v54 = vld [vmem:[#allocation24_spill] sm:$0xff] }
 0x22e   : > { %6787 = vmatpush3.bf16.msra.mxu1 %v10581_v10  ;;  %6303 = vmatprep.mubr.f32.mxu0 %v9303_v29  ;;  %v10586_v29 = vld [vmem:[#allocation26_spill] sm:$0xff] }
 0x22f   : > { %6979 = vmatpush3.bf16.msra.mxu0 %v10582_v49  ;;  %6789 = vmatprep.subr.bf16.mxu1 %v10583_v23 }
 0x230   : > { %5968 = vmatmul.mubr.f32.gmra.mrb[26].mxu1 %v9295_v30  ;;  %6981 = vmatprep.subr.bf16.mxu0 %v10584_v17 }
 0x231   : > { %6304 = vmatmul.mubr.f32.gmra.mrb[26].mxu0 %v9295_v30  ;;  %5970 = vmatprep.mubr.f32.mxu1 %v9345_v42  ;;  %v10587_v30 = vld [vmem:[#allocation36_spill] sm:$0xff] }
 0x232   : > { %6791 = vmatpush3.bf16.msra.mxu1 %v10583_v23  ;;  %6306 = vmatprep.mubr.f32.mxu0 %v9345_v42  ;;  %v10588_v42 = vld [vmem:[#allocation29_spill] sm:$0xff] }
 0x233   : > { %6983 = vmatpush3.bf16.msra.mxu0 %v10584_v17  ;;  %6793 = vmatprep.subr.bf16.mxu1 %v10585_v54  ;;  %v10589_v58 = vand.u32 4294901760, %v10588_v42  ;;  %v10598_v42 = vand.u32 4294901760, %v8975_v18  ;;  %v10604_v18 = vand.u32 4294901760, %v8995_v34  ;;  %v10610_v34 = vand.u32 4294901760, %v9035_v7  ;;  %v10616_v7 = vld [vmem:[#allocation40_spill] sm:$0xff] }
 0x234   : > { %5971 = vmatmul.mubr.f32.gmra.mrb[28].mxu1 %v9341_v6  ;;  %6985 = vmatprep.subr.bf16.mxu0 %v10586_v29 }
 0x235   : > { %6307 = vmatmul.mubr.f32.gmra.mrb[28].mxu0 %v9341_v6  ;;  %5973 = vmatprep.mubr.f32.mxu1 %v9370_v38  ;;  %v6800_v14 = vpack.c.bf16 %v10591_v22, %v10589_v58  ;;  %v10593_v6 = vld [vmem:[#allocation33_spill] sm:$0xff]  ;;  %v10599_v58 = vand.u32 4294901760, %v8980_v19  ;;  %v10605_v19 = vand.u32 4294901760, %v9001_v32  ;;  %v10611_v32 = vand.u32 4294901760, %v9048_v13 }
 0x236   : > { %6795 = vmatpush3.bf16.msra.mxu1 %v10585_v54  ;;  %6309 = vmatprep.mubr.f32.mxu0 %v9370_v38  ;;  %v10594_v60 = vand.u32 4294901760, %v10593_v6  ;;  %v10597_v38 = vld [vmem:[#allocation70_spill] sm:$0xff]  ;;  %v10600_v22 = vld [vmem:[#allocation69_spill] sm:$0xff]  ;;  %v10601_v6 = vand.u32 4294901760, %v8985_v43  ;;  %v10607_v43 = vand.u32 4294901760, %v9006_v1  ;;  %v10613_v1 = vand.u32 4294901760, %v9053_v44 }
 0x237   : > { %6987 = vmatpush3.bf16.msra.mxu0 %v10586_v29  ;;  %6797 = vmatprep.subr.bf16.mxu1 %v10587_v30  ;;  %v6804_v24 = vpack.c.bf16 %v10599_v58, %v10598_v42  ;;  %v10612_v58 = vld [vmem:[#allocation85_spill] sm:$0xff]  ;;  %v10617_v13 = vand.u32 4294901760, %v10616_v7  ;;  %v10621_v44 = vld [vmem:[#allocation42_spill] sm:$0xff] }
 0x238   : > { %5974 = vmatmul.mubr.f32.gmra.mrb[30].mxu1 %v9366_v45  ;;  %6989 = vmatprep.subr.bf16.mxu0 %v10592_v51  ;;  %v6992_v35 = vpack.c.bf16 %v10596_v62, %v10594_v60  ;;  %v6808_v62 = vpack.c.bf16 %v10605_v19, %v10604_v18  ;;  %v10623_v18 = vld [vmem:[#allocation43_spill] sm:$0xff] }
 0x239   : > { %6310 = vmatmul.mubr.f32.gmra.mrb[30].mxu0 %v9366_v45  ;;  %6008 = vmatprep.mubr.f32.mxu1 %v10597_v38  ;;  %v10602_v45 = vand.u32 4294901760, %v8990_v3  ;;  %v10608_v3 = vand.u32 4294901760, %v9011_v56  ;;  %v10614_v56 = vand.u32 4294901760, %v9067_v50  ;;  %v10622_v50 = vand.u32 4294901760, %v10621_v44 }
 0x23a   : > { %6799 = vmatpush3.bf16.msra.mxu1 %v10587_v30  ;;  %6344 = vmatprep.mubr.f32.mxu0 %v10597_v38  ;;  %v10606_v38 = vld [vmem:[#allocation77_spill] sm:$0xff]  ;;  %v10624_v19 = vand.u32 4294901760, %v10623_v18 }
 0x23b   : > { %6991 = vmatpush3.bf16.msra.mxu0 %v10592_v51  ;;  %6801 = vmatprep.subr.bf16.mxu1 %v6800_v14  ;;  %v6996_v60 = vpack.c.bf16 %v10602_v45, %v10601_v6  ;;  %v7000_v42 = vpack.c.bf16 %v10608_v3, %v10607_v43  ;;  %v10618_v6 = vld [vmem:[#allocation41_spill] sm:$0xff] }
 0x23c   : > { %6993 = vmatprep.subr.bf16.mxu0 %v6992_v35  ;;  %v10619_v45 = vand.u32 4294901760, %v10618_v6  ;;  %v10627_v3 = vld [vmem:[#allocation45_spill] sm:$0xff]  ;;  %v10638_v6 = vld [vmem:[#allocation50_spill] sm:$0xff] }
 0x23d   : > { %6009 = vmatmul.mubr.f32.vlgmr.msra.gmra.mrb[16].mxu1 %v10600_v22  ;;  %v10644_v18 = vld [vmem:[#allocation53_spill] sm:$0xff] }
 0x23e   : > { %6345 = vmatmul.mubr.f32.vlgmr.msra.gmra.mrb[16].mxu0 %v10600_v22  ;;  %6011 = vmatprep.mubr.f32.mxu1 %v10603_v31  ;;  %v7004_v22 = vpack.c.bf16 %v10614_v56, %v10613_v1  ;;  %v10632_v1 = vld [vmem:[#allocation47_spill] sm:$0xff] }
 0x23f   : > { %6803 = vmatpush3.bf16.msra.mxu1 %v6800_v14  ;;  %6347 = vmatprep.mubr.f32.mxu0 %v10603_v31  ;;  %v10609_v14 = vld [vmem:[#allocation84_spill] sm:$0xff]  ;;  %v10620_v31 = vld [vmem:[#allocation86_spill] sm:$0xff]  ;;  %v10633_v56 = vand.u32 4294901760, %v10632_v1 }
 0x240   : > { %6995 = vmatpush3.bf16.msra.mxu0 %v6992_v35  ;;  %6805 = vmatprep.subr.bf16.mxu1 %v6804_v24  ;;  %v6812_v35 = vpack.c.bf16 %v10611_v32, %v10610_v34  ;;  %v10629_v34 = vld [vmem:[#allocation92_spill] sm:$0xff]  ;;  %v10630_v32 = vld [vmem:[#allocation46_spill] sm:$0xff] }
 0x241   : > { %6012 = vmatmul.mubr.f32.gmra.mrb[18].mxu1 %v10606_v38  ;;  %6997 = vmatprep.subr.bf16.mxu0 %v6996_v60 }
 0x242   : > { %6348 = vmatmul.mubr.f32.gmra.mrb[18].mxu0 %v10606_v38  ;;  %6014 = vmatprep.mubr.f32.mxu1 %v10609_v14  ;;  %v7008_v38 = vpack.c.bf16 %v10624_v19, %v10622_v50  ;;  %v10645_v19 = vand.u32 4294901760, %v10644_v18 }
 0x243   : > { %6807 = vmatpush3.bf16.msra.mxu1 %v6804_v24  ;;  %6350 = vmatprep.mubr.f32.mxu0 %v10609_v14  ;;  %v10615_v24 = vld [vmem:[#allocation88_spill] sm:$0xff] }
 0x244   : > { %6999 = vmatpush3.bf16.msra.mxu0 %v6996_v60  ;;  %6809 = vmatprep.subr.bf16.mxu1 %v6808_v62  ;;  %v6816_v60 = vpack.c.bf16 %v10619_v45, %v10617_v13  ;;  %v10639_v45 = vand.u32 4294901760, %v10638_v6 }
 0x245   : > { %6015 = vmatmul.mubr.f32.gmra.mrb[20].mxu1 %v10612_v58  ;;  %7001 = vmatprep.subr.bf16.mxu0 %v7000_v42 }
 0x246   : > { %6351 = vmatmul.mubr.f32.gmra.mrb[20].mxu0 %v10612_v58  ;;  %6017 = vmatprep.mubr.f32.mxu1 %v10615_v24  ;;  %v10631_v58 = vand.u32 4294901760, %v10630_v32 }
 0x247   : > { %6811 = vmatpush3.bf16.msra.mxu1 %v6808_v62  ;;  %6353 = vmatprep.mubr.f32.mxu0 %v10615_v24  ;;  %v10625_v62 = vld [vmem:[#allocation44_spill] sm:$0xff] }
 0x248   : > { %7003 = vmatpush3.bf16.msra.mxu0 %v7000_v42  ;;  %6813 = vmatprep.subr.bf16.mxu1 %v6812_v35  ;;  %v10626_v43 = vand.u32 4294901760, %v10625_v62  ;;  %v10628_v42 = vand.u32 4294901760, %v10627_v3  ;;  %v7012_v24 = vpack.c.bf16 %v10633_v56, %v10631_v58  ;;  %v10646_v62 = vld [vmem:[#allocation54_spill] sm:$0xff]  ;;  %v10648_v3 = vld [vmem:[#allocation55_spill] sm:$0xff] }
 0x249   : > { %6018 = vmatmul.mubr.f32.gmra.mrb[22].mxu1 %v10620_v31  ;;  %7005 = vmatprep.subr.bf16.mxu0 %v7004_v22 }
 0x24a   : > { %6354 = vmatmul.mubr.f32.gmra.mrb[22].mxu0 %v10620_v31  ;;  %6020 = vmatprep.mubr.f32.mxu1 %v9309_v16  ;;  %v6820_v14 = vpack.c.bf16 %v10628_v42, %v10626_v43  ;;  %v10640_v31 = vld [vmem:[#allocation51_spill] sm:$0xff]  ;;  %v10647_v43 = vand.u32 4294901760, %v10646_v62  ;;  %v10649_v42 = vand.u32 4294901760, %v10648_v3 }
 0x24b   : > { %6815 = vmatpush3.bf16.msra.mxu1 %v6812_v35  ;;  %6356 = vmatprep.mubr.f32.mxu0 %v9309_v16  ;;  %v10634_v16 = vld [vmem:[#allocation48_spill] sm:$0xff]  ;;  %v10641_v44 = vand.u32 4294901760, %v10640_v31 }
 0x24c   : > { %7007 = vmatpush3.bf16.msra.mxu0 %v7004_v22  ;;  %6817 = vmatprep.subr.bf16.mxu1 %v6816_v60  ;;  %v10635_v35 = vand.u32 4294901760, %v10634_v16  ;;  %v10636_v22 = vld [vmem:[#allocation49_spill] sm:$0xff] }
 0x24d   : > { %6021 = vmatmul.mubr.f32.gmra.mrb[24].mxu1 %v10629_v34  ;;  %7009 = vmatprep.subr.bf16.mxu0 %v7008_v38  ;;  %v10637_v7 = vand.u32 4294901760, %v10636_v22  ;;  %v7016_v50 = vpack.c.bf16 %v10641_v44, %v10639_v45 }
 0x24e   : > { %6357 = vmatmul.mubr.f32.gmra.mrb[24].mxu0 %v10629_v34  ;;  %6023 = vmatprep.mubr.f32.mxu1 %v9337_v37 }
 0x24f   : > { %6819 = vmatpush3.bf16.msra.mxu1 %v6816_v60  ;;  %6359 = vmatprep.mubr.f32.mxu0 %v9337_v37  ;;  %v6824_v13 = vpack.c.bf16 %v10637_v7, %v10635_v35  ;;  %v10642_v37 = vld [vmem:[#allocation52_spill] sm:$0xff] }
 0x250   : > { %7011 = vmatpush3.bf16.msra.mxu0 %v7008_v38  ;;  %6821 = vmatprep.subr.bf16.mxu1 %v6820_v14  ;;  %v10643_v60 = vand.u32 4294901760, %v10642_v37 }
 0x251   : > { %6024 = vmatmul.mubr.f32.gmra.mrb[26].mxu1 %v9328_v55  ;;  %7013 = vmatprep.subr.bf16.mxu0 %v7012_v24 }
 0x252   : > { %6360 = vmatmul.mubr.f32.gmra.mrb[26].mxu0 %v9328_v55  ;;  %6026 = vmatprep.mubr.f32.mxu1 %v9360_v15  ;;  %v6828_v38 = vpack.c.bf16 %v10645_v19, %v10643_v60  ;;  %v7020_v55 = vpack.c.bf16 %v10649_v42, %v10647_v43 }
 0x253   : > { %6823 = vmatpush3.bf16.msra.mxu1 %v6820_v14  ;;  %6362 = vmatprep.mubr.f32.mxu0 %v9360_v15 }
 0x254   : > { %7015 = vmatpush3.bf16.msra.mxu0 %v7012_v24  ;;  %6825 = vmatprep.subr.bf16.mxu1 %v6824_v13 }
 0x255   : > { %6027 = vmatmul.mubr.f32.gmra.mrb[28].mxu1 %v9373_v25  ;;  %7017 = vmatprep.subr.bf16.mxu0 %v7016_v50 }
 0x256   : > { %6363 = vmatmul.mubr.f32.gmra.mrb[28].mxu0 %v9373_v25  ;;  %6029 = vmatprep.mubr.f32.mxu1 %v9385_v61 }
 0x257   : > { %6827 = vmatpush3.bf16.msra.mxu1 %v6824_v13  ;;  %6365 = vmatprep.mubr.f32.mxu0 %v9385_v61 }
 0x258   : > { %7019 = vmatpush3.bf16.msra.mxu0 %v7016_v50  ;;  %6829 = vmatprep.subr.bf16.mxu1 %v6828_v38 }
 0x259   : > { %6030 = vmatmul.mubr.f32.gmra.mrb[30].mxu1 %v9391_v59  ;;  %7021 = vmatprep.subr.bf16.mxu0 %v7020_v55 }
 0x25a   : > { %6366 = vmatmul.mubr.f32.gmra.mrb[30].mxu0 %v9391_v59  ;;  %6064 = vmatprep.mubr.f32.mxu1 %v9095_v39 }
 0x25b   : > { %6831 = vmatpush3.bf16.msra.mxu1 %v6828_v38  ;;  %6400 = vmatprep.mubr.f32.mxu0 %v9095_v39 }
 0x25c   : > { %7023 = vmatpush3.bf16.msra.mxu0 %v7020_v55  ;;  %6833 = vmatprep.subr.bf16.mxu1 %v10567_v8 }
 0x25d   : > { %7025 = vmatprep.subr.bf16.mxu0 %v10568_v0 }
 0x25e   : > { %6065 = vmatmul.mubr.f32.vlgmr.msra.gmra.mrb[16].mxu1 %v9084_v41 }
 0x25f   : > { %6401 = vmatmul.mubr.f32.vlgmr.msra.gmra.mrb[16].mxu0 %v9084_v41  ;;  %6067 = vmatprep.mubr.f32.mxu1 %v9141_v11 }
 0x260   : > { %6835 = vmatpush3.bf16.msra.mxu1 %v10567_v8  ;;  %6403 = vmatprep.mubr.f32.mxu0 %v9141_v11 }
 0x261   : > { %7027 = vmatpush3.bf16.msra.mxu0 %v10568_v0  ;;  %6837 = vmatprep.subr.bf16.mxu1 %v10571_v57 }
 0x262   : > { %6068 = vmatmul.mubr.f32.gmra.mrb[18].mxu1 %v9135_v47  ;;  %7029 = vmatprep.subr.bf16.mxu0 %v10573_v12 }
 0x263   : > { %6404 = vmatmul.mubr.f32.gmra.mrb[18].mxu0 %v9135_v47  ;;  %6070 = vmatprep.mubr.f32.mxu1 %v9173_v33 }
 0x264   : > { %6839 = vmatpush3.bf16.msra.mxu1 %v10571_v57  ;;  %6406 = vmatprep.mubr.f32.mxu0 %v9173_v33 }
 0x265   : > { %7031 = vmatpush3.bf16.msra.mxu0 %v10573_v12  ;;  %6841 = vmatprep.subr.bf16.mxu1 %v10575_v40 }
 0x266   : > { %6071 = vmatmul.mubr.f32.gmra.mrb[20].mxu1 %v9167_v26  ;;  %7033 = vmatprep.subr.bf16.mxu0 %v10577_v21 }
 0x267   : > { %6407 = vmatmul.mubr.f32.gmra.mrb[20].mxu0 %v9167_v26  ;;  %6073 = vmatprep.mubr.f32.mxu1 %v9208_v9 }
 0x268   : > { %6843 = vmatpush3.bf16.msra.mxu1 %v10575_v40  ;;  %6409 = vmatprep.mubr.f32.mxu0 %v9208_v9 }
 0x269   : > { %7035 = vmatpush3.bf16.msra.mxu0 %v10577_v21  ;;  %6845 = vmatprep.subr.bf16.mxu1 %v10578_v36 }
 0x26a   : > { %6074 = vmatmul.mubr.f32.gmra.mrb[22].mxu1 %v9200_v28  ;;  %7037 = vmatprep.subr.bf16.mxu0 %v10580_v4 }
 0x26b   : > { %6410 = vmatmul.mubr.f32.gmra.mrb[22].mxu0 %v9200_v28  ;;  %6076 = vmatprep.mubr.f32.mxu1 %v9247_v52 }
 0x26c   : > { %6847 = vmatpush3.bf16.msra.mxu1 %v10578_v36  ;;  %6412 = vmatprep.mubr.f32.mxu0 %v9247_v52 }
 0x26d   : > { %7039 = vmatpush3.bf16.msra.mxu0 %v10580_v4  ;;  %6849 = vmatprep.subr.bf16.mxu1 %v10581_v10 }
 0x26e   : > { %6077 = vmatmul.mubr.f32.gmra.mrb[24].mxu1 %v9238_v46  ;;  %7041 = vmatprep.subr.bf16.mxu0 %v10582_v49 }
 0x26f   : > { %6413 = vmatmul.mubr.f32.gmra.mrb[24].mxu0 %v9238_v46  ;;  %6079 = vmatprep.mubr.f32.mxu1 %v9284_v5 }
 0x270   : > { %6851 = vmatpush3.bf16.msra.mxu1 %v10581_v10  ;;  %6415 = vmatprep.mubr.f32.mxu0 %v9284_v5 }
 0x271   : > { %7043 = vmatpush3.bf16.msra.mxu0 %v10582_v49  ;;  %6853 = vmatprep.subr.bf16.mxu1 %v10583_v23 }
 0x272   : > { %6080 = vmatmul.mubr.f32.gmra.mrb[26].mxu1 %v9276_v53  ;;  %7045 = vmatprep.subr.bf16.mxu0 %v10584_v17 }
 0x273   : > { %6416 = vmatmul.mubr.f32.gmra.mrb[26].mxu0 %v9276_v53  ;;  %6082 = vmatprep.mubr.f32.mxu1 %v9322_v48 }
 0x274   : > { %6855 = vmatpush3.bf16.msra.mxu1 %v10583_v23  ;;  %6418 = vmatprep.mubr.f32.mxu0 %v9322_v48 }
 0x275   : > { %7047 = vmatpush3.bf16.msra.mxu0 %v10584_v17  ;;  %6857 = vmatprep.subr.bf16.mxu1 %v10585_v54 }
 0x276   : > { %6083 = vmatmul.mubr.f32.gmra.mrb[28].mxu1 %v9315_v2  ;;  %7049 = vmatprep.subr.bf16.mxu0 %v10586_v29 }
 0x277   : > { %6419 = vmatmul.mubr.f32.gmra.mrb[28].mxu0 %v9315_v2  ;;  %6085 = vmatprep.mubr.f32.mxu1 %v9357_v27 }
 0x278   : > { %6859 = vmatpush3.bf16.msra.mxu1 %v10585_v54  ;;  %6421 = vmatprep.mubr.f32.mxu0 %v9357_v27 }
 0x279   : > { %7051 = vmatpush3.bf16.msra.mxu0 %v10586_v29  ;;  %6861 = vmatprep.subr.bf16.mxu1 %v10587_v30 }
 0x27a   : > { %6086 = vmatmul.mubr.f32.gmra.mrb[30].mxu1 %v9351_v63  ;;  %7053 = vmatprep.subr.bf16.mxu0 %v10592_v51 }
 0x27b   : > { %6422 = vmatmul.mubr.f32.gmra.mrb[30].mxu0 %v9351_v63  ;;  %6120 = vmatprep.mubr.f32.mxu1 %v9095_v39 }
 0x27c   : > { %6863 = vmatpush3.bf16.msra.mxu1 %v10587_v30  ;;  %6456 = vmatprep.mubr.f32.mxu0 %v9095_v39 }
 0x27d   : > { %7055 = vmatpush3.bf16.msra.mxu0 %v10592_v51 }
 0x27f   : > { %6121 = vmatmul.mubr.f32.vlgmr.msra.gmra.mrb[16].mxu1 %v9084_v41 }
 0x280   : > { %6457 = vmatmul.mubr.f32.vlgmr.msra.gmra.mrb[16].mxu0 %v9084_v41  ;;  %6123 = vmatprep.mubr.f32.mxu1 %v9141_v11  ;;  %v3035_v41 = vpop.xlane.xlu0 %3034 }
 0x281   : > { %6459 = vmatprep.mubr.f32.mxu0 %v9141_v11 }
 0x283   : > { %6124 = vmatmul.mubr.f32.gmra.mrb[18].mxu1 %v9135_v47 }
 0x284   : > { %6460 = vmatmul.mubr.f32.gmra.mrb[18].mxu0 %v9135_v47  ;;  %6126 = vmatprep.mubr.f32.mxu1 %v9173_v33  ;;  %v3033_v47 = vpop.xlane.xlu0 %3032 }
 0x285   : > { %6462 = vmatprep.mubr.f32.mxu0 %v9173_v33  ;;  %v9734_v33 = vld [vmem:[%s10152_s4] ss:$0 sm:$0xff] }
 0x287   : > { %6127 = vmatmul.mubr.f32.gmra.mrb[20].mxu1 %v9167_v26 }
 0x288   : > { %6463 = vmatmul.mubr.f32.gmra.mrb[20].mxu0 %v9167_v26  ;;  %6129 = vmatprep.mubr.f32.mxu1 %v9208_v9  ;;  %v3041_v26 = vpop.xlane.xlu0 %3040 }
 0x289   : > { %6465 = vmatprep.mubr.f32.mxu0 %v9208_v9  ;;  %v9739_v9 = vld [vmem:[%s10154_s6] ss:$0 sm:$0xff] }
 0x28a   : > { %v4373_v15 = vadd.f32 %v9739_v9, %v3033_v47  ;;  %v4377_v13 = vadd.f32 %v9739_v9, %v3041_v26 }
 0x28b   : > { %6130 = vmatmul.mubr.f32.gmra.mrb[22].mxu1 %v9200_v28 }
 0x28c   : > { %6466 = vmatmul.mubr.f32.gmra.mrb[22].mxu0 %v9200_v28  ;;  %6132 = vmatprep.mubr.f32.mxu1 %v9247_v52  ;;  %v3039_v28 = vpop.xlane.xlu1 %3038  ;;  %v3045_v61 = vpop.xlane.xlu0 %3044 }
 0x28d   : > { %6468 = vmatprep.mubr.f32.mxu0 %v9247_v52  ;;  %v4376_v36 = vadd.f32 %v9739_v9, %v3039_v28  ;;  %v4379_v55 = vadd.f32 %v9739_v9, %v3045_v61 }
 0x28f   : > { %6133 = vmatmul.mubr.f32.gmra.mrb[24].mxu1 %v9238_v46 }
 0x290   : > { %6469 = vmatmul.mubr.f32.gmra.mrb[24].mxu0 %v9238_v46  ;;  %6135 = vmatprep.mubr.f32.mxu1 %v9284_v5  ;;  %v3037_v39 = vpop.xlane.xlu1 %3036  ;;  %v3049_v24 = vpop.xlane.xlu0 %3048 }
 0x291   : > { %6471 = vmatprep.mubr.f32.mxu0 %v9284_v5  ;;  %v4375_v17 = vadd.f32 %v9739_v9, %v3037_v39 }
 0x293   : > { %6136 = vmatmul.mubr.f32.gmra.mrb[26].mxu1 %v9276_v53 }
 0x294   : > { %6472 = vmatmul.mubr.f32.gmra.mrb[26].mxu0 %v9276_v53  ;;  %6138 = vmatprep.mubr.f32.mxu1 %v9322_v48  ;;  %v3043_v11 = vpop.xlane.xlu1 %3042  ;;  %v3053_v39 = vpop.xlane.xlu0 %3052 }
 0x295   : > { %6474 = vmatprep.mubr.f32.mxu0 %v9322_v48  ;;  %v4378_v56 = vadd.f32 %v9739_v9, %v3043_v11 }
 0x297   : > { %6139 = vmatmul.mubr.f32.gmra.mrb[28].mxu1 %v9315_v2 }
 0x298   : > { %6475 = vmatmul.mubr.f32.gmra.mrb[28].mxu0 %v9315_v2  ;;  %6141 = vmatprep.mubr.f32.mxu1 %v9357_v27  ;;  %v3047_v2 = vpop.xlane.xlu1 %3046 }
 0x299   : > { %6477 = vmatprep.mubr.f32.mxu0 %v9357_v27  ;;  %v4374_v27 = vadd.f32 %v9739_v9, %v3035_v41  ;;  %v4380_v19 = vadd.f32 %v9739_v9, %v3047_v2 }
 0x29b   : > { %6142 = vmatmul.mubr.f32.gmra.mrb[30].mxu1 %v9351_v63 }
 0x29c   : > { %6478 = vmatmul.mubr.f32.gmra.mrb[30].mxu0 %v9351_v63  ;;  %v3051_v30 = vpop.xlane.xlu1 %3050 }
 0x2a0   : > { %v3055_v38 = vpop.xlane.xlu1 %3054 }
 0x2a4   : > { %v3059_v61 = vpop.xlane.xlu1 %3058 }
 0x352   : > { %v6122_v53 = vpop.f32.mrb[16].mxu1 }
 0x353   : > { %v7088_v46 = vadd.f32 %v6122_v53, %v9734_v33  ;;  %v6458_v52 = vpop.f32.mrb[16].mxu0  ;;  %v2922_v5 = vpop.f32.mrb[17].mxu1 }
 0x354   : > { %v4390_v48 = vmul.f32 2.0, %v6458_v52  ;;  %v7089_v59 = vadd.f32 %v9734_v33, %v2922_v5  ;;  %v4272_v63 = vpop.f32.mrb[17].mxu0  ;;  %v4382_v5 = vadd.f32 %v9739_v9, %v3051_v30  ;;  %v4383_v30 = vadd.f32 %v9739_v9, %v3053_v39 }
 0x355   : > { %4682 = vst [vmem:[%s9746_s16 + $0x8] sm:$0xff] %v7088_v46  ;;  %v4389_v25 = vmul.f32 2.0, %v4272_v63  ;;  %v4381_v63 = vadd.f32 %v9739_v9, %v3049_v24 }
 0x356   : > { %v4406_v8 = vsub.f32 %v4374_v27, %v4390_v48  ;;  %4681 = vst [vmem:[%s9746_s16] sm:$0xff] %v7089_v59  ;;  %v6125_v0 = vpop.f32.mrb[18].mxu1 }
 0x357   : > { %v4405_v57 = vsub.f32 %v4373_v15, %v4389_v25  ;;  %v7090_v12 = vadd.f32 %v6125_v0, %v9734_v33  ;;  %v6461_v40 = vpop.f32.mrb[18].mxu0  ;;  %v2934_v21 = vpop.f32.mrb[19].mxu1 }
 0x358   : > { %v9752_v4 = vmax.f32 %v4406_v8, 0.0  ;;  %v4392_v10 = vmul.f32 2.0, %v6461_v40  ;;  %v7091_v49 = vadd.f32 %v9734_v33, %v2934_v21  ;;  %v4284_v23 = vpop.f32.mrb[19].mxu0 }
 0x359   : > { %v9756_v54 = vmax.f32 %v4405_v57, 0.0  ;;  %4684 = vst [vmem:[%s9746_s16 + $0x18] sm:$0xff] %v7090_v12  ;;  %v4391_v29 = vmul.f32 2.0, %v4284_v23 }
 0x35a   : > { %v4408_v51 = vsub.f32 %v4376_v36, %v4392_v10  ;;  %4683 = vst [vmem:[%s9746_s16 + $0x10] sm:$0xff] %v7091_v49  ;;  %4439 = vmin.xlane.f32.xlu1 %v9752_v4  ;;  %v6128_v14 = vpop.f32.mrb[20].mxu1  ;;  %v4384_v36 = vadd.f32 %v9739_v9, %v3055_v38  ;;  %v3057_v10 = vpop.xlane.xlu0 %3056 }
 0x35b   : > { %v4407_v34 = vsub.f32 %v4375_v17, %v4391_v29  ;;  %4437 = vmin.xlane.f32.xlu0 %v9756_v54  ;;  %v7092_v32 = vadd.f32 %v6128_v14, %v9734_v33  ;;  %v6464_v58 = vpop.f32.mrb[20].mxu0  ;;  %v2946_v1 = vpop.f32.mrb[21].mxu1 }
 0x35c   : > { %v9764_v16 = vmax.f32 %v4408_v51, 0.0  ;;  %v4394_v35 = vmul.f32 2.0, %v6464_v58  ;;  %v7093_v22 = vadd.f32 %v9734_v33, %v2946_v1  ;;  %v4296_v7 = vpop.f32.mrb[21].mxu0 }
 0x35d   : > { %v9768_v6 = vmax.f32 %v4407_v34, 0.0  ;;  %4686 = vst [vmem:[%s9746_s16 + $0x28] sm:$0xff] %v7092_v32  ;;  %v4393_v45 = vmul.f32 2.0, %v4296_v7 }
 0x35e   : > { %v4410_v31 = vsub.f32 %v4378_v56, %v4394_v35  ;;  %4685 = vst [vmem:[%s9746_s16 + $0x20] sm:$0xff] %v7093_v22  ;;  %4443 = vmin.xlane.f32.xlu1 %v9764_v16  ;;  %v6131_v44 = vpop.f32.mrb[22].mxu1  ;;  %v4386_v35 = vadd.f32 %v9739_v9, %v3059_v61 }
 0x35f   : > { %v4409_v50 = vsub.f32 %v4377_v13, %v4393_v45  ;;  %4441 = vmin.xlane.f32.xlu0 %v9768_v6  ;;  %v7094_v37 = vadd.f32 %v6131_v44, %v9734_v33  ;;  %v6467_v60 = vpop.f32.mrb[22].mxu0  ;;  %v2958_v18 = vpop.f32.mrb[23].mxu1 }
 0x360   : > { %v9776_v62 = vmax.f32 %v4410_v31, 0.0  ;;  %v4396_v43 = vmul.f32 2.0, %v6467_v60  ;;  %v7095_v3 = vadd.f32 %v9734_v33, %v2958_v18  ;;  %v4308_v42 = vpop.f32.mrb[23].mxu0  ;;  %v4385_v31 = vadd.f32 %v9739_v9, %v3057_v10  ;;  %v3063_v44 = vpop.xlane.xlu1 %3062 }
 0x361   : > { %v9780_v28 = vmax.f32 %v4409_v50, 0.0  ;;  %4688 = vst [vmem:[%s9746_s16 + $0x38] sm:$0xff] %v7094_v37  ;;  %v4395_v41 = vmul.f32 2.0, %v4308_v42  ;;  %v3061_v60 = vpop.xlane.xlu0 %3060 }
 0x362   : > { %v4412_v47 = vsub.f32 %v4380_v19, %v4396_v43  ;;  %4687 = vst [vmem:[%s9746_s16 + $0x30] sm:$0xff] %v7095_v3  ;;  %4447 = vmin.xlane.f32.xlu1 %v9776_v62  ;;  %v6134_v11 = vpop.f32.mrb[24].mxu1 }
 0x363   : > { %v4411_v26 = vsub.f32 %v4379_v55, %v4395_v41  ;;  %4445 = vmin.xlane.f32.xlu0 %v9780_v28  ;;  %v7096_v53 = vadd.f32 %v6134_v11, %v9734_v33  ;;  %v6470_v46 = vpop.f32.mrb[24].mxu0  ;;  %v2970_v52 = vpop.f32.mrb[25].mxu1  ;;  %v4388_v55 = vadd.f32 %v9739_v9, %v3063_v44 }
 0x364   : > { %v9788_v27 = vmax.f32 %v4412_v47, 0.0  ;;  %v4398_v2 = vmul.f32 2.0, %v6470_v46  ;;  %v7097_v48 = vadd.f32 %v9734_v33, %v2970_v52  ;;  %v4320_v59 = vpop.f32.mrb[25].mxu0 }
 0x365   : > { %v9792_v15 = vmax.f32 %v4411_v26, 0.0  ;;  %4690 = vst [vmem:[%s9746_s16 + $0x48] sm:$0xff] %v7096_v53  ;;  %v4397_v25 = vmul.f32 2.0, %v4320_v59  ;;  %v4387_v26 = vadd.f32 %v9739_v9, %v3061_v60 }
 0x366   : > { %v4414_v8 = vsub.f32 %v4382_v5, %v4398_v2  ;;  %4689 = vst [vmem:[%s9746_s16 + $0x40] sm:$0xff] %v7097_v48  ;;  %4451 = vmin.xlane.f32.xlu1 %v9788_v27  ;;  %v6137_v0 = vpop.f32.mrb[26].mxu1 }
 0x367   : > { %v4413_v57 = vsub.f32 %v4381_v63, %v4397_v25  ;;  %4449 = vmin.xlane.f32.xlu0 %v9792_v15  ;;  %v7098_v12 = vadd.f32 %v6137_v0, %v9734_v33  ;;  %v6473_v40 = vpop.f32.mrb[26].mxu0  ;;  %v2982_v21 = vpop.f32.mrb[27].mxu1 }
 0x368   : > { %v9800_v49 = vmax.f32 %v4414_v8, 0.0  ;;  %v4400_v23 = vmul.f32 2.0, %v6473_v40  ;;  %v7099_v17 = vadd.f32 %v9734_v33, %v2982_v21  ;;  %v4332_v29 = vpop.f32.mrb[27].mxu0 }
 0x369   : > { %v9804_v51 = vmax.f32 %v4413_v57, 0.0  ;;  %4692 = vst [vmem:[%s9746_s16 + $0x58] sm:$0xff] %v7098_v12  ;;  %v4399_v14 = vmul.f32 2.0, %v4332_v29 }
 0x36a   : > { %v4416_v34 = vsub.f32 %v4384_v36, %v4400_v23  ;;  %4691 = vst [vmem:[%s9746_s16 + $0x50] sm:$0xff] %v7099_v17  ;;  %4455 = vmin.xlane.f32.xlu1 %v9800_v49  ;;  %v6140_v32 = vpop.f32.mrb[28].mxu1 }
 0x36b   : > { %v4415_v58 = vsub.f32 %v4383_v30, %v4399_v14  ;;  %4453 = vmin.xlane.f32.xlu0 %v9804_v51  ;;  %v7100_v1 = vadd.f32 %v6140_v32, %v9734_v33  ;;  %v6476_v56 = vpop.f32.mrb[28].mxu0  ;;  %v2994_v24 = vpop.f32.mrb[29].mxu1 }
 0x36c   : > { %v9812_v22 = vmax.f32 %v4416_v34, 0.0  ;;  %v4402_v7 = vmul.f32 2.0, %v6476_v56  ;;  %v7101_v13 = vadd.f32 %v9734_v33, %v2994_v24  ;;  %v4344_v45 = vpop.f32.mrb[29].mxu0 }
 0x36d   : > { %v9816_v50 = vmax.f32 %v4415_v58, 0.0  ;;  %4694 = vst [vmem:[%s9746_s16 + $0x68] sm:$0xff] %v7100_v1  ;;  %v4401_v37 = vmul.f32 2.0, %v4344_v45 }
 0x36e   : > { %v4418_v18 = vsub.f32 %v4386_v35, %v4402_v7  ;;  %4693 = vst [vmem:[%s9746_s16 + $0x60] sm:$0xff] %v7101_v13  ;;  %4459 = vmin.xlane.f32.xlu1 %v9812_v22  ;;  %v6143_v19 = vpop.f32.mrb[30].mxu1 }
 0x36f   : > { %v4417_v38 = vsub.f32 %v4385_v31, %v4401_v37  ;;  %4457 = vmin.xlane.f32.xlu0 %v9816_v50  ;;  %v7102_v43 = vadd.f32 %v6143_v19, %v9734_v33  ;;  %v6479_v3 = vpop.f32.mrb[30].mxu0  ;;  %v3006_v42 = vpop.f32.mrb[31].mxu1 }
 0x370   : > { %v9824_v41 = vmax.f32 %v4418_v18, 0.0  ;;  %v4404_v39 = vmul.f32 2.0, %v6479_v3  ;;  %v7103_v47 = vadd.f32 %v9734_v33, %v3006_v42  ;;  %v4356_v11 = vpop.f32.mrb[31].mxu0 }
 0x371   : > { %v9828_v53 = vmax.f32 %v4417_v38, 0.0  ;;  %4696 = vst [vmem:[%s9746_s16 + $0x78] sm:$0xff] %v7102_v43  ;;  %v4403_v46 = vmul.f32 2.0, %v4356_v11 }
 0x372   : > { %v4420_v52 = vsub.f32 %v4388_v55, %v4404_v39  ;;  %4695 = vst [vmem:[%s9746_s16 + $0x70] sm:$0xff] %v7103_v47  ;;  %4463 = vmin.xlane.f32.xlu1 %v9824_v41 }
 0x373   : > { %v4419_v5 = vsub.f32 %v4387_v26, %v4403_v46  ;;  %4461 = vmin.xlane.f32.xlu0 %v9828_v53 }
 0x374   : > { %v9834_v2 = vmax.f32 %v4420_v52, 0.0 }
 0x375   : > { %v9836_v48 = vmax.f32 %v4419_v5, 0.0 }
 0x376   : > { %4467 = vmin.xlane.f32.xlu1 %v9834_v2 }
 0x377   : > { %4465 = vmin.xlane.f32.xlu0 %v9836_v48 }
 0x3e7   : > { %v4440_v33 = vpop.xlane.xlu1 %4439 }
 0x3e8   : > { %v4470_v9 = vsub.f32 %v9752_v4, %v4440_v33  ;;  %v4438_v59 = vpop.xlane.xlu0 %4437 }
 0x3e9   : > { %v4469_v63 = vsub.f32 %v9756_v54, %v4438_v59 }
 0x3ea   : > { %v4486_v25 = vmul.f32 -1000.0, %v4470_v9 }
 0x3eb   : > { %v4485_v61 = vmul.f32 -1000.0, %v4469_v63  ;;  %v4444_v8 = vpop.xlane.xlu1 %4443 }
 0x3ec   : > { %v4503_v0 = vmul.f32 1.442695, %v4486_v25  ;;  %v4472_v57 = vsub.f32 %v9764_v16, %v4444_v8  ;;  %v4442_v12 = vpop.xlane.xlu0 %4441 }
 0x3ed   : > { %v4501_v40 = vmul.f32 1.442695, %v4485_v61  ;;  %v4471_v21 = vsub.f32 %v9768_v6, %v4442_v12 }
 0x3ee   : > { %7414 = vpow2.f32 %v4503_v0  ;;  %v4488_v36 = vmul.f32 -1000.0, %v4472_v57 }
 0x3ef   : > { %7416 = vpow2.f32 %v4501_v40  ;;  %v4487_v10 = vmul.f32 -1000.0, %v4471_v21  ;;  %v4448_v23 = vpop.xlane.xlu1 %4447 }
 0x3f0   : > { %v4507_v17 = vmul.f32 1.442695, %v4488_v36  ;;  %v4474_v29 = vsub.f32 %v9776_v62, %v4448_v23  ;;  %v4446_v30 = vpop.xlane.xlu0 %4445 }
 0x3f1   : > { %v4505_v14 = vmul.f32 1.442695, %v4487_v10  ;;  %v4473_v34 = vsub.f32 %v9780_v28, %v4446_v30 }
 0x3f2   : > { %7418 = vpow2.f32 %v4507_v17  ;;  %v4490_v32 = vmul.f32 -1000.0, %v4474_v29 }
 0x3f3   : > { %7420 = vpow2.f32 %v4505_v14  ;;  %v4489_v58 = vmul.f32 -1000.0, %v4473_v34  ;;  %v4452_v1 = vpop.xlane.xlu1 %4451 }
 0x3f4   : > { %v4511_v56 = vmul.f32 1.442695, %v4490_v32  ;;  %v4476_v24 = vsub.f32 %v9788_v27, %v4452_v1  ;;  %v4450_v35 = vpop.xlane.xlu0 %4449 }
 0x3f5   : > { %v4509_v7 = vmul.f32 1.442695, %v4489_v58  ;;  %v4475_v13 = vsub.f32 %v9792_v15, %v4450_v35 }
 0x3f6   : > { %7422 = vpow2.f32 %v4511_v56  ;;  %v4492_v45 = vmul.f32 -1000.0, %v4476_v24 }
 0x3f7   : > { %7424 = vpow2.f32 %v4509_v7  ;;  %v4491_v31 = vmul.f32 -1000.0, %v4475_v13  ;;  %v4456_v44 = vpop.xlane.xlu1 %4455 }
 0x3f8   : > { %v9848_v37 = vpop.eup %7414  ;;  %v4515_v60 = vmul.f32 1.442695, %v4492_v45  ;;  %v4478_v18 = vsub.f32 %v9800_v49, %v4456_v44  ;;  %v4454_v19 = vpop.xlane.xlu0 %4453 }
 0x3f9   : > { %v9851_v38 = vpop.eup %7416  ;;  %v4513_v43 = vmul.f32 1.442695, %v4491_v31  ;;  %v4477_v3 = vsub.f32 %v9804_v51, %v4454_v19  ;;  %4535 = vadd.xlane.f32.xlu1 %v9848_v37 }
 0x3fa   : > { %7426 = vpow2.f32 %v4515_v60  ;;  %v4494_v42 = vmul.f32 -1000.0, %v4478_v18  ;;  %4533 = vadd.xlane.f32.xlu0 %v9851_v38 }
 0x3fb   : > { %7428 = vpow2.f32 %v4513_v43  ;;  %v4493_v55 = vmul.f32 -1000.0, %v4477_v3  ;;  %v4460_v39 = vpop.xlane.xlu1 %4459 }
 0x3fc   : > { %v9856_v47 = vpop.eup %7418  ;;  %v4519_v11 = vmul.f32 1.442695, %v4494_v42  ;;  %v4480_v26 = vsub.f32 %v9812_v22, %v4460_v39  ;;  %v4458_v46 = vpop.xlane.xlu0 %4457 }
 0x3fd   : > { %v9859_v52 = vpop.eup %7420  ;;  %v4517_v5 = vmul.f32 1.442695, %v4493_v55  ;;  %v4479_v33 = vsub.f32 %v9816_v50, %v4458_v46  ;;  %4539 = vadd.xlane.f32.xlu1 %v9856_v47 }
 0x3fe   : > { %7430 = vpow2.f32 %v4519_v11  ;;  %v4496_v9 = vmul.f32 -1000.0, %v4480_v26  ;;  %4537 = vadd.xlane.f32.xlu0 %v9859_v52 }
 0x3ff   : > { %7432 = vpow2.f32 %v4517_v5  ;;  %v4495_v59 = vmul.f32 -1000.0, %v4479_v33  ;;  %v4464_v63 = vpop.xlane.xlu1 %4463 }
 0x400   : > { %v9864_v25 = vpop.eup %7422  ;;  %v4523_v61 = vmul.f32 1.442695, %v4496_v9  ;;  %v4482_v8 = vsub.f32 %v9824_v41, %v4464_v63  ;;  %v4462_v0 = vpop.xlane.xlu0 %4461 }
 0x401   : > { %v9867_v57 = vpop.eup %7424  ;;  %v4521_v12 = vmul.f32 1.442695, %v4495_v59  ;;  %v4481_v40 = vsub.f32 %v9828_v53, %v4462_v0  ;;  %4543 = vadd.xlane.f32.xlu1 %v9864_v25 }
 0x402   : > { %7434 = vpow2.f32 %v4523_v61  ;;  %v4498_v21 = vmul.f32 -1000.0, %v4482_v8  ;;  %4541 = vadd.xlane.f32.xlu0 %v9867_v57 }
 0x403   : > { %7436 = vpow2.f32 %v4521_v12  ;;  %v4497_v36 = vmul.f32 -1000.0, %v4481_v40  ;;  %v4468_v10 = vpop.xlane.xlu1 %4467 }
 0x404   : > { %v9872_v23 = vpop.eup %7426  ;;  %v4527_v17 = vmul.f32 1.442695, %v4498_v21  ;;  %v4484_v29 = vsub.f32 %v9834_v2, %v4468_v10  ;;  %v4466_v30 = vpop.xlane.xlu0 %4465 }
 0x405   : > { %v9875_v14 = vpop.eup %7428  ;;  %v4525_v34 = vmul.f32 1.442695, %v4497_v36  ;;  %v4483_v32 = vsub.f32 %v9836_v48, %v4466_v30  ;;  %4547 = vadd.xlane.f32.xlu1 %v9872_v23 }
 0x406   : > { %7438 = vpow2.f32 %v4527_v17  ;;  %v4500_v58 = vmul.f32 -1000.0, %v4484_v29  ;;  %4545 = vadd.xlane.f32.xlu0 %v9875_v14 }
 0x407   : > { %7440 = vpow2.f32 %v4525_v34  ;;  %v4499_v1 = vmul.f32 -1000.0, %v4483_v32 }
 0x408   : > { %v9880_v56 = vpop.eup %7430  ;;  %v4531_v24 = vmul.f32 1.442695, %v4500_v58 }
 0x409   : > { %v9882_v35 = vpop.eup %7432  ;;  %v4529_v7 = vmul.f32 1.442695, %v4499_v1  ;;  %4551 = vadd.xlane.f32.xlu1 %v9880_v56 }
 0x40a   : > { %7442 = vpow2.f32 %v4531_v24  ;;  %4549 = vadd.xlane.f32.xlu0 %v9882_v35 }
 0x40b   : > { %7444 = vpow2.f32 %v4529_v7 }
 0x40c   : > { %v9886_v13 = vpop.eup %7434 }
 0x40d   : > { %v9888_v45 = vpop.eup %7436  ;;  %4555 = vadd.xlane.f32.xlu1 %v9886_v13 }
 0x40e   : > { %4553 = vadd.xlane.f32.xlu0 %v9888_v45 }
 0x410   : > { %v9892_v31 = vpop.eup %7438 }
 0x411   : > { %v9894_v44 = vpop.eup %7440  ;;  %4559 = vadd.xlane.f32.xlu1 %v9892_v31 }
 0x412   : > { %4557 = vadd.xlane.f32.xlu0 %v9894_v44 }
 0x414   : > { %v9898_v60 = vpop.eup %7442 }
 0x415   : > { %v9900_v18 = vpop.eup %7444  ;;  %4563 = vadd.xlane.f32.xlu1 %v9898_v60 }
 0x416   : > { %4561 = vadd.xlane.f32.xlu0 %v9900_v18 }
 0x417   : > { %7605 = shalt.err (!%p7602_p4)
}
 0x418   : > { %s7606_s17 = scalar_lea.hbm %s9910_s14, 2048  ;;  %s7610_s25 = scalar_lea.hbm %s10156_s8, 4096 }
 0x419   : > { %p7607_p9 = scmp.ne.s32.totalorder %s9910_s14, %s7606_s17  ;;  %p7611_p8 = scmp.lt.u32.totalorder %s9910_s14, %s10156_s8 }
 0x41a   : > { %p7612_p13 = scmp.lt.u32.totalorder %s7610_s25, %s7606_s17  ;;  %p7614_p10 = scmp.lt.u32.totalorder %s7606_s17, %s9910_s14 }
 0x41b   : > { %p7608_p0 = pnand %p7607_p9, %p7909_p5 }
 0x41c   : > { %p7613_p6 = por %p7612_p13, %p7611_p8 }
 0x41d   : > { %p7609_p11 = pneg %p7608_p0 }
 0x41e   : > { %p7615_p3 = por %p7614_p10, %p7613_p6 }
 0x420   : > { %p7616_p7 = pnand %p7615_p3, %p7609_p11 }
 0x422   : > { %7619 = shalt.err (!%p7616_p7)
}
 0x423   : > { %s7707_s11 = smov 128   ;;  %s7708_s19 = smov 8   ;;  %v4629_v3 = vlaneseq  ;;  %v4598_v33 = vmul.f32 %v9848_v37, %v9752_v4  ;;  %v4597_v63 = vmul.f32 %v9851_v38, %v9756_v54  ;;  %v10650_v40 = vld [vmem:[#allocation63_spill] sm:$0xff]  ;;  %v10651_v10 = vld [vmem:[#allocation64_spill] sm:$0xff]  ;;  %v4600_v29 = vmul.f32 %v9856_v47, %v9764_v16  ;;  %v10652_v24 = vld [vmem:[#allocation66_spill] sm:$0xff] }
 0x424   : > { %7343 = dma.vmem_to_hbm [thread:$0]  (%p7909_p5), %s9913_s27, 2048, %s9910_s14, %s4703_s15, %s7707_s11, %s7707_s11, %s7708_s19   ;;  %v4599_v32 = vmul.f32 %v9859_v52, %v9768_v6 }
 0x425   : > { %v9942_v39 = vand.u32 127, %v4629_v3  ;;  %s9963_s14 = scalar_lea.vmem [#allocation10], %s7963_s10  ;;  %v10653_v3 = vld [vmem:[#allocation68_spill] sm:$0xff]  ;;  %s10095_s21 = scalar_lea.hbm %s10155_s7, %s4894_s24 }
 0x426   : > { %s4716_s10 = sshll.u32 %s9963_s14, 4  ;;  %s4698_s17 = scalar_lea.sflag [#allocation4], %s7960_s12  ;;  %s10097_s10 = int_to_ptr.vmem [resolvable:$true] %s4716_s10 }
 0x427   : > { %vm4632_vm0 = vcmp.lt.s32.totalorder %v9942_v39, 32  ;;  %vm4631_vm1 = vcmp.lt.s32.totalorder %v9942_v39, 16  ;;  %s7620_s18 = scalar_lea.vmem %s10097_s10, 2048  ;;  %s7709_s9 = smov [#allocation10]  }
 0x428   : > { %v4634_v21 = vsel %vm4632_vm0, %v9752_v4, %v10650_v40  ;;  %v4633_v17 = vsel %vm4632_vm0, %v9756_v54, %v10651_v10  ;;  %v4636_v7 = vsel %vm4632_vm0, %v9764_v16, %v10652_v24  ;;  %v4635_v52 = vsel %vm4632_vm0, %v9768_v6, %v10653_v3  ;;  %p7621_p12 = scmp.ne.s32.totalorder %s10097_s10, %s7620_s18  ;;  %s7624_s16 = sshll.u32 %s7709_s9, 4  ;;  %s7625_s16 = int_to_ptr.vmem [resolvable:$false] %s7624_s16 }
 0x429   : > { %v4601_v16 = vmul.f32 %v9867_v57, %v9780_v28  ;;  %s7626_s24 = scalar_lea.vmem %s7625_s16, 4096  ;;  %p7627_p4 = scmp.lt.s32.totalorder %s10097_s10, %s7625_s16 }
 0x42a   : > { %p7622_p1 = pnand %p7621_p12, %p7909_p5  ;;  %p7628_p9 = scmp.lt.s32.totalorder %s7626_s24, %s7620_s18 }
 0x42c   : > { %p7623_p2 = pneg %p7622_p1  ;;  %p7629_p0 = por %p7628_p9, %p7627_p4 }
 0x42e   : > { %p7630_p11 = pnand %p7629_p0, %p7623_p2 }
 0x486   : > { %v4536_v19 = vpop.xlane.xlu1 %4535 }
 0x487   : > { %7446 = vrcp.f32 %v4536_v19  ;;  %v4534_v43 = vpop.xlane.xlu0 %4533 }
 0x488   : > { %7448 = vrcp.f32 %v4534_v43 }
 0x48a   : > { %v4540_v42 = vpop.xlane.xlu1 %4539 }
 0x48b   : > { %7450 = vrcp.f32 %v4540_v42  ;;  %v4538_v55 = vpop.xlane.xlu0 %4537 }
 0x48c   : > { %7452 = vrcp.f32 %v4538_v55  ;;  %v4602_v55 = vmul.f32 %v9864_v25, %v9776_v62 }
 0x48e   : > { %v4544_v11 = vpop.xlane.xlu1 %4543 }
 0x48f   : > { %7454 = vrcp.f32 %v4544_v11  ;;  %v4542_v26 = vpop.xlane.xlu0 %4541 }
 0x490   : > { %7456 = vrcp.f32 %v4542_v26 }
 0x491   : > { %v7447_v46 = vpop.eup %7446 }
 0x492   : > { %v7449_v5 = vpop.eup %7448  ;;  %v4582_v9 = vmul.f32 2.0, %v7447_v46  ;;  %v4548_v59 = vpop.xlane.xlu1 %4547 }
 0x493   : > { %v4581_v61 = vmul.f32 2.0, %v7449_v5  ;;  %7458 = vrcp.f32 %v4548_v59  ;;  %v4546_v8 = vpop.xlane.xlu0 %4545  ;;  %v10654_v59 = vld [vmem:[#allocation72_spill] sm:$0xff] }
 0x494   : > { %v4614_v0 = vmul.f32 %v4598_v33, %v4582_v9  ;;  %7460 = vrcp.f32 %v4546_v8  ;;  %v4638_v25 = vsel %vm4632_vm0, %v9776_v62, %v10654_v59  ;;  %v10655_v8 = vld [vmem:[#allocation74_spill] sm:$0xff]  ;;  %v4603_v62 = vmul.f32 %v9875_v14, %v9792_v15 }
 0x495   : > { %v7451_v12 = vpop.eup %7450  ;;  %v4613_v37 = vmul.f32 %v4597_v63, %v4581_v61  ;;  %v4637_v57 = vsel %vm4632_vm0, %v9780_v28, %v10655_v8 }
 0x496   : > { %v7453_v36 = vpop.eup %7452  ;;  %v4650_v38 = vsel %vm4631_vm1, %v4614_v0, %v4634_v21  ;;  %v4584_v30 = vmul.f32 2.0, %v7451_v12  ;;  %v4552_v34 = vpop.xlane.xlu1 %4551  ;;  %v4604_v12 = vmul.f32 %v9872_v23, %v9788_v27 }
 0x497   : > { %4666 = vst [vmem:[%s9963_s14 + $0x8] sm:$0xff] %v4650_v38  ;;  %v4649_v4 = vsel %vm4631_vm1, %v4613_v37, %v4633_v17  ;;  %v4583_v54 = vmul.f32 2.0, %v7453_v36  ;;  %7462 = vrcp.f32 %v4552_v34  ;;  %v4550_v58 = vpop.xlane.xlu0 %4549  ;;  %v10656_v38 = vld [vmem:[#allocation75_spill] sm:$0xff]  ;;  %v10657_v34 = vld [vmem:[#allocation80_spill] sm:$0xff] }
 0x498   : > { %4665 = vst [vmem:[%s9963_s14] sm:$0xff] %v4649_v4  ;;  %v4616_v1 = vmul.f32 %v4600_v29, %v4584_v30  ;;  %7464 = vrcp.f32 %v4550_v58  ;;  %v4640_v23 = vsel %vm4632_vm0, %v9788_v27, %v10656_v38  ;;  %v4639_v14 = vsel %vm4632_vm0, %v9792_v15, %v10657_v34  ;;  %v10664_v38 = vld [vmem:[#allocation93_spill] sm:$0xff] }
 0x499   : > { %v7455_v47 = vpop.eup %7454  ;;  %v4615_v19 = vmul.f32 %v4599_v32, %v4583_v54  ;;  %v4606_v32 = vmul.f32 %v9880_v56, %v9800_v49  ;;  %v4605_v27 = vmul.f32 %v9882_v35, %v9804_v51 }
 0x49a   : > { %v7457_v43 = vpop.eup %7456  ;;  %v4652_v42 = vsel %vm4631_vm1, %v4616_v1, %v4636_v7  ;;  %v4586_v11 = vmul.f32 2.0, %v7455_v47  ;;  %v4556_v26 = vpop.xlane.xlu1 %4555 }
 0x49b   : > { %4668 = vst [vmem:[%s9963_s14 + $0x18] sm:$0xff] %v4652_v42  ;;  %v4651_v46 = vsel %vm4631_vm1, %v4615_v19, %v4635_v52  ;;  %v4585_v5 = vmul.f32 2.0, %v7457_v43  ;;  %7466 = vrcp.f32 %v4556_v26  ;;  %v4554_v33 = vpop.xlane.xlu0 %4553  ;;  %v10658_v19 = vld [vmem:[#allocation82_spill] sm:$0xff]  ;;  %v10659_v52 = vld [vmem:[#allocation83_spill] sm:$0xff] }
 0x49c   : > { %4667 = vst [vmem:[%s9963_s14 + $0x10] sm:$0xff] %v4651_v46  ;;  %v4618_v6 = vmul.f32 %v4602_v55, %v4586_v11  ;;  %7468 = vrcp.f32 %v4554_v33  ;;  %v4642_v56 = vsel %vm4632_vm0, %v9800_v49, %v10658_v19  ;;  %v4641_v35 = vsel %vm4632_vm0, %v9804_v51, %v10659_v52 }
 0x49d   : > { %v7459_v9 = vpop.eup %7458  ;;  %v4617_v63 = vmul.f32 %v4601_v16, %v4585_v5  ;;  %v4608_v55 = vmul.f32 %v9886_v13, %v9812_v22  ;;  %v4607_v49 = vmul.f32 %v9888_v45, %v9816_v50  ;;  %v10660_v5 = vld [vmem:[#allocation87_spill] sm:$0xff] }
 0x49e   : > { %v7461_v61 = vpop.eup %7460  ;;  %v4654_v0 = vsel %vm4631_vm1, %v4618_v6, %v4638_v25  ;;  %v4588_v40 = vmul.f32 2.0, %v7459_v9  ;;  %v4560_v21 = vpop.xlane.xlu1 %4559  ;;  %v4644_v33 = vsel %vm4632_vm0, %v9812_v22, %v10660_v5  ;;  %v10661_v9 = vld [vmem:[#allocation89_spill] sm:$0xff]  ;;  %v4610_v25 = vmul.f32 %v9892_v31, %v9824_v41 }
 0x49f   : > { %4670 = vst [vmem:[%s9963_s14 + $0x28] sm:$0xff] %v4654_v0  ;;  %v4653_v37 = vsel %vm4631_vm1, %v4617_v63, %v4637_v57  ;;  %v4587_v36 = vmul.f32 2.0, %v7461_v61  ;;  %7470 = vrcp.f32 %v4560_v21  ;;  %v4558_v10 = vpop.xlane.xlu0 %4557  ;;  %v4643_v59 = vsel %vm4632_vm0, %v9816_v50, %v10661_v9  ;;  %v10662_v0 = vld [vmem:[#allocation90_spill] sm:$0xff]  ;;  %v10663_v21 = vld [vmem:[#allocation91_spill] sm:$0xff] }
 0x4a0   : > { %4669 = vst [vmem:[%s9963_s14 + $0x20] sm:$0xff] %v4653_v37  ;;  %v4620_v28 = vmul.f32 %v4604_v12, %v4588_v40  ;;  %7472 = vrcp.f32 %v4558_v10  ;;  %v4609_v22 = vmul.f32 %v9894_v44, %v9828_v53  ;;  %v4646_v31 = vsel %vm4632_vm0, %v9824_v41, %v10662_v0 }
 0x4a1   : > { %v7463_v17 = vpop.eup %7462  ;;  %v4619_v29 = vmul.f32 %v4603_v62, %v4587_v36  ;;  %v4645_v37 = vsel %vm4632_vm0, %v9828_v53, %v10663_v21  ;;  %v4612_v62 = vmul.f32 %v9898_v60, %v9834_v2  ;;  %v4611_v10 = vmul.f32 %v9900_v18, %v9836_v48 }
 0x4a2   : > { %v7465_v30 = vpop.eup %7464  ;;  %v4656_v4 = vsel %vm4631_vm1, %v4620_v28, %v4640_v23  ;;  %v4590_v54 = vmul.f32 2.0, %v7463_v17  ;;  %v4564_v58 = vpop.xlane.xlu1 %4563  ;;  %v4648_v60 = vsel %vm4632_vm0, %v9834_v2, %v9330_v20  ;;  %v4647_v23 = vsel %vm4632_vm0, %v9836_v48, %v10664_v38 }
 0x4a3   : > { %4672 = vst [vmem:[%s9963_s14 + $0x38] sm:$0xff] %v4656_v4  ;;  %v4655_v1 = vsel %vm4631_vm1, %v4619_v29, %v4639_v14  ;;  %v4589_v47 = vmul.f32 2.0, %v7465_v30  ;;  %7474 = vrcp.f32 %v4564_v58  ;;  %v4562_v24 = vpop.xlane.xlu0 %4561 }
 0x4a4   : > { %4671 = vst [vmem:[%s9963_s14 + $0x30] sm:$0xff] %v4655_v1  ;;  %v4622_v15 = vmul.f32 %v4606_v32, %v4590_v54  ;;  %7476 = vrcp.f32 %v4562_v24 }
 0x4a5   : > { %v7467_v7 = vpop.eup %7466  ;;  %v4621_v43 = vmul.f32 %v4605_v27, %v4589_v47 }
 0x4a6   : > { %v7469_v3 = vpop.eup %7468  ;;  %v4658_v42 = vsel %vm4631_vm1, %v4622_v15, %v4642_v56  ;;  %v4592_v11 = vmul.f32 2.0, %v7467_v7 }
 0x4a7   : > { %4674 = vst [vmem:[%s9963_s14 + $0x48] sm:$0xff] %v4658_v42  ;;  %v4657_v26 = vsel %vm4631_vm1, %v4621_v43, %v4641_v35  ;;  %v4591_v46 = vmul.f32 2.0, %v7469_v3 }
 0x4a8   : > { %4673 = vst [vmem:[%s9963_s14 + $0x40] sm:$0xff] %v4657_v26  ;;  %v4624_v16 = vmul.f32 %v4608_v55, %v4592_v11 }
 0x4a9   : > { %v7471_v51 = vpop.eup %7470  ;;  %v4623_v13 = vmul.f32 %v4607_v49, %v4591_v46 }
 0x4aa   : > { %v7473_v6 = vpop.eup %7472  ;;  %v4660_v45 = vsel %vm4631_vm1, %v4624_v16, %v4644_v33  ;;  %v4594_v63 = vmul.f32 2.0, %v7471_v51 }
 0x4ab   : > { %4676 = vst [vmem:[%s9963_s14 + $0x58] sm:$0xff] %v4660_v45  ;;  %v4659_v61 = vsel %vm4631_vm1, %v4623_v13, %v4643_v59  ;;  %v4593_v8 = vmul.f32 2.0, %v7473_v6 }
 0x4ac   : > { %4675 = vst [vmem:[%s9963_s14 + $0x50] sm:$0xff] %v4659_v61  ;;  %v4626_v50 = vmul.f32 %v4610_v25, %v4594_v63 }
 0x4ad   : > { %v7475_v57 = vpop.eup %7474  ;;  %v4625_v12 = vmul.f32 %v4609_v22, %v4593_v8 }
 0x4ae   : > { %v7477_v40 = vpop.eup %7476  ;;  %v4662_v44 = vsel %vm4631_vm1, %v4626_v50, %v4646_v31  ;;  %v4596_v36 = vmul.f32 2.0, %v7475_v57 }
 0x4af   : > { %4678 = vst [vmem:[%s9963_s14 + $0x68] sm:$0xff] %v4662_v44  ;;  %v4661_v41 = vsel %vm4631_vm1, %v4625_v12, %v4645_v37  ;;  %v4595_v28 = vmul.f32 2.0, %v7477_v40 }
 0x4b0   : > { %4677 = vst [vmem:[%s9963_s14 + $0x60] sm:$0xff] %v4661_v41  ;;  %v4628_v53 = vmul.f32 %v4612_v62, %v4596_v36 }
 0x4b1   : > { %v4627_v17 = vmul.f32 %v4611_v10, %v4595_v28 }
 0x4b2   : > { %v4664_v29 = vsel %vm4631_vm1, %v4628_v53, %v4648_v60 }
 0x4b3   : > { %4680 = vst [vmem:[%s9963_s14 + $0x78] sm:$0xff] %v4664_v29  ;;  %v4663_v20 = vsel %vm4631_vm1, %v4627_v17, %v4647_v23 }
 0x4b4   : > { %4679 = vst [vmem:[%s9963_s14 + $0x70] sm:$0xff] %v4663_v20 }
 0x4b5   : > { %7633 = shalt.err (!%p7630_p11)
}
 0x4b6   : > { %s7634_s25 = scalar_lea.hbm %s10095_s21, 2048  ;;  %s7638_s14 = scalar_lea.hbm %s10155_s7, 4096 }
 0x4b7   : > { %p7635_p8 = scmp.ne.s32.totalorder %s10095_s21, %s7634_s25  ;;  %p7639_p10 = scmp.lt.u32.totalorder %s10095_s21, %s10155_s7 }
 0x4b8   : > { %p7640_p3 = scmp.lt.u32.totalorder %s7638_s14, %s7634_s25  ;;  %p7642_p12 = scmp.lt.u32.totalorder %s7634_s25, %s10095_s21 }
 0x4b9   : > { %p7636_p13 = pnand %p7635_p8, %p7909_p5 }
 0x4ba   : > { %p7641_p7 = por %p7640_p3, %p7639_p10 }
 0x4bb   : > { %p7637_p6 = pneg %p7636_p13 }
 0x4bc   : > { %p7643_p1 = por %p7642_p12, %p7641_p7 }
 0x4be   : > { %p7644_p2 = pnand %p7643_p1, %p7637_p6 }
 0x4c0   : > { %7647 = shalt.err (!%p7644_p2)
}
 0x4c1   : > { %7342 = dma.vmem_to_hbm [thread:$0]  (%p7909_p5), %s10097_s10, 2048, %s10095_s21, %s4698_s17, %s7707_s11, %s7707_s11, %s7708_s19  }
 0x4c2 PF: > { %s10665_s18 = sld [smem:[#allocation18_spill]]  ;;  %s10666_s9 = sld [smem:[#allocation19_spill]] }
 0x4c3   : > { %p10668_p9 = scmp.ge.s32.totalorder %s7698_s30, 2 }
 0x4c8   : > { %s4747_s16 = sand.u32 1, %s10665_s18   ;;  %p10667_p4 = scmp.ne.s32.totalorder %s10666_s9, 0 }
 0x4c9   : > { %s4748_s24 = scalar_lea.sflag [#allocation4], %s4747_s16 }
 0x4ca   : > { %p7361_p0 = pnand %p10668_p9, %p10667_p4 }
 0x4cc   : > { %7677 = dma.done.wait (!%p7361_p0), %s4748_s24, 2048  }
 0x4cd   : > { %7679 = vsyncadd (!%p7361_p0), %s4748_s24, 4294965248  ;;  %s4757_s23 = scalar_lea.sflag [#allocation12], %s4747_s16 }
 0x4ce   : > { %7681 = dma.done.wait (!%p7361_p0), %s4757_s23, 2048  }
 0x4cf   : > { %7683 = vsyncadd (!%p7361_p0), %s4757_s23, 4294965248  ;;  %p27_p5 = scmp.ge.s32.totalorder %s7895_s26, 4   ;;  %s10669_s27 = smov %s7690_s28 }
 0x4d0   : > { %s10670_s28 = smov %s7694_s29  ;;  %s10671_s29 = smov %s7905_s22 }
 0x4d1   : > { %s10672_s30 = smov %s7895_s26  ;;  %29 = sbr.rel (!%p27_p5) target bundleno = 9 (0x9), region = 122 }
 0x4d8   :  { %4762 = vsyncpa [#allocation3], 1 }
 0x4d9   :  { %4764 = vsyncpa [#allocation3 + $0x1], 1 }
 0x4da   :  { %4765 = vsyncpa [#allocation6], 1 }
 0x4db   :  { %4766 = vsyncpa [#allocation9], 1 }
 0x4dc   :  { %4767 = vsyncpa [#allocation4], 1 }
 0x4dd   :  { %4769 = vsyncpa [#allocation4 + $0x1], 1 }
 0x4de   :  { %4770 = vsyncpa [#allocation12], 1 }
 0x4df   :  { %4772 = vsyncpa [#allocation12 + $0x1], 1 }

</bundles_post_ra>
